<compile_context>
chip_gen: v7x
topology: tpu7x:2x2x1
jax: 0.10.0
libtpu: 0.0.40
codegen_flags: <defaults>
</compile_context>

<pallas_src>
import functools

import jax
import jax.numpy as jnp
from jax import lax
from jax.experimental import pallas as pl
from jax.experimental.pallas import tpu as pltpu

EPS = 1e-5
LANE = 128


def _round_up(x, m):
    return ((x + m - 1) // m) * m


@functools.lru_cache(maxsize=1)
def _vmem_limit_bytes():
    # Generation-aware scoped-VMEM budget: ~3/4 of physical, capped at 64 MiB.
    # v5e/v6e (128 MiB phys) -> 64 MiB; v7x (64 MiB phys) -> 48 MiB; fallback 48 MiB.
    try:
        cap = int(pltpu.get_tpu_info().vmem_capacity_bytes)
        return int(max(32 << 20, min((cap * 3) // 4, 64 << 20)))
    except Exception:
        return 48 << 20


def _cparams(n_axes=1):
    return pltpu.CompilerParams(
        dimension_semantics=("parallel",) * n_axes,
        vmem_limit_bytes=_vmem_limit_bytes(),
    )


def _pick_group(n_images, hw, target_rows):
    """Largest g dividing n_images with (g*hw) % 8 == 0 and g*hw <= target_rows.
    Falls back to g = n_images (block == full row extent, always layout-legal)."""
    divs = [g for g in range(1, n_images + 1) if n_images % g == 0]
    ok = [g for g in divs if (g * hw) % 8 == 0]
    if not ok:
        return n_images
    within = [g for g in ok if g * hw <= target_rows]
    return max(within) if within else min(ok)


def _partial_stats(hq):
    """(1, 2, C) f32 [sum; sum of squares] of a bf16 tile (as seen by downstream)."""
    hf = hq.astype(jnp.float32)
    return jnp.concatenate(
        [jnp.sum(hf, axis=0, keepdims=True),
         jnp.sum(hf * hf, axis=0, keepdims=True)], axis=0)[None]


# ----------------------------------------------------------------------------
# Kernels
# ----------------------------------------------------------------------------
def _conv1_kernel(x_ref, w_ref, h_ref, st_ref):
    # x: (TM, Cin_p) f32 ; w: (Cin_p, Pp) bf16 ; h: (TM, Pp) bf16 ; st: (1, 2, Pp) f32
    h = jnp.dot(x_ref[...].astype(jnp.bfloat16), w_ref[...],
                preferred_element_type=jnp.float32)
    hq = h.astype(jnp.bfloat16)
    h_ref[...] = hq
    st_ref[...] = _partial_stats(hq)


def _conv2_kernel(h1_ref, sc_ref, sh_ref, w2_ref, h2_ref, st_ref, apad_ref,
                  *, H, W, C):
    # One image per grid step.  bn1 + relu (folded scale/shift, f32 math) and the
    # spatial zero-pad are fused here, so the bn1 activation never touches HBM.
    Hp, Wp = H + 2, W + 2
    a = jnp.maximum(h1_ref[0].astype(jnp.float32) * sc_ref[...] + sh_ref[...], 0.0)

    # Zero the 1-pixel border every step (cheap, megacore-safe), write the centre.
    apad_ref[0:1, :, :] = jnp.zeros((1, Wp, C), jnp.float32)
    apad_ref[H + 1:Hp, :, :] = jnp.zeros((1, Wp, C), jnp.float32)
    apad_ref[:, 0:1, :] = jnp.zeros((Hp, 1, C), jnp.float32)
    apad_ref[:, W + 1:Wp, :] = jnp.zeros((Hp, 1, C), jnp.float32)
    apad_ref[1:H + 1, 1:W + 1, :] = a.reshape(H, W, C)

    ap = apad_ref[...]
    acc = jnp.zeros((H * W, C), jnp.float32)
    # 3x3 conv as 9 statically-unrolled accumulated bf16 matmuls (no im2col in HBM).
    # TODO(synk): cut the window-relayout traffic via roll-based shifted accumulation.
    for dy in range(3):
        for dx in range(3):
            win = ap[dy:dy + H, dx:dx + W, :].reshape(H * W, C)
            acc = acc + jnp.dot(win.astype(jnp.bfloat16), w2_ref[dy, dx],
                                preferred_element_type=jnp.float32)
    hq = acc.astype(jnp.bfloat16)
    h2_ref[...] = hq[None]
    st_ref[...] = _partial_stats(hq)


def _conv3_kernel(h2_ref, w_ref, sc_ref, sh_ref, h_ref, st_ref):
    # bn2 + relu fused into conv3's prologue (f32 math, bf16 matmul operands).
    a = jnp.maximum(h2_ref[...].astype(jnp.float32) * sc_ref[...] + sh_ref[...], 0.0)
    h = jnp.dot(a.astype(jnp.bfloat16), w_ref[...],
                preferred_element_type=jnp.float32)
    hq = h.astype(jnp.bfloat16)
    h_ref[...] = hq
    st_ref[...] = _partial_stats(hq)


def _finalize_kernel(h3_ref, res_ref, sc_ref, sh_ref, o_ref):
    # bn3 (folded) + identity residual + relu, all in f32.
    o_ref[...] = jnp.maximum(
        h3_ref[...].astype(jnp.float32) * sc_ref[...] + sh_ref[...] + res_ref[...],
        0.0)


# ----------------------------------------------------------------------------
# pallas_call builders
# ----------------------------------------------------------------------------
def _call_conv1(x2d, w1_b, tm):
    M, Cin_p = x2d.shape
    Pp = w1_b.shape[1]
    T = M // tm
    return pl.pallas_call(
        _conv1_kernel,
        out_shape=(jax.ShapeDtypeStruct((M, Pp), jnp.bfloat16),
                   jax.ShapeDtypeStruct((T, 2, Pp), jnp.float32)),
        grid=(T,),
        in_specs=[pl.BlockSpec((tm, Cin_p), lambda i: (i, 0)),
                  pl.BlockSpec((Cin_p, Pp), lambda i: (0, 0))],
        out_specs=(pl.BlockSpec((tm, Pp), lambda i: (i, 0)),
                   pl.BlockSpec((1, 2, Pp), lambda i: (i, 0, 0))),
        compiler_params=_cparams(),
    )(x2d, w1_b)


def _call_conv2(h1_3d, w2_b, scale1, shift1, H, W):
    N, HW, Pp = h1_3d.shape
    kern = functools.partial(_conv2_kernel, H=H, W=W, C=Pp)
    return pl.pallas_call(
        kern,
        out_shape=(jax.ShapeDtypeStruct((N, HW, Pp), jnp.bfloat16),
                   jax.ShapeDtypeStruct((N, 2, Pp), jnp.float32)),
        grid=(N,),
        in_specs=[pl.BlockSpec((1, HW, Pp), lambda n: (n, 0, 0)),
                  pl.BlockSpec((1, Pp), lambda n: (0, 0)),
                  pl.BlockSpec((1, Pp), lambda n: (0, 0)),
                  pl.BlockSpec((3, 3, Pp, Pp), lambda n: (0, 0, 0, 0))],
        out_specs=(pl.BlockSpec((1, HW, Pp), lambda n: (n, 0, 0)),
                   pl.BlockSpec((1, 2, Pp), lambda n: (n, 0, 0))),
        scratch_shapes=[pltpu.VMEM((H + 2, W + 2, Pp), jnp.float32)],
        compiler_params=_cparams(),
    )(h1_3d, scale1, shift1, w2_b)


def _call_conv3(h2_flat, w3_b, scale2, shift2, tm):
    M, Pp = h2_flat.shape
    C4p = w3_b.shape[1]
    T = M // tm
    return pl.pallas_call(
        _conv3_kernel,
        out_shape=(jax.ShapeDtypeStruct((M, C4p), jnp.bfloat16),
                   jax.ShapeDtypeStruct((T, 2, C4p), jnp.float32)),
        grid=(T,),
        in_specs=[pl.BlockSpec((tm, Pp), lambda i: (i, 0)),
                  pl.BlockSpec((Pp, C4p), lambda i: (0, 0)),
                  pl.BlockSpec((1, Pp), lambda i: (0, 0)),
                  pl.BlockSpec((1, Pp), lambda i: (0, 0))],
        out_specs=(pl.BlockSpec((tm, C4p), lambda i: (i, 0)),
                   pl.BlockSpec((1, 2, C4p), lambda i: (i, 0, 0))),
        compiler_params=_cparams(),
    )(h2_flat, w3_b, scale2, shift2)


def _call_finalize(h3_flat, res_flat, scale3, shift3, tm):
    M, C4p = h3_flat.shape
    T = M // tm
    return pl.pallas_call(
        _finalize_kernel,
        out_shape=jax.ShapeDtypeStruct((M, C4p), jnp.float32),
        grid=(T,),
        in_specs=[pl.BlockSpec((tm, C4p), lambda i: (i, 0)),
                  pl.BlockSpec((tm, C4p), lambda i: (i, 0)),
                  pl.BlockSpec((1, C4p), lambda i: (0, 0)),
                  pl.BlockSpec((1, C4p), lambda i: (0, 0))],
        out_specs=pl.BlockSpec((tm, C4p), lambda i: (i, 0)),
        compiler_params=_cparams(),
    )(h3_flat, res_flat, scale3, shift3)


# ----------------------------------------------------------------------------
# BN stat combination (tiny JAX): partial sums -> folded per-channel scale/shift
# ----------------------------------------------------------------------------
def _fold_bn(stats, count, gamma_p, beta_p):
    s = jnp.sum(stats[:, 0, :], axis=0)
    q = jnp.sum(stats[:, 1, :], axis=0)
    mean = s / count
    # NOTE: one-pass sum/sumsq can cancel when |mean| >> std; acceptable here since
    # the activations are conv outputs of ~zero-mean inputs (f32 accumulation).
    var = jnp.maximum(q / count - mean * mean, 0.0)
    scale = gamma_p * lax.rsqrt(var + EPS)
    shift = beta_p - mean * scale
    return scale.reshape(1, -1), shift.reshape(1, -1)   # padded channels -> (0, 0)


# ----------------------------------------------------------------------------
# Bottleneck forward (wrapper).  Input/output: NCHW float32, like PyTorch.
# ----------------------------------------------------------------------------
@functools.partial(jax.jit, static_argnames=("tile_rows",))
def bottleneck_forward(x_nchw, params, tile_rows=1024):
    w1, g1, b1 = params["w1"], params["g1"], params["b1"]
    w2, g2, b2 = params["w2"], params["g2"], params["b2"]
    w3, g3, b3 = params["w3"], params["g3"], params["b3"]

    N, Cin, H, W = x_nchw.shape
    P = w1.shape[0]                 # planes
    C4 = w3.shape[0]                # planes * 4
    assert C4 == Cin, "identity residual requires inplanes == planes * 4"
    HW = H * W
    M = N * HW

    Cin_p = _round_up(Cin, LANE)
    Pp = _round_up(P, LANE)
    C4p = _round_up(C4, LANE)

    # Row tiling: whole images per block (exact, no padding / masking).  Cap the
    # per-block rows so the widest f32 buffer stays ~<= 4 MiB.
    budget_rows = max(256, (4 << 20) // (4 * max(Cin_p, Pp, C4p)))
    target = max(HW, min(tile_rows, budget_rows))
    g = _pick_group(N, HW, target)
    tm = g * HW

    # --- layout glue: NCHW -> channels-last flat (M, Cin_p); same buffer doubles
    #     as the f32 residual for the finalize kernel. -------------------------
    x2d = jnp.pad(jnp.transpose(x_nchw, (0, 2, 3, 1)).reshape(M, Cin),
                  ((0, 0), (0, Cin_p - Cin)))

    # --- weights / BN affine params: channels-last, zero-padded, weights bf16 --
    w1_b = jnp.pad(jnp.transpose(w1[:, :, 0, 0], (1, 0)),
                   ((0, Cin_p - Cin), (0, Pp - P))).astype(jnp.bfloat16)
    w2_b = jnp.pad(jnp.transpose(w2, (2, 3, 1, 0)),          # (kh, kw, cin, cout)
                   ((0, 0), (0, 0), (0, Pp - P), (0, Pp - P))).astype(jnp.bfloat16)
    w3_b = jnp.pad(jnp.transpose(w3[:, :, 0, 0], (1, 0)),
                   ((0, Pp - P), (0, C4p - C4))).astype(jnp.bfloat16)
    g1p, b1p = jnp.pad(g1, (0, Pp - P)), jnp.pad(b1, (0, Pp - P))
    g2p, b2p = jnp.pad(g2, (0, Pp - P)), jnp.pad(b2, (0, Pp - P))
    g3p, b3p = jnp.pad(g3, (0, C4p - C4)), jnp.pad(b3, (0, C4p - C4))

    # --- conv1 (1x1) -> bf16 h1 + batch-stat partials --------------------------
    h1_flat, st1 = _call_conv1(x2d, w1_b, tm)
    scale1, shift1 = _fold_bn(st1, M, g1p, b1p)

    # --- conv2 (3x3, pad 1) with bn1+relu+zero-pad fused into its prologue -----
    h2_3d, st2 = _call_conv2(h1_flat.reshape(N, HW, Pp), w2_b, scale1, shift1, H, W)
    scale2, shift2 = _fold_bn(st2, M, g2p, b2p)

    # --- conv3 (1x1) with bn2+relu fused into its prologue ---------------------
    h3_flat, st3 = _call_conv3(h2_3d.reshape(M, Pp), w3_b, scale2, shift2, tm)
    scale3, shift3 = _fold_bn(st3, M, g3p, b3p)

    # --- bn3 + identity residual + relu (f32) ----------------------------------
    out_flat = _call_finalize(h3_flat, x2d, scale3, shift3, tm)

    out = out_flat.reshape(N, H, W, C4p)[:, :, :, :C4]
    return jnp.transpose(out, (0, 3, 1, 2))                  # NHWC -> NCHW


# ----------------------------------------------------------------------------
# References for the self-check
# ----------------------------------------------------------------------------
def _bn_train(x, gamma, beta):
    mean = jnp.mean(x, axis=(0, 1, 2))
    var = jnp.mean(jnp.square(x - mean), axis=(0, 1, 2))
    return (x - mean) * lax.rsqrt(var + EPS) * gamma + beta


def bottleneck_reference_f32(x_nchw, params):
    """Pure-f32 (HIGHEST precision) reference of the PyTorch forward."""
    dn = ("NHWC", "HWIO", "NHWC")
    hi = jax.lax.Precision.HIGHEST
    w1 = jnp.transpose(params["w1"], (2, 3, 1, 0))
    w2 = jnp.transpose(params["w2"], (2, 3, 1, 0))
    w3 = jnp.transpose(params["w3"], (2, 3, 1, 0))
    x = jnp.transpose(x_nchw, (0, 2, 3, 1))
    h = lax.conv_general_dilated(x, w1, (1, 1), "SAME", dimension_numbers=dn,
                                 precision=hi)
    h = jnp.maximum(_bn_train(h, params["g1"], params["b1"]), 0.0)
    h = lax.conv_general_dilated(h, w2, (1, 1), "SAME", dimension_numbers=dn,
                                 precision=hi)
    h = jnp.maximum(_bn_train(h, params["g2"], params["b2"]), 0.0)
    h = lax.conv_general_dilated(h, w3, (1, 1), "SAME", dimension_numbers=dn,
                                 precision=hi)
    h = _bn_train(h, params["g3"], params["b3"])
    out = jnp.maximum(h + x, 0.0)
    return jnp.transpose(out, (0, 3, 1, 2))


def bottleneck_reference_matched(x_nchw, params):
    """Mirrors the kernel's precision choices: bf16 conv operands + bf16
    inter-stage activations, f32 accumulation and f32 BN/ReLU/residual math."""
    dn = ("NHWC", "HWIO", "NHWC")
    q = lambda t: t.astype(jnp.bfloat16).astype(jnp.float32)

    def conv(x, w):
        return lax.conv_general_dilated(
            x.astype(jnp.bfloat16), w.astype(jnp.bfloat16), (1, 1), "SAME",
            dimension_numbers=dn, preferred_element_type=jnp.float32)

    w1 = jnp.transpose(params["w1"], (2, 3, 1, 0))
    w2 = jnp.transpose(params["w2"], (2, 3, 1, 0))
    w3 = jnp.transpose(params["w3"], (2, 3, 1, 0))
    x = jnp.transpose(x_nchw, (0, 2, 3, 1))
    h = q(conv(x, w1))
    h = jnp.maximum(_bn_train(h, params["g1"], params["b1"]), 0.0)
    h = q(conv(h, w2))
    h = jnp.maximum(_bn_train(h, params["g2"], params["b2"]), 0.0)
    h = q(conv(h, w3))
    h = _bn_train(h, params["g3"], params["b3"])
    out = jnp.maximum(h + x, 0.0)
    return jnp.transpose(out, (0, 3, 1, 2))


# ----------------------------------------------------------------------------
if __name__ == "__main__":
    def make_params(key, inplanes, planes):
        k = jax.random.split(key, 9)
        return {
            "w1": 0.1 * jax.random.normal(k[0], (planes, inplanes, 1, 1), jnp.float32),
            "w2": 0.1 * jax.random.normal(k[1], (planes, planes, 3, 3), jnp.float32),
            "w3": 0.1 * jax.random.normal(k[2], (planes * 4, planes, 1, 1), jnp.float32),
            "g1": 1.0 + 0.1 * jax.random.normal(k[3], (planes,), jnp.float32),
            "b1": 0.1 * jax.random.normal(k[4], (planes,), jnp.float32),
            "g2": 1.0 + 0.1 * jax.random.normal(k[5], (planes,), jnp.float32),
            "b2": 0.1 * jax.random.normal(k[6], (planes,), jnp.float32),
            "g3": 1.0 + 0.1 * jax.random.normal(k[7], (planes * 4,), jnp.float32),
            "b3": 0.1 * jax.random.normal(k[8], (planes * 4,), jnp.float32),
        }

    def check(x, params, tile_rows):
        out = jax.block_until_ready(bottleneck_forward(x, params, tile_rows=tile_rows))
        assert bool(jnp.all(jnp.isfinite(out)))
        # Tight check against a precision-matched reference (bf16 operands / activations).
        ref_m = bottleneck_reference_matched(x, params)
        assert jnp.allclose(out, ref_m, atol=2e-3, rtol=2e-3), \
            float(jnp.max(jnp.abs(out - ref_m)))
        # Loose semantic check against the pure-f32 reference (bf16 MXU error budget).
        ref_f = bottleneck_reference_f32(x, params)
        rel = float(jnp.linalg.norm(out - ref_f) / (jnp.linalg.norm(ref_f) + 1e-12))
        assert rel < 4e-2, rel
        return out

    planes = 4
    inplanes = planes * 4  # identity residual requires inplanes == planes*4
    key = jax.random.PRNGKey(0)

    # Case 1: N=2, 16x16 -> tile_rows=256 forces one image per row tile (2-step grid),
    # exercising multi-tile BN-stat combination.
    k1, k2, key = jax.random.split(key, 3)
    params = make_params(k1, inplanes, planes)
    x = jax.random.normal(k2, (2, inplanes, 16, 16), jnp.float32)
    out = check(x, params, tile_rows=256)
    assert out.shape == (2, inplanes, 16, 16), out.shape

    # Case 2: N=3, 8x8 -> default tiling groups all images into a single row tile.
    k3, k4, key = jax.random.split(key, 3)
    params2 = make_params(k3, inplanes, planes)
    x2 = jax.random.normal(k4, (3, inplanes, 8, 8), jnp.float32)
    out2 = check(x2, params2, tile_rows=1024)
    assert out2.shape == (3, inplanes, 8, 8), out2.shape

    print("KERNEL_OK")
</pallas_src>

<mosaic_0001>
module attributes {stable_mosaic.version = 11 : i64} {
  func.func @_conv1_kernel(%arg0: i32, %arg1: memref<256x128xf32, #tpu.memory_space<vmem>>, %arg2: memref<128x128xbf16, #tpu.memory_space<vmem>>, %arg3: memref<256x128xbf16, #tpu.memory_space<vmem>>, %arg4: memref<1x2x128xf32, #tpu.memory_space<vmem>>) attributes {dimension_semantics = [#tpu.dimension_semantics<parallel>], iteration_bounds = array<i64: 2>, scalar_prefetch = 0 : i64, scratch_operands = 0 : i64, tpu.core_type = #tpu.core_type<tc>, window_params = [{transform_indices = @transform_0, window_bounds = array<i64: 256, 128>}, {pipeline_mode = #tpu.pipeline_mode<synchronous>, transform_indices = @transform_1, window_bounds = array<i64: 128, 128>}, {transform_indices = @transform_2, window_bounds = array<i64: 256, 128>}, {transform_indices = @transform_3, window_bounds = array<i64: 1, 2, 128>}]} {
    %c0 = arith.constant 0 : index
    %c0_0 = arith.constant 0 : index
    %0 = vector.load %arg1[%c0, %c0_0] : memref<256x128xf32, #tpu.memory_space<vmem>>, vector<256x128xf32>
    %1 = arith.truncf %0 : vector<256x128xf32> to vector<256x128xbf16>
    %c0_1 = arith.constant 0 : index
    %c0_2 = arith.constant 0 : index
    %2 = vector.load %arg2[%c0_1, %c0_2] : memref<128x128xbf16, #tpu.memory_space<vmem>>, vector<128x128xbf16>
    %cst = arith.constant dense<0.000000e+00> : vector<256x128xf32>
    %3 = tpu.matmul %1, %2, %cst {dimension_numbers = #tpu.dot_dimension_numbers<[1], [0], [0], [1], [0, 0, 1, 1], [], []>} : vector<256x128xbf16>, vector<128x128xbf16>, vector<256x128xf32> -> vector<256x128xf32>
    %4 = arith.truncf %3 : vector<256x128xf32> to vector<256x128xbf16>
    %c0_3 = arith.constant 0 : index
    %c0_4 = arith.constant 0 : index
    %5 = vector.load %arg3[%c0_3, %c0_4] : memref<256x128xbf16, #tpu.memory_space<vmem>>, vector<256x128xbf16>
    tpu.vector_store %arg3[%c0_3, %c0_4], %4 {strides = array<i32>} : memref<256x128xbf16, #tpu.memory_space<vmem>>, vector<256x128xbf16>,
    %6 = arith.extf %4 : vector<256x128xbf16> to vector<256x128xf32>
    %cst_5 = arith.constant dense<0.000000e+00> : vector<128xf32>
    %7 = vector.multi_reduction <add>, %6, %cst_5 [0] : vector<256x128xf32> to vector<128xf32>
    %8 = vector.shape_cast %7 : vector<128xf32> to vector<1x128xf32>
    %9 = arith.mulf %6, %6 : vector<256x128xf32>
    %cst_6 = arith.constant dense<0.000000e+00> : vector<128xf32>
    %10 = vector.multi_reduction <add>, %9, %cst_6 [0] : vector<256x128xf32> to vector<128xf32>
    %11 = vector.shape_cast %10 : vector<128xf32> to vector<1x128xf32>
    %12 = tpu.concatenate %8, %11 in 0 : vector<1x128xf32>, vector<1x128xf32> -> vector<2x128xf32>
    %13 = vector.shape_cast %12 : vector<2x128xf32> to vector<1x2x128xf32>
    %c0_7 = arith.constant 0 : index
    %c0_8 = arith.constant 0 : index
    %c0_9 = arith.constant 0 : index
    %14 = vector.load %arg4[%c0_7, %c0_8, %c0_9] : memref<1x2x128xf32, #tpu.memory_space<vmem>>, vector<1x2x128xf32>
    tpu.vector_store %arg4[%c0_7, %c0_8, %c0_9], %13 {strides = array<i32>} : memref<1x2x128xf32, #tpu.memory_space<vmem>>, vector<1x2x128xf32>,
    return
  }
  func.func @transform_0(%arg0: i32) -> (i32, i32) {
    %c0_i32 = arith.constant 0 : i32
    %c0_i32_0 = arith.constant 0 : i32
    return %arg0, %c0_i32 : i32, i32
  }
  func.func @transform_1(%arg0: i32) -> (i32, i32) {
    %c0_i32 = arith.constant 0 : i32
    %c0_i32_0 = arith.constant 0 : i32
    %c0_i32_1 = arith.constant 0 : i32
    return %c0_i32, %c0_i32_0 : i32, i32
  }
  func.func @transform_2(%arg0: i32) -> (i32, i32) {
    %c0_i32 = arith.constant 0 : i32
    %c0_i32_0 = arith.constant 0 : i32
    return %arg0, %c0_i32 : i32, i32
  }
  func.func @transform_3(%arg0: i32) -> (i32, i32, i32) {
    %c0_i32 = arith.constant 0 : i32
    %c0_i32_0 = arith.constant 0 : i32
    %c0_i32_1 = arith.constant 0 : i32
    return %arg0, %c0_i32, %c0_i32_0 : i32, i32, i32
  }
}

module attributes {stable_mosaic.version = 11 : i64} {
  func.func @_conv2_kernel(%arg0: i32, %arg1: memref<1x256x128xbf16, #tpu.memory_space<vmem>>, %arg2: memref<1x128xf32, #tpu.memory_space<vmem>>, %arg3: memref<1x128xf32, #tpu.memory_space<vmem>>, %arg4: memref<3x3x128x128xbf16, #tpu.memory_space<vmem>>, %arg5: memref<1x256x128xbf16, #tpu.memory_space<vmem>>, %arg6: memref<1x2x128xf32, #tpu.memory_space<vmem>>, %arg7: memref<18x18x128xf32, #tpu.memory_space<vmem>>) attributes {dimension_semantics = [#tpu.dimension_semantics<parallel>], iteration_bounds = array<i64: 2>, scalar_prefetch = 0 : i64, scratch_operands = 1 : i64, tpu.core_type = #tpu.core_type<tc>, window_params = [{transform_indices = @transform_0, window_bounds = array<i64: 1, 256, 128>}, {pipeline_mode = #tpu.pipeline_mode<synchronous>, transform_indices = @transform_1, window_bounds = array<i64: 1, 128>}, {pipeline_mode = #tpu.pipeline_mode<synchronous>, transform_indices = @transform_2, window_bounds = array<i64: 1, 128>}, {pipeline_mode = #tpu.pipeline_mode<synchronous>, transform_indices = @transform_3, window_bounds = array<i64: 3, 3, 128, 128>}, {transform_indices = @transform_4, window_bounds = array<i64: 1, 256, 128>}, {transform_indices = @transform_5, window_bounds = array<i64: 1, 2, 128>}]} {
    %c0 = arith.constant 0 : index
    %c0_0 = arith.constant 0 : index
    %c0_1 = arith.constant 0 : index
    %0 = vector.load %arg1[%c0, %c0_0, %c0_1] : memref<1x256x128xbf16, #tpu.memory_space<vmem>>, vector<1x256x128xbf16>
    %1 = vector.shape_cast %0 : vector<1x256x128xbf16> to vector<256x128xbf16>
    %2 = arith.extf %1 : vector<256x128xbf16> to vector<256x128xf32>
    %c0_2 = arith.constant 0 : index
    %c0_3 = arith.constant 0 : index
    %3 = vector.load %arg2[%c0_2, %c0_3] : memref<1x128xf32, #tpu.memory_space<vmem>>, vector<1x128xf32>
    %4 = vector.broadcast %3 : vector<1x128xf32> to vector<256x128xf32>
    %5 = arith.mulf %2, %4 : vector<256x128xf32>
    %c0_4 = arith.constant 0 : index
    %c0_5 = arith.constant 0 : index
    %6 = vector.load %arg3[%c0_4, %c0_5] : memref<1x128xf32, #tpu.memory_space<vmem>>, vector<1x128xf32>
    %7 = vector.broadcast %6 : vector<1x128xf32> to vector<256x128xf32>
    %8 = arith.addf %5, %7 : vector<256x128xf32>
    %cst = arith.constant 0.000000e+00 : f32
    %9 = vector.broadcast %cst : f32 to vector<256x128xf32>
    %10 = arith.maximumf %8, %9 : vector<256x128xf32>
    %cst_6 = arith.constant 0.000000e+00 : f32
    %11 = vector.broadcast %cst_6 : f32 to vector<1x18x128xf32>
    %c0_7 = arith.constant 0 : index
    %c0_8 = arith.constant 0 : index
    %c0_9 = arith.constant 0 : index
    %12 = vector.load %arg7[%c0_7, %c0_8, %c0_9] : memref<18x18x128xf32, #tpu.memory_space<vmem>>, vector<1x18x128xf32>
    tpu.vector_store %arg7[%c0_7, %c0_8, %c0_9], %11 {strides = array<i32>} : memref<18x18x128xf32, #tpu.memory_space<vmem>>, vector<1x18x128xf32>,
    %cst_10 = arith.constant 0.000000e+00 : f32
    %13 = vector.broadcast %cst_10 : f32 to vector<1x18x128xf32>
    %c17 = arith.constant 17 : index
    %c0_11 = arith.constant 0 : index
    %c0_12 = arith.constant 0 : index
    %14 = vector.load %arg7[%c17, %c0_11, %c0_12] : memref<18x18x128xf32, #tpu.memory_space<vmem>>, vector<1x18x128xf32>
    tpu.vector_store %arg7[%c17, %c0_11, %c0_12], %13 {strides = array<i32>} : memref<18x18x128xf32, #tpu.memory_space<vmem>>, vector<1x18x128xf32>,
    %cst_13 = arith.constant 0.000000e+00 : f32
    %15 = vector.broadcast %cst_13 : f32 to vector<18x1x128xf32>
    %c0_14 = arith.constant 0 : index
    %c0_15 = arith.constant 0 : index
    %c0_16 = arith.constant 0 : index
    %16 = vector.load %arg7[%c0_14, %c0_15, %c0_16] : memref<18x18x128xf32, #tpu.memory_space<vmem>>, vector<18x1x128xf32>
    tpu.vector_store %arg7[%c0_14, %c0_15, %c0_16], %15 {strides = array<i32>} : memref<18x18x128xf32, #tpu.memory_space<vmem>>, vector<18x1x128xf32>,
    %cst_17 = arith.constant 0.000000e+00 : f32
    %17 = vector.broadcast %cst_17 : f32 to vector<18x1x128xf32>
    %c0_18 = arith.constant 0 : index
    %c17_19 = arith.constant 17 : index
    %c0_20 = arith.constant 0 : index
    %18 = vector.load %arg7[%c0_18, %c17_19, %c0_20] : memref<18x18x128xf32, #tpu.memory_space<vmem>>, vector<18x1x128xf32>
    tpu.vector_store %arg7[%c0_18, %c17_19, %c0_20], %17 {strides = array<i32>} : memref<18x18x128xf32, #tpu.memory_space<vmem>>, vector<18x1x128xf32>,
    %19 = vector.shape_cast %10 : vector<256x128xf32> to vector<16x16x128xf32>
    %c1 = arith.constant 1 : index
    %c1_21 = arith.constant 1 : index
    %c0_22 = arith.constant 0 : index
    %20 = vector.load %arg7[%c1, %c1_21, %c0_22] : memref<18x18x128xf32, #tpu.memory_space<vmem>>, vector<16x16x128xf32>
    tpu.vector_store %arg7[%c1, %c1_21, %c0_22], %19 {strides = array<i32>} : memref<18x18x128xf32, #tpu.memory_space<vmem>>, vector<16x16x128xf32>,
    %c0_23 = arith.constant 0 : index
    %c0_24 = arith.constant 0 : index
    %c0_25 = arith.constant 0 : index
    %21 = vector.load %arg7[%c0_23, %c0_24, %c0_25] : memref<18x18x128xf32, #tpu.memory_space<vmem>>, vector<18x18x128xf32>
    %cst_26 = arith.constant 0.000000e+00 : f32
    %22 = vector.broadcast %cst_26 : f32 to vector<256x128xf32>
    %23 = vector.extract_strided_slice %21 {offsets = [0, 0, 0], sizes = [16, 16, 128], strides = [1, 1, 1]} : vector<18x18x128xf32> to vector<16x16x128xf32>
    %24 = vector.shape_cast %23 : vector<16x16x128xf32> to vector<256x128xf32>
    %25 = arith.truncf %24 : vector<256x128xf32> to vector<256x128xbf16>
    %c0_27 = arith.constant 0 : index
    %c0_28 = arith.constant 0 : index
    %c0_29 = arith.constant 0 : index
    %c0_30 = arith.constant 0 : index
    %26 = vector.load %arg4[%c0_27, %c0_28, %c0_29, %c0_30] : memref<3x3x128x128xbf16, #tpu.memory_space<vmem>>, vector<1x1x128x128xbf16>
    %27 = vector.shape_cast %26 : vector<1x1x128x128xbf16> to vector<128x128xbf16>
    %cst_31 = arith.constant dense<0.000000e+00> : vector<256x128xf32>
    %28 = tpu.matmul %25, %27, %cst_31 {dimension_numbers = #tpu.dot_dimension_numbers<[1], [0], [0], [1], [0, 0, 1, 1], [], []>} : vector<256x128xbf16>, vector<128x128xbf16>, vector<256x128xf32> -> vector<256x128xf32>
    %29 = arith.addf %22, %28 : vector<256x128xf32>
    %30 = vector.extract_strided_slice %21 {offsets = [0, 1, 0], sizes = [16, 16, 128], strides = [1, 1, 1]} : vector<18x18x128xf32> to vector<16x16x128xf32>
    %31 = vector.shape_cast %30 : vector<16x16x128xf32> to vector<256x128xf32>
    %32 = arith.truncf %31 : vector<256x128xf32> to vector<256x128xbf16>
    %c0_32 = arith.constant 0 : index
    %c1_33 = arith.constant 1 : index
    %c0_34 = arith.constant 0 : index
    %c0_35 = arith.constant 0 : index
    %33 = vector.load %arg4[%c0_32, %c1_33, %c0_34, %c0_35] : memref<3x3x128x128xbf16, #tpu.memory_space<vmem>>, vector<1x1x128x128xbf16>
    %34 = vector.shape_cast %33 : vector<1x1x128x128xbf16> to vector<128x128xbf16>
    %cst_36 = arith.constant dense<0.000000e+00> : vector<256x128xf32>
    %35 = tpu.matmul %32, %34, %cst_36 {dimension_numbers = #tpu.dot_dimension_numbers<[1], [0], [0], [1], [0, 0, 1, 1], [], []>} : vector<256x128xbf16>, vector<128x128xbf16>, vector<256x128xf32> -> vector<256x128xf32>
    %36 = arith.addf %29, %35 : vector<256x128xf32>
    %37 = vector.extract_strided_slice %21 {offsets = [0, 2, 0], sizes = [16, 16, 128], strides = [1, 1, 1]} : vector<18x18x128xf32> to vector<16x16x128xf32>
    %38 = vector.shape_cast %37 : vector<16x16x128xf32> to vector<256x128xf32>
    %39 = arith.truncf %38 : vector<256x128xf32> to vector<256x128xbf16>
    %c0_37 = arith.constant 0 : index
    %c2 = arith.constant 2 : index
    %c0_38 = arith.constant 0 : index
    %c0_39 = arith.constant 0 : index
    %40 = vector.load %arg4[%c0_37, %c2, %c0_38, %c0_39] : memref<3x3x128x128xbf16, #tpu.memory_space<vmem>>, vector<1x1x128x128xbf16>
    %41 = vector.shape_cast %40 : vector<1x1x128x128xbf16> to vector<128x128xbf16>
    %cst_40 = arith.constant dense<0.000000e+00> : vector<256x128xf32>
    %42 = tpu.matmul %39, %41, %cst_40 {dimension_numbers = #tpu.dot_dimension_numbers<[1], [0], [0], [1], [0, 0, 1, 1], [], []>} : vector<256x128xbf16>, vector<128x128xbf16>, vector<256x128xf32> -> vector<256x128xf32>
    %43 = arith.addf %36, %42 : vector<256x128xf32>
    %44 = vector.extract_strided_slice %21 {offsets = [1, 0, 0], sizes = [16, 16, 128], strides = [1, 1, 1]} : vector<18x18x128xf32> to vector<16x16x128xf32>
    %45 = vector.shape_cast %44 : vector<16x16x128xf32> to vector<256x128xf32>
    %46 = arith.truncf %45 : vector<256x128xf32> to vector<256x128xbf16>
    %c1_41 = arith.constant 1 : index
    %c0_42 = arith.constant 0 : index
    %c0_43 = arith.constant 0 : index
    %c0_44 = arith.constant 0 : index
    %47 = vector.load %arg4[%c1_41, %c0_42, %c0_43, %c0_44] : memref<3x3x128x128xbf16, #tpu.memory_space<vmem>>, vector<1x1x128x128xbf16>
    %48 = vector.shape_cast %47 : vector<1x1x128x128xbf16> to vector<128x128xbf16>
    %cst_45 = arith.constant dense<0.000000e+00> : vector<256x128xf32>
    %49 = tpu.matmul %46, %48, %cst_45 {dimension_numbers = #tpu.dot_dimension_numbers<[1], [0], [0], [1], [0, 0, 1, 1], [], []>} : vector<256x128xbf16>, vector<128x128xbf16>, vector<256x128xf32> -> vector<256x128xf32>
    %50 = arith.addf %43, %49 : vector<256x128xf32>
    %51 = vector.extract_strided_slice %21 {offsets = [1, 1, 0], sizes = [16, 16, 128], strides = [1, 1, 1]} : vector<18x18x128xf32> to vector<16x16x128xf32>
    %52 = vector.shape_cast %51 : vector<16x16x128xf32> to vector<256x128xf32>
    %53 = arith.truncf %52 : vector<256x128xf32> to vector<256x128xbf16>
    %c1_46 = arith.constant 1 : index
    %c1_47 = arith.constant 1 : index
    %c0_48 = arith.constant 0 : index
    %c0_49 = arith.constant 0 : index
    %54 = vector.load %arg4[%c1_46, %c1_47, %c0_48, %c0_49] : memref<3x3x128x128xbf16, #tpu.memory_space<vmem>>, vector<1x1x128x128xbf16>
    %55 = vector.shape_cast %54 : vector<1x1x128x128xbf16> to vector<128x128xbf16>
    %cst_50 = arith.constant dense<0.000000e+00> : vector<256x128xf32>
    %56 = tpu.matmul %53, %55, %cst_50 {dimension_numbers = #tpu.dot_dimension_numbers<[1], [0], [0], [1], [0, 0, 1, 1], [], []>} : vector<256x128xbf16>, vector<128x128xbf16>, vector<256x128xf32> -> vector<256x128xf32>
    %57 = arith.addf %50, %56 : vector<256x128xf32>
    %58 = vector.extract_strided_slice %21 {offsets = [1, 2, 0], sizes = [16, 16, 128], strides = [1, 1, 1]} : vector<18x18x128xf32> to vector<16x16x128xf32>
    %59 = vector.shape_cast %58 : vector<16x16x128xf32> to vector<256x128xf32>
    %60 = arith.truncf %59 : vector<256x128xf32> to vector<256x128xbf16>
    %c1_51 = arith.constant 1 : index
    %c2_52 = arith.constant 2 : index
    %c0_53 = arith.constant 0 : index
    %c0_54 = arith.constant 0 : index
    %61 = vector.load %arg4[%c1_51, %c2_52, %c0_53, %c0_54] : memref<3x3x128x128xbf16, #tpu.memory_space<vmem>>, vector<1x1x128x128xbf16>
    %62 = vector.shape_cast %61 : vector<1x1x128x128xbf16> to vector<128x128xbf16>
    %cst_55 = arith.constant dense<0.000000e+00> : vector<256x128xf32>
    %63 = tpu.matmul %60, %62, %cst_55 {dimension_numbers = #tpu.dot_dimension_numbers<[1], [0], [0], [1], [0, 0, 1, 1], [], []>} : vector<256x128xbf16>, vector<128x128xbf16>, vector<256x128xf32> -> vector<256x128xf32>
    %64 = arith.addf %57, %63 : vector<256x128xf32>
    %65 = vector.extract_strided_slice %21 {offsets = [2, 0, 0], sizes = [16, 16, 128], strides = [1, 1, 1]} : vector<18x18x128xf32> to vector<16x16x128xf32>
    %66 = vector.shape_cast %65 : vector<16x16x128xf32> to vector<256x128xf32>
    %67 = arith.truncf %66 : vector<256x128xf32> to vector<256x128xbf16>
    %c2_56 = arith.constant 2 : index
    %c0_57 = arith.constant 0 : index
    %c0_58 = arith.constant 0 : index
    %c0_59 = arith.constant 0 : index
    %68 = vector.load %arg4[%c2_56, %c0_57, %c0_58, %c0_59] : memref<3x3x128x128xbf16, #tpu.memory_space<vmem>>, vector<1x1x128x128xbf16>
    %69 = vector.shape_cast %68 : vector<1x1x128x128xbf16> to vector<128x128xbf16>
    %cst_60 = arith.constant dense<0.000000e+00> : vector<256x128xf32>
    %70 = tpu.matmul %67, %69, %cst_60 {dimension_numbers = #tpu.dot_dimension_numbers<[1], [0], [0], [1], [0, 0, 1, 1], [], []>} : vector<256x128xbf16>, vector<128x128xbf16>, vector<256x128xf32> -> vector<256x128xf32>
    %71 = arith.addf %64, %70 : vector<256x128xf32>
    %72 = vector.extract_strided_slice %21 {offsets = [2, 1, 0], sizes = [16, 16, 128], strides = [1, 1, 1]} : vector<18x18x128xf32> to vector<16x16x128xf32>
    %73 = vector.shape_cast %72 : vector<16x16x128xf32> to vector<256x128xf32>
    %74 = arith.truncf %73 : vector<256x128xf32> to vector<256x128xbf16>
    %c2_61 = arith.constant 2 : index
    %c1_62 = arith.constant 1 : index
    %c0_63 = arith.constant 0 : index
    %c0_64 = arith.constant 0 : index
    %75 = vector.load %arg4[%c2_61, %c1_62, %c0_63, %c0_64] : memref<3x3x128x128xbf16, #tpu.memory_space<vmem>>, vector<1x1x128x128xbf16>
    %76 = vector.shape_cast %75 : vector<1x1x128x128xbf16> to vector<128x128xbf16>
    %cst_65 = arith.constant dense<0.000000e+00> : vector<256x128xf32>
    %77 = tpu.matmul %74, %76, %cst_65 {dimension_numbers = #tpu.dot_dimension_numbers<[1], [0], [0], [1], [0, 0, 1, 1], [], []>} : vector<256x128xbf16>, vector<128x128xbf16>, vector<256x128xf32> -> vector<256x128xf32>
    %78 = arith.addf %71, %77 : vector<256x128xf32>
    %79 = vector.extract_strided_slice %21 {offsets = [2, 2, 0], sizes = [16, 16, 128], strides = [1, 1, 1]} : vector<18x18x128xf32> to vector<16x16x128xf32>
    %80 = vector.shape_cast %79 : vector<16x16x128xf32> to vector<256x128xf32>
    %81 = arith.truncf %80 : vector<256x128xf32> to vector<256x128xbf16>
    %c2_66 = arith.constant 2 : index
    %c2_67 = arith.constant 2 : index
    %c0_68 = arith.constant 0 : index
    %c0_69 = arith.constant 0 : index
    %82 = vector.load %arg4[%c2_66, %c2_67, %c0_68, %c0_69] : memref<3x3x128x128xbf16, #tpu.memory_space<vmem>>, vector<1x1x128x128xbf16>
    %83 = vector.shape_cast %82 : vector<1x1x128x128xbf16> to vector<128x128xbf16>
    %cst_70 = arith.constant dense<0.000000e+00> : vector<256x128xf32>
    %84 = tpu.matmul %81, %83, %cst_70 {dimension_numbers = #tpu.dot_dimension_numbers<[1], [0], [0], [1], [0, 0, 1, 1], [], []>} : vector<256x128xbf16>, vector<128x128xbf16>, vector<256x128xf32> -> vector<256x128xf32>
    %85 = arith.addf %78, %84 : vector<256x128xf32>
    %86 = arith.truncf %85 : vector<256x128xf32> to vector<256x128xbf16>
    %87 = vector.shape_cast %86 : vector<256x128xbf16> to vector<1x256x128xbf16>
    %c0_71 = arith.constant 0 : index
    %c0_72 = arith.constant 0 : index
    %c0_73 = arith.constant 0 : index
    %88 = vector.load %arg5[%c0_71, %c0_72, %c0_73] : memref<1x256x128xbf16, #tpu.memory_space<vmem>>, vector<1x256x128xbf16>
    tpu.vector_store %arg5[%c0_71, %c0_72, %c0_73], %87 {strides = array<i32>} : memref<1x256x128xbf16, #tpu.memory_space<vmem>>, vector<1x256x128xbf16>,
    %89 = arith.extf %86 : vector<256x128xbf16> to vector<256x128xf32>
    %cst_74 = arith.constant dense<0.000000e+00> : vector<128xf32>
    %90 = vector.multi_reduction <add>, %89, %cst_74 [0] : vector<256x128xf32> to vector<128xf32>
    %91 = vector.shape_cast %90 : vector<128xf32> to vector<1x128xf32>
    %92 = arith.mulf %89, %89 : vector<256x128xf32>
    %cst_75 = arith.constant dense<0.000000e+00> : vector<128xf32>
    %93 = vector.multi_reduction <add>, %92, %cst_75 [0] : vector<256x128xf32> to vector<128xf32>
    %94 = vector.shape_cast %93 : vector<128xf32> to vector<1x128xf32>
    %95 = tpu.concatenate %91, %94 in 0 : vector<1x128xf32>, vector<1x128xf32> -> vector<2x128xf32>
    %96 = vector.shape_cast %95 : vector<2x128xf32> to vector<1x2x128xf32>
    %c0_76 = arith.constant 0 : index
    %c0_77 = arith.constant 0 : index
    %c0_78 = arith.constant 0 : index
    %97 = vector.load %arg6[%c0_76, %c0_77, %c0_78] : memref<1x2x128xf32, #tpu.memory_space<vmem>>, vector<1x2x128xf32>
    tpu.vector_store %arg6[%c0_76, %c0_77, %c0_78], %96 {strides = array<i32>} : memref<1x2x128xf32, #tpu.memory_space<vmem>>, vector<1x2x128xf32>,
    return
  }
  func.func @transform_0(%arg0: i32) -> (i32, i32, i32) {
    %c0_i32 = arith.constant 0 : i32
    %c0_i32_0 = arith.constant 0 : i32
    %c0_i32_1 = arith.constant 0 : i32
    return %arg0, %c0_i32, %c0_i32_0 : i32, i32, i32
  }
  func.func @transform_1(%arg0: i32) -> (i32, i32) {
    %c0_i32 = arith.constant 0 : i32
    %c0_i32_0 = arith.constant 0 : i32
    %c0_i32_1 = arith.constant 0 : i32
    return %c0_i32, %c0_i32_0 : i32, i32
  }
  func.func @transform_2(%arg0: i32) -> (i32, i32) {
    %c0_i32 = arith.constant 0 : i32
    %c0_i32_0 = arith.constant 0 : i32
    %c0_i32_1 = arith.constant 0 : i32
    return %c0_i32, %c0_i32_0 : i32, i32
  }
  func.func @transform_3(%arg0: i32) -> (i32, i32, i32, i32) {
    %c0_i32 = arith.constant 0 : i32
    %c0_i32_0 = arith.constant 0 : i32
    %c0_i32_1 = arith.constant 0 : i32
    %c0_i32_2 = arith.constant 0 : i32
    %c0_i32_3 = arith.constant 0 : i32
    return %c0_i32, %c0_i32_0, %c0_i32_1, %c0_i32_2 : i32, i32, i32, i32
  }
  func.func @transform_4(%arg0: i32) -> (i32, i32, i32) {
    %c0_i32 = arith.constant 0 : i32
    %c0_i32_0 = arith.constant 0 : i32
    %c0_i32_1 = arith.constant 0 : i32
    return %arg0, %c0_i32, %c0_i32_0 : i32, i32, i32
  }
  func.func @transform_5(%arg0: i32) -> (i32, i32, i32) {
    %c0_i32 = arith.constant 0 : i32
    %c0_i32_0 = arith.constant 0 : i32
    %c0_i32_1 = arith.constant 0 : i32
    return %arg0, %c0_i32, %c0_i32_0 : i32, i32, i32
  }
}

module attributes {stable_mosaic.version = 11 : i64} {
  func.func @_finalize_kernel(%arg0: i32, %arg1: memref<256x128xbf16, #tpu.memory_space<vmem>>, %arg2: memref<256x128xf32, #tpu.memory_space<vmem>>, %arg3: memref<1x128xf32, #tpu.memory_space<vmem>>, %arg4: memref<1x128xf32, #tpu.memory_space<vmem>>, %arg5: memref<256x128xf32, #tpu.memory_space<vmem>>) attributes {dimension_semantics = [#tpu.dimension_semantics<parallel>], iteration_bounds = array<i64: 2>, scalar_prefetch = 0 : i64, scratch_operands = 0 : i64, tpu.core_type = #tpu.core_type<tc>, window_params = [{transform_indices = @transform_0, window_bounds = array<i64: 256, 128>}, {transform_indices = @transform_1, window_bounds = array<i64: 256, 128>}, {pipeline_mode = #tpu.pipeline_mode<synchronous>, transform_indices = @transform_2, window_bounds = array<i64: 1, 128>}, {pipeline_mode = #tpu.pipeline_mode<synchronous>, transform_indices = @transform_3, window_bounds = array<i64: 1, 128>}, {transform_indices = @transform_4, window_bounds = array<i64: 256, 128>}]} {
    %c0 = arith.constant 0 : index
    %c0_0 = arith.constant 0 : index
    %0 = vector.load %arg1[%c0, %c0_0] : memref<256x128xbf16, #tpu.memory_space<vmem>>, vector<256x128xbf16>
    %1 = arith.extf %0 : vector<256x128xbf16> to vector<256x128xf32>
    %c0_1 = arith.constant 0 : index
    %c0_2 = arith.constant 0 : index
    %2 = vector.load %arg3[%c0_1, %c0_2] : memref<1x128xf32, #tpu.memory_space<vmem>>, vector<1x128xf32>
    %3 = vector.broadcast %2 : vector<1x128xf32> to vector<256x128xf32>
    %4 = arith.mulf %1, %3 : vector<256x128xf32>
    %c0_3 = arith.constant 0 : index
    %c0_4 = arith.constant 0 : index
    %5 = vector.load %arg4[%c0_3, %c0_4] : memref<1x128xf32, #tpu.memory_space<vmem>>, vector<1x128xf32>
    %6 = vector.broadcast %5 : vector<1x128xf32> to vector<256x128xf32>
    %7 = arith.addf %4, %6 : vector<256x128xf32>
    %c0_5 = arith.constant 0 : index
    %c0_6 = arith.constant 0 : index
    %8 = vector.load %arg2[%c0_5, %c0_6] : memref<256x128xf32, #tpu.memory_space<vmem>>, vector<256x128xf32>
    %9 = arith.addf %7, %8 : vector<256x128xf32>
    %cst = arith.constant 0.000000e+00 : f32
    %10 = vector.broadcast %cst : f32 to vector<256x128xf32>
    %11 = arith.maximumf %9, %10 : vector<256x128xf32>
    %c0_7 = arith.constant 0 : index
    %c0_8 = arith.constant 0 : index
    %12 = vector.load %arg5[%c0_7, %c0_8] : memref<256x128xf32, #tpu.memory_space<vmem>>, vector<256x128xf32>
    tpu.vector_store %arg5[%c0_7, %c0_8], %11 {strides = array<i32>} : memref<256x128xf32, #tpu.memory_space<vmem>>, vector<256x128xf32>,
    return
  }
  func.func @transform_0(%arg0: i32) -> (i32, i32) {
    %c0_i32 = arith.constant 0 : i32
    %c0_i32_0 = arith.constant 0 : i32
    return %arg0, %c0_i32 : i32, i32
  }
  func.func @transform_1(%arg0: i32) -> (i32, i32) {
    %c0_i32 = arith.constant 0 : i32
    %c0_i32_0 = arith.constant 0 : i32
    return %arg0, %c0_i32 : i32, i32
  }
  func.func @transform_2(%arg0: i32) -> (i32, i32) {
    %c0_i32 = arith.constant 0 : i32
    %c0_i32_0 = arith.constant 0 : i32
    %c0_i32_1 = arith.constant 0 : i32
    return %c0_i32, %c0_i32_0 : i32, i32
  }
  func.func @transform_3(%arg0: i32) -> (i32, i32) {
    %c0_i32 = arith.constant 0 : i32
    %c0_i32_0 = arith.constant 0 : i32
    %c0_i32_1 = arith.constant 0 : i32
    return %c0_i32, %c0_i32_0 : i32, i32
  }
  func.func @transform_4(%arg0: i32) -> (i32, i32) {
    %c0_i32 = arith.constant 0 : i32
    %c0_i32_0 = arith.constant 0 : i32
    return %arg0, %c0_i32 : i32, i32
  }
}

module attributes {stable_mosaic.version = 11 : i64} {
  func.func @_conv3_kernel(%arg0: i32, %arg1: memref<256x128xbf16, #tpu.memory_space<vmem>>, %arg2: memref<128x128xbf16, #tpu.memory_space<vmem>>, %arg3: memref<1x128xf32, #tpu.memory_space<vmem>>, %arg4: memref<1x128xf32, #tpu.memory_space<vmem>>, %arg5: memref<256x128xbf16, #tpu.memory_space<vmem>>, %arg6: memref<1x2x128xf32, #tpu.memory_space<vmem>>) attributes {dimension_semantics = [#tpu.dimension_semantics<parallel>], iteration_bounds = array<i64: 2>, scalar_prefetch = 0 : i64, scratch_operands = 0 : i64, tpu.core_type = #tpu.core_type<tc>, window_params = [{transform_indices = @transform_0, window_bounds = array<i64: 256, 128>}, {pipeline_mode = #tpu.pipeline_mode<synchronous>, transform_indices = @transform_1, window_bounds = array<i64: 128, 128>}, {pipeline_mode = #tpu.pipeline_mode<synchronous>, transform_indices = @transform_2, window_bounds = array<i64: 1, 128>}, {pipeline_mode = #tpu.pipeline_mode<synchronous>, transform_indices = @transform_3, window_bounds = array<i64: 1, 128>}, {transform_indices = @transform_4, window_bounds = array<i64: 256, 128>}, {transform_indices = @transform_5, window_bounds = array<i64: 1, 2, 128>}]} {
    %c0 = arith.constant 0 : index
    %c0_0 = arith.constant 0 : index
    %0 = vector.load %arg1[%c0, %c0_0] : memref<256x128xbf16, #tpu.memory_space<vmem>>, vector<256x128xbf16>
    %1 = arith.extf %0 : vector<256x128xbf16> to vector<256x128xf32>
    %c0_1 = arith.constant 0 : index
    %c0_2 = arith.constant 0 : index
    %2 = vector.load %arg3[%c0_1, %c0_2] : memref<1x128xf32, #tpu.memory_space<vmem>>, vector<1x128xf32>
    %3 = vector.broadcast %2 : vector<1x128xf32> to vector<256x128xf32>
    %4 = arith.mulf %1, %3 : vector<256x128xf32>
    %c0_3 = arith.constant 0 : index
    %c0_4 = arith.constant 0 : index
    %5 = vector.load %arg4[%c0_3, %c0_4] : memref<1x128xf32, #tpu.memory_space<vmem>>, vector<1x128xf32>
    %6 = vector.broadcast %5 : vector<1x128xf32> to vector<256x128xf32>
    %7 = arith.addf %4, %6 : vector<256x128xf32>
    %cst = arith.constant 0.000000e+00 : f32
    %8 = vector.broadcast %cst : f32 to vector<256x128xf32>
    %9 = arith.maximumf %7, %8 : vector<256x128xf32>
    %10 = arith.truncf %9 : vector<256x128xf32> to vector<256x128xbf16>
    %c0_5 = arith.constant 0 : index
    %c0_6 = arith.constant 0 : index
    %11 = vector.load %arg2[%c0_5, %c0_6] : memref<128x128xbf16, #tpu.memory_space<vmem>>, vector<128x128xbf16>
    %cst_7 = arith.constant dense<0.000000e+00> : vector<256x128xf32>
    %12 = tpu.matmul %10, %11, %cst_7 {dimension_numbers = #tpu.dot_dimension_numbers<[1], [0], [0], [1], [0, 0, 1, 1], [], []>} : vector<256x128xbf16>, vector<128x128xbf16>, vector<256x128xf32> -> vector<256x128xf32>
    %13 = arith.truncf %12 : vector<256x128xf32> to vector<256x128xbf16>
    %c0_8 = arith.constant 0 : index
    %c0_9 = arith.constant 0 : index
    %14 = vector.load %arg5[%c0_8, %c0_9] : memref<256x128xbf16, #tpu.memory_space<vmem>>, vector<256x128xbf16>
    tpu.vector_store %arg5[%c0_8, %c0_9], %13 {strides = array<i32>} : memref<256x128xbf16, #tpu.memory_space<vmem>>, vector<256x128xbf16>,
    %15 = arith.extf %13 : vector<256x128xbf16> to vector<256x128xf32>
    %cst_10 = arith.constant dense<0.000000e+00> : vector<128xf32>
    %16 = vector.multi_reduction <add>, %15, %cst_10 [0] : vector<256x128xf32> to vector<128xf32>
    %17 = vector.shape_cast %16 : vector<128xf32> to vector<1x128xf32>
    %18 = arith.mulf %15, %15 : vector<256x128xf32>
    %cst_11 = arith.constant dense<0.000000e+00> : vector<128xf32>
    %19 = vector.multi_reduction <add>, %18, %cst_11 [0] : vector<256x128xf32> to vector<128xf32>
    %20 = vector.shape_cast %19 : vector<128xf32> to vector<1x128xf32>
    %21 = tpu.concatenate %17, %20 in 0 : vector<1x128xf32>, vector<1x128xf32> -> vector<2x128xf32>
    %22 = vector.shape_cast %21 : vector<2x128xf32> to vector<1x2x128xf32>
    %c0_12 = arith.constant 0 : index
    %c0_13 = arith.constant 0 : index
    %c0_14 = arith.constant 0 : index
    %23 = vector.load %arg6[%c0_12, %c0_13, %c0_14] : memref<1x2x128xf32, #tpu.memory_space<vmem>>, vector<1x2x128xf32>
    tpu.vector_store %arg6[%c0_12, %c0_13, %c0_14], %22 {strides = array<i32>} : memref<1x2x128xf32, #tpu.memory_space<vmem>>, vector<1x2x128xf32>,
    return
  }
  func.func @transform_0(%arg0: i32) -> (i32, i32) {
    %c0_i32 = arith.constant 0 : i32
    %c0_i32_0 = arith.constant 0 : i32
    return %arg0, %c0_i32 : i32, i32
  }
  func.func @transform_1(%arg0: i32) -> (i32, i32) {
    %c0_i32 = arith.constant 0 : i32
    %c0_i32_0 = arith.constant 0 : i32
    %c0_i32_1 = arith.constant 0 : i32
    return %c0_i32, %c0_i32_0 : i32, i32
  }
  func.func @transform_2(%arg0: i32) -> (i32, i32) {
    %c0_i32 = arith.constant 0 : i32
    %c0_i32_0 = arith.constant 0 : i32
    %c0_i32_1 = arith.constant 0 : i32
    return %c0_i32, %c0_i32_0 : i32, i32
  }
  func.func @transform_3(%arg0: i32) -> (i32, i32) {
    %c0_i32 = arith.constant 0 : i32
    %c0_i32_0 = arith.constant 0 : i32
    %c0_i32_1 = arith.constant 0 : i32
    return %c0_i32, %c0_i32_0 : i32, i32
  }
  func.func @transform_4(%arg0: i32) -> (i32, i32) {
    %c0_i32 = arith.constant 0 : i32
    %c0_i32_0 = arith.constant 0 : i32
    return %arg0, %c0_i32 : i32, i32
  }
  func.func @transform_5(%arg0: i32) -> (i32, i32, i32) {
    %c0_i32 = arith.constant 0 : i32
    %c0_i32_0 = arith.constant 0 : i32
    %c0_i32_1 = arith.constant 0 : i32
    return %arg0, %c0_i32, %c0_i32_0 : i32, i32, i32
  }
}

</mosaic_0001>

<bundles_post_ra>
// kernel: bottleneck_forward.7
= control target key start
LH: loop header
LB: loop body
LE: loop exit
PB: predicated region body
PF: predicated region fallthrough
CT: control target
= control target key end

     0   :  { %s696_s15 = smov 0   ;;  %s884_s0 = inlined_call_operand.vmem [shape: bf16[512,128], index: 0, kind: input, shape index: {}]   ;;  %s885_s1 = inlined_call_operand.vmem [shape: f32[512,128], index: 1, kind: input, shape index: {}]   ;;  %s886_s2 = inlined_call_operand.vmem [shape: f32[1,128], index: 2, kind: input, shape index: {}]   ;;  %s887_s3 = inlined_call_operand.vmem [shape: f32[1,128], index: 3, kind: input, shape index: {}]   ;;  %s888_s4 = inlined_call_operand.vmem [shape: f32[512,128], index: 4, kind: output, shape index: {}]  }
   0x1 LB: > { %s561_s16 = sadd.s32 4294967295, %s669_s15   ;;  %p565_p0 = scmp.ge.s32.totalorder %s669_s15, 1  ;;  %s669_s15 = sphi %s696_s15, %s14_s15  }
   0x2   : > { %p174_p1 = scmp.lt.s32.totalorder %s669_s15, 3 }
   0x4   : > { %p175_p2 = pnand %p565_p0, %p174_p1 }
   0x5   : > { %s566_s17 = sshll.u32 (!%p175_p2), %s561_s16, 5  ;;  %v717_v1 = vld [vmem:[%s886_s2] ss:$0 sm:$0xff] (!%p175_p2) }
   0x6   : > { %178 = sbr.rel (%p175_p2) target bundleno = 60 (0x3c), region = 36  ;;  %p206_p3 = scmp.lt.s32.totalorder (!%p175_p2), %s566_s17, 63  ;;  %v730_v5 = vld [vmem:[%s887_s3] ss:$0 sm:$0xff] (!%p175_p2) }
   0xd   : > { %s890_s17 = smov (!%p206_p3, %s566_s17), 63 }
   0xe   : > { %s567_s18 = sshll.u32 %s890_s17, 2  ;;  %s569_s19 = sshll.u32 %s890_s17, 3 }
   0xf   : > { %s711_s22 = scalar_lea.vmem %s884_s0, %s567_s18  ;;  %s724_s27 = scalar_lea.vmem %s885_s1, %s569_s19 }
  0x10   : > { %v577_v0 = vld [vmem:[%s711_s22] sm:$0xff]   ;;  %v640_v4 = vld [vmem:[%s711_s22 + $0x8] sm:$0xff]   ;;  %v641_v8 = vld [vmem:[%s711_s22 + $0x10] sm:$0xff]   ;;  %s761_s6 = scalar_lea.vmem %s888_s4, %s569_s19 }
  0x11   : > { %v578_v2 = vunpack.c.l.bf16 %v577_v0  ;;  %v579_v3 = vunpack.c.h.bf16 %v577_v0  ;;  %v582_v6 = vunpack.c.l.bf16 %v640_v4  ;;  %v583_v7 = vunpack.c.h.bf16 %v640_v4  ;;  %v642_v13 = vld [vmem:[%s711_s22 + $0x18] sm:$0xff]   ;;  %v365_v14 = vld [vmem:[%s724_s27] sm:$0xff]  ;;  %v366_v15 = vld [vmem:[%s724_s27 + $0x8] sm:$0xff] }
  0x12   : > { %v586_v11 = vunpack.c.l.bf16 %v641_v8  ;;  %v587_v12 = vunpack.c.h.bf16 %v641_v8  ;;  %v590_v18 = vunpack.c.l.bf16 %v642_v13  ;;  %v591_v19 = vunpack.c.h.bf16 %v642_v13  ;;  %v367_v22 = vld [vmem:[%s724_s27 + $0x10] sm:$0xff]  ;;  %v368_v23 = vld [vmem:[%s724_s27 + $0x18] sm:$0xff]  ;;  %v369_v28 = vld [vmem:[%s724_s27 + $0x20] sm:$0xff] }
  0x13   : > { %v294_v9 = vmul.f32 %v578_v2, %v717_v1  ;;  %v295_v10 = vmul.f32 %v579_v3, %v717_v1  ;;  %v296_v16 = vmul.f32 %v582_v6, %v717_v1  ;;  %v297_v17 = vmul.f32 %v583_v7, %v717_v1  ;;  %v370_v29 = vld [vmem:[%s724_s27 + $0x28] sm:$0xff]  ;;  %v371_v36 = vld [vmem:[%s724_s27 + $0x30] sm:$0xff]  ;;  %v372_v37 = vld [vmem:[%s724_s27 + $0x38] sm:$0xff] }
  0x14   : > { %v298_v24 = vmul.f32 %v586_v11, %v717_v1  ;;  %v299_v25 = vmul.f32 %v587_v12, %v717_v1  ;;  %v300_v30 = vmul.f32 %v590_v18, %v717_v1  ;;  %v301_v31 = vmul.f32 %v591_v19, %v717_v1  ;;  %v643_v42 = vld [vmem:[%s711_s22 + $0x20] sm:$0xff]   ;;  %v644_v47 = vld [vmem:[%s711_s22 + $0x28] sm:$0xff]   ;;  %v645_v52 = vld [vmem:[%s711_s22 + $0x30] sm:$0xff]  }
  0x15   : > { %v333_v20 = vadd.f32 %v730_v5, %v294_v9  ;;  %v334_v21 = vadd.f32 %v730_v5, %v295_v10  ;;  %v335_v26 = vadd.f32 %v730_v5, %v296_v16  ;;  %v336_v27 = vadd.f32 %v730_v5, %v297_v17  ;;  %v646_v57 = vld [vmem:[%s711_s22 + $0x38] sm:$0xff]   ;;  %v373_v3 = vld [vmem:[%s724_s27 + $0x40] sm:$0xff]  ;;  %v374_v4 = vld [vmem:[%s724_s27 + $0x48] sm:$0xff] }
  0x16   : > { %v337_v34 = vadd.f32 %v730_v5, %v298_v24  ;;  %v338_v35 = vadd.f32 %v730_v5, %v299_v25  ;;  %v339_v40 = vadd.f32 %v730_v5, %v300_v30  ;;  %v340_v41 = vadd.f32 %v730_v5, %v301_v31  ;;  %v375_v12 = vld [vmem:[%s724_s27 + $0x50] sm:$0xff]  ;;  %v376_v13 = vld [vmem:[%s724_s27 + $0x58] sm:$0xff]  ;;  %v377_v18 = vld [vmem:[%s724_s27 + $0x60] sm:$0xff] }
  0x17   : > { %v397_v32 = vadd.f32 %v365_v14, %v333_v20  ;;  %v398_v33 = vadd.f32 %v366_v15, %v334_v21  ;;  %v399_v38 = vadd.f32 %v367_v22, %v335_v26  ;;  %v400_v39 = vadd.f32 %v368_v23, %v336_v27  ;;  %v378_v19 = vld [vmem:[%s724_s27 + $0x68] sm:$0xff]  ;;  %v379_v26 = vld [vmem:[%s724_s27 + $0x70] sm:$0xff]  ;;  %v380_v27 = vld [vmem:[%s724_s27 + $0x78] sm:$0xff] }
  0x18   : > { %v401_v45 = vadd.f32 %v369_v28, %v337_v34  ;;  %v402_v46 = vadd.f32 %v370_v29, %v338_v35  ;;  %v403_v50 = vadd.f32 %v371_v36, %v339_v40  ;;  %v404_v51 = vadd.f32 %v372_v37, %v340_v41  ;;  %v648_v37 = vld [vmem:[%s711_s22 + $0x48] sm:$0xff]  }
  0x19   : > { %v429_v43 = vmax.f32 %v397_v32, 0.0  ;;  %v430_v44 = vmax.f32 %v398_v33, 0.0  ;;  %v431_v48 = vmax.f32 %v399_v38, 0.0  ;;  %v432_v49 = vmax.f32 %v400_v39, 0.0  ;;  %v647_v32 = vld [vmem:[%s711_s22 + $0x40] sm:$0xff]  }
  0x1a   : > { %v433_v53 = vmax.f32 %v401_v45, 0.0  ;;  %v434_v54 = vmax.f32 %v402_v46, 0.0  ;;  %v594_v55 = vunpack.c.l.bf16 %v643_v42  ;;  %v595_v56 = vunpack.c.h.bf16 %v643_v42  ;;  %v649_v42 = vld [vmem:[%s711_s22 + $0x50] sm:$0xff]  }
  0x1b   : > { %461 = vst [vmem:[%s761_s6] sm:$0xff] %v429_v43  ;;  %462 = vst [vmem:[%s761_s6 + $0x8] sm:$0xff] %v430_v44  ;;  %v435_v58 = vmax.f32 %v403_v50, 0.0  ;;  %v436_v59 = vmax.f32 %v404_v51, 0.0  ;;  %v598_v60 = vunpack.c.l.bf16 %v644_v47  ;;  %v599_v61 = vunpack.c.h.bf16 %v644_v47  ;;  %v650_v47 = vld [vmem:[%s711_s22 + $0x58] sm:$0xff]  }
  0x1c   : > { %463 = vst [vmem:[%s761_s6 + $0x10] sm:$0xff] %v431_v48  ;;  %464 = vst [vmem:[%s761_s6 + $0x18] sm:$0xff] %v432_v49  ;;  %v302_v62 = vmul.f32 %v594_v55, %v717_v1  ;;  %v303_v63 = vmul.f32 %v595_v56, %v717_v1  ;;  %v602_v0 = vunpack.c.l.bf16 %v645_v52  ;;  %v603_v2 = vunpack.c.h.bf16 %v645_v52  ;;  %v381_v56 = vld [vmem:[%s724_s27 + $0x80] sm:$0xff] }
  0x1d   : > { %465 = vst [vmem:[%s761_s6 + $0x20] sm:$0xff] %v433_v53  ;;  %466 = vst [vmem:[%s761_s6 + $0x28] sm:$0xff] %v434_v54  ;;  %v304_v6 = vmul.f32 %v598_v60, %v717_v1  ;;  %v305_v7 = vmul.f32 %v599_v61, %v717_v1  ;;  %v606_v8 = vunpack.c.l.bf16 %v646_v57  ;;  %v607_v9 = vunpack.c.h.bf16 %v646_v57  ;;  %v382_v57 = vld [vmem:[%s724_s27 + $0x88] sm:$0xff] }
  0x1e   : > { %467 = vst [vmem:[%s761_s6 + $0x30] sm:$0xff] %v435_v58  ;;  %468 = vst [vmem:[%s761_s6 + $0x38] sm:$0xff] %v436_v59  ;;  %v341_v10 = vadd.f32 %v730_v5, %v302_v62  ;;  %v342_v11 = vadd.f32 %v730_v5, %v303_v63  ;;  %v306_v14 = vmul.f32 %v602_v0, %v717_v1  ;;  %v610_v45 = vunpack.c.l.bf16 %v647_v32  ;;  %v383_v0 = vld [vmem:[%s724_s27 + $0x90] sm:$0xff] }
  0x1f   : > { %v307_v15 = vmul.f32 %v603_v2, %v717_v1  ;;  %v343_v16 = vadd.f32 %v730_v5, %v304_v6  ;;  %v344_v17 = vadd.f32 %v730_v5, %v305_v7  ;;  %v308_v20 = vmul.f32 %v606_v8, %v717_v1  ;;  %v384_v2 = vld [vmem:[%s724_s27 + $0x98] sm:$0xff]  ;;  %v385_v8 = vld [vmem:[%s724_s27 + $0xa0] sm:$0xff] }
  0x20   : > { %v309_v21 = vmul.f32 %v607_v9, %v717_v1  ;;  %v405_v22 = vadd.f32 %v373_v3, %v341_v10  ;;  %v406_v23 = vadd.f32 %v374_v4, %v342_v11  ;;  %v345_v24 = vadd.f32 %v730_v5, %v306_v14  ;;  %v386_v9 = vld [vmem:[%s724_s27 + $0xa8] sm:$0xff] }
  0x21   : > { %v346_v25 = vadd.f32 %v730_v5, %v307_v15  ;;  %v407_v28 = vadd.f32 %v375_v12, %v343_v16  ;;  %v408_v29 = vadd.f32 %v376_v13, %v344_v17  ;;  %v347_v30 = vadd.f32 %v730_v5, %v308_v20  ;;  %v387_v16 = vld [vmem:[%s724_s27 + $0xb0] sm:$0xff]  ;;  %v388_v17 = vld [vmem:[%s724_s27 + $0xb8] sm:$0xff] }
  0x22   : > { %v348_v31 = vadd.f32 %v730_v5, %v309_v21  ;;  %v437_v33 = vmax.f32 %v405_v22, 0.0  ;;  %v438_v34 = vmax.f32 %v406_v23, 0.0  ;;  %v409_v35 = vadd.f32 %v377_v18, %v345_v24  ;;  %v651_v22 = vld [vmem:[%s711_s22 + $0x60] sm:$0xff]  }
  0x23   : > { %v410_v36 = vadd.f32 %v378_v19, %v346_v25  ;;  %v439_v38 = vmax.f32 %v407_v28, 0.0  ;;  %v440_v39 = vmax.f32 %v408_v29, 0.0  ;;  %v411_v40 = vadd.f32 %v379_v26, %v347_v30 }
  0x24   : > { %v412_v41 = vadd.f32 %v380_v27, %v348_v31  ;;  %469 = vst [vmem:[%s761_s6 + $0x40] sm:$0xff] %v437_v33  ;;  %470 = vst [vmem:[%s761_s6 + $0x48] sm:$0xff] %v438_v34  ;;  %v441_v43 = vmax.f32 %v409_v35, 0.0  ;;  %v611_v46 = vunpack.c.h.bf16 %v647_v32  ;;  %v614_v50 = vunpack.c.l.bf16 %v648_v37  ;;  %v652_v27 = vld [vmem:[%s711_s22 + $0x68] sm:$0xff]   ;;  %v653_v32 = vld [vmem:[%s711_s22 + $0x70] sm:$0xff]  }
  0x25   : > { %v442_v44 = vmax.f32 %v410_v36, 0.0  ;;  %471 = vst [vmem:[%s761_s6 + $0x50] sm:$0xff] %v439_v38  ;;  %472 = vst [vmem:[%s761_s6 + $0x58] sm:$0xff] %v440_v39  ;;  %v443_v48 = vmax.f32 %v411_v40, 0.0  ;;  %v615_v51 = vunpack.c.h.bf16 %v648_v37  ;;  %v310_v52 = vmul.f32 %v610_v45, %v717_v1  ;;  %v654_v37 = vld [vmem:[%s711_s22 + $0x78] sm:$0xff]  }
  0x26   : > { %v444_v49 = vmax.f32 %v412_v41, 0.0  ;;  %473 = vst [vmem:[%s761_s6 + $0x60] sm:$0xff] %v441_v43  ;;  %v311_v53 = vmul.f32 %v611_v46, %v717_v1  ;;  %v618_v54 = vunpack.c.l.bf16 %v649_v42  ;;  %v619_v55 = vunpack.c.h.bf16 %v649_v42  ;;  %v389_v46 = vld [vmem:[%s724_s27 + $0xc0] sm:$0xff] }
  0x27   : > { %474 = vst [vmem:[%s761_s6 + $0x68] sm:$0xff] %v442_v44  ;;  %475 = vst [vmem:[%s761_s6 + $0x70] sm:$0xff] %v443_v48  ;;  %v312_v58 = vmul.f32 %v614_v50, %v717_v1  ;;  %v313_v59 = vmul.f32 %v615_v51, %v717_v1  ;;  %v622_v60 = vunpack.c.l.bf16 %v650_v47  ;;  %v623_v61 = vunpack.c.h.bf16 %v650_v47  ;;  %v390_v47 = vld [vmem:[%s724_s27 + $0xc8] sm:$0xff] }
  0x28   : > { %476 = vst [vmem:[%s761_s6 + $0x78] sm:$0xff] %v444_v49  ;;  %v349_v62 = vadd.f32 %v730_v5, %v310_v52  ;;  %v350_v63 = vadd.f32 %v730_v5, %v311_v53  ;;  %v314_v3 = vmul.f32 %v618_v54, %v717_v1  ;;  %v315_v4 = vmul.f32 %v619_v55, %v717_v1  ;;  %v391_v54 = vld [vmem:[%s724_s27 + $0xd0] sm:$0xff]  ;;  %v392_v55 = vld [vmem:[%s724_s27 + $0xd8] sm:$0xff] }
  0x29   : > { %v351_v6 = vadd.f32 %v730_v5, %v312_v58  ;;  %v352_v7 = vadd.f32 %v730_v5, %v313_v59  ;;  %v316_v10 = vmul.f32 %v622_v60, %v717_v1  ;;  %v317_v11 = vmul.f32 %v623_v61, %v717_v1  ;;  %v393_v60 = vld [vmem:[%s724_s27 + $0xe0] sm:$0xff]  ;;  %v394_v61 = vld [vmem:[%s724_s27 + $0xe8] sm:$0xff] }
  0x2a   : > { %v413_v12 = vadd.f32 %v381_v56, %v349_v62  ;;  %v414_v13 = vadd.f32 %v382_v57, %v350_v63  ;;  %v353_v14 = vadd.f32 %v730_v5, %v314_v3  ;;  %v354_v15 = vadd.f32 %v730_v5, %v315_v4 }
  0x2b   : > { %v415_v18 = vadd.f32 %v383_v0, %v351_v6  ;;  %v416_v19 = vadd.f32 %v384_v2, %v352_v7  ;;  %v355_v20 = vadd.f32 %v730_v5, %v316_v10  ;;  %v356_v21 = vadd.f32 %v730_v5, %v317_v11  ;;  %v395_v6 = vld [vmem:[%s724_s27 + $0xf0] sm:$0xff]  ;;  %v396_v7 = vld [vmem:[%s724_s27 + $0xf8] sm:$0xff] }
  0x2c   : > { %v445_v23 = vmax.f32 %v413_v12, 0.0  ;;  %v446_v24 = vmax.f32 %v414_v13, 0.0  ;;  %v417_v25 = vadd.f32 %v385_v8, %v353_v14  ;;  %v418_v26 = vadd.f32 %v386_v9, %v354_v15 }
  0x2d   : > { %v447_v28 = vmax.f32 %v415_v18, 0.0  ;;  %v448_v29 = vmax.f32 %v416_v19, 0.0  ;;  %v419_v30 = vadd.f32 %v387_v16, %v355_v20  ;;  %v420_v31 = vadd.f32 %v388_v17, %v356_v21 }
  0x2e   : > { %477 = vst [vmem:[%s761_s6 + $0x80] sm:$0xff] %v445_v23  ;;  %478 = vst [vmem:[%s761_s6 + $0x88] sm:$0xff] %v446_v24  ;;  %v449_v33 = vmax.f32 %v417_v25, 0.0  ;;  %v450_v34 = vmax.f32 %v418_v26, 0.0  ;;  %v626_v35 = vunpack.c.l.bf16 %v651_v22  ;;  %v627_v36 = vunpack.c.h.bf16 %v651_v22 }
  0x2f   : > { %479 = vst [vmem:[%s761_s6 + $0x90] sm:$0xff] %v447_v28  ;;  %480 = vst [vmem:[%s761_s6 + $0x98] sm:$0xff] %v448_v29  ;;  %v451_v38 = vmax.f32 %v419_v30, 0.0  ;;  %v452_v39 = vmax.f32 %v420_v31, 0.0  ;;  %v630_v40 = vunpack.c.l.bf16 %v652_v27  ;;  %v631_v41 = vunpack.c.h.bf16 %v652_v27 }
  0x30   : > { %481 = vst [vmem:[%s761_s6 + $0xa0] sm:$0xff] %v449_v33  ;;  %482 = vst [vmem:[%s761_s6 + $0xa8] sm:$0xff] %v450_v34  ;;  %v318_v42 = vmul.f32 %v626_v35, %v717_v1  ;;  %v319_v43 = vmul.f32 %v627_v36, %v717_v1  ;;  %v634_v44 = vunpack.c.l.bf16 %v653_v32  ;;  %v635_v45 = vunpack.c.h.bf16 %v653_v32 }
  0x31   : > { %483 = vst [vmem:[%s761_s6 + $0xb0] sm:$0xff] %v451_v38  ;;  %484 = vst [vmem:[%s761_s6 + $0xb8] sm:$0xff] %v452_v39  ;;  %v320_v48 = vmul.f32 %v630_v40, %v717_v1  ;;  %v321_v49 = vmul.f32 %v631_v41, %v717_v1  ;;  %v638_v50 = vunpack.c.l.bf16 %v654_v37  ;;  %v639_v51 = vunpack.c.h.bf16 %v654_v37 }
  0x32   : > { %v357_v52 = vadd.f32 %v730_v5, %v318_v42  ;;  %v358_v53 = vadd.f32 %v730_v5, %v319_v43  ;;  %v322_v56 = vmul.f32 %v634_v44, %v717_v1  ;;  %v323_v57 = vmul.f32 %v635_v45, %v717_v1 }
  0x33   : > { %v359_v58 = vadd.f32 %v730_v5, %v320_v48  ;;  %v360_v59 = vadd.f32 %v730_v5, %v321_v49  ;;  %v324_v62 = vmul.f32 %v638_v50, %v717_v1  ;;  %v325_v63 = vmul.f32 %v639_v51, %v717_v1 }
  0x34   : > { %v421_v0 = vadd.f32 %v389_v46, %v357_v52  ;;  %v422_v2 = vadd.f32 %v390_v47, %v358_v53  ;;  %v361_v3 = vadd.f32 %v730_v5, %v322_v56  ;;  %v362_v4 = vadd.f32 %v730_v5, %v323_v57 }
  0x35   : > { %v423_v8 = vadd.f32 %v391_v54, %v359_v58  ;;  %v424_v9 = vadd.f32 %v392_v55, %v360_v59  ;;  %v363_v10 = vadd.f32 %v730_v5, %v324_v62  ;;  %v364_v11 = vadd.f32 %v730_v5, %v325_v63 }
  0x36   : > { %v453_v12 = vmax.f32 %v421_v0, 0.0  ;;  %v454_v1 = vmax.f32 %v422_v2, 0.0  ;;  %v425_v13 = vadd.f32 %v393_v60, %v361_v3  ;;  %v426_v14 = vadd.f32 %v394_v61, %v362_v4 }
  0x37   : > { %v455_v15 = vmax.f32 %v423_v8, 0.0  ;;  %v456_v16 = vmax.f32 %v424_v9, 0.0  ;;  %v427_v17 = vadd.f32 %v395_v6, %v363_v10  ;;  %v428_v18 = vadd.f32 %v396_v7, %v364_v11 }
  0x38   : > { %485 = vst [vmem:[%s761_s6 + $0xc0] sm:$0xff] %v453_v12  ;;  %486 = vst [vmem:[%s761_s6 + $0xc8] sm:$0xff] %v454_v1  ;;  %v457_v19 = vmax.f32 %v425_v13, 0.0  ;;  %v458_v20 = vmax.f32 %v426_v14, 0.0 }
  0x39   : > { %487 = vst [vmem:[%s761_s6 + $0xd0] sm:$0xff] %v455_v15  ;;  %488 = vst [vmem:[%s761_s6 + $0xd8] sm:$0xff] %v456_v16  ;;  %v459_v21 = vmax.f32 %v427_v17, 0.0  ;;  %v460_v5 = vmax.f32 %v428_v18, 0.0 }
  0x3a   : > { %489 = vst [vmem:[%s761_s6 + $0xe0] sm:$0xff] %v457_v19  ;;  %490 = vst [vmem:[%s761_s6 + $0xe8] sm:$0xff] %v458_v20 }
  0x3b   : > { %491 = vst [vmem:[%s761_s6 + $0xf0] sm:$0xff] %v459_v21  ;;  %492 = vst [vmem:[%s761_s6 + $0xf8] sm:$0xff] %v460_v5 }
  0x3c PF: > { %s14_s15 = sadd.s32 1, %s669_s15  }
  0x3d   : > { %p11_p4 = scmp.ge.s32.totalorder %s14_s15, 4  }
  0x3f   :  { %13 = sbr.rel (!%p11_p4) target bundleno = 1 (0x1), region = 69 }

// kernel: bottleneck_forward.4
= control target key start
LH: loop header
LB: loop body
LE: loop exit
PB: predicated region body
PF: predicated region fallthrough
CT: control target
= control target key end

     0   :  { %s1158_s12 = smov 0   ;;  %s1303_s0 = inlined_call_operand.vmem [shape: f32[512,128], index: 0, kind: input, shape index: {}]   ;;  %s1304_s1 = inlined_call_operand.vmem [shape: bf16[128,128], index: 1, kind: input, shape index: {}]   ;;  %s1305_s2 = inlined_call_operand.vmem [shape: bf16[512,128], index: 2, kind: output, shape index: {0}]   ;;  %s1306_s3 = inlined_call_operand.vmem [shape: f32[2,2,128], index: 3, kind: output, shape index: {1}]  }
   0x1 LB: > { %s1164_s13 = sadd.s32 4294967295, %s1136_s12   ;;  %p851_p0 = scmp.ge.s32.totalorder %s1136_s12, 1  ;;  %s1136_s12 = sphi %s1158_s12, %s14_s12  }
   0x2   : > { %p141_p1 = scmp.lt.s32.totalorder %s1136_s12, 3 }
   0x4   : > { %p142_p2 = pnand %p851_p0, %p141_p1 }
   0x5   : > { %v1122_v0 = vld [vmem:[%s1304_s1] sm:$0xff] (!%p142_p2)   ;;  %s852_s16 = sshll.u32 (!%p142_p2), %s1164_s13, 5  ;;  %v1123_v1 = vld [vmem:[%s1304_s1 + $0x8] sm:$0xff] (!%p142_p2)   ;;  %v1124_v2 = vld [vmem:[%s1304_s1 + $0x10] sm:$0xff] (!%p142_p2)   ;;  %p181_p4 = scmp.lt.s32.totalorder (!%p142_p2), %s1164_s13, 1  ;;  %vm757_vm0 = vcmask (!%p142_p2), 1040384  }
   0x6   : > { %145 = sbr.rel (%p142_p2) target bundleno = 337 (0x151), region = 28  ;;  %p170_p3 = scmp.lt.s32.totalorder (!%p142_p2), %s852_s16, 63  ;;  %1050 = vmatprep.subr.bf16.mxu0 (!%p142_p2), %v1122_v0  ;;  %1098 = vmatprep.subr.bf16.mxu1 (!%p142_p2), %v1122_v0  ;;  %v1125_v3 = vld [vmem:[%s1304_s1 + $0x18] sm:$0xff] (!%p142_p2)   ;;  %v1126_v7 = vld [vmem:[%s1304_s1 + $0x20] sm:$0xff] (!%p142_p2)   ;;  %v1127_v11 = vld [vmem:[%s1304_s1 + $0x28] sm:$0xff] (!%p142_p2)  }
   0x7   : > { %1051 = vmatpush3.bf16.msra.mxu0 (!%p142_p2), %v1122_v0  ;;  %1106 = vmatpush3.bf16.msra.mxu1 (!%p142_p2), %v1122_v0  ;;  %v1128_v12 = vld [vmem:[%s1304_s1 + $0x30] sm:$0xff] (!%p142_p2)   ;;  %v1129_v13 = vld [vmem:[%s1304_s1 + $0x38] sm:$0xff] (!%p142_p2)  }
   0x8   : > { %1052 = vmatprep.subr.bf16.mxu0 (!%p142_p2), %v1123_v1  ;;  %1099 = vmatprep.subr.bf16.mxu1 (!%p142_p2), %v1123_v1 }
   0xb   : > { %1053 = vmatpush3.bf16.msra.mxu0 (!%p142_p2), %v1123_v1  ;;  %1107 = vmatpush3.bf16.msra.mxu1 (!%p142_p2), %v1123_v1 }
   0xc   : > { %1054 = vmatprep.subr.bf16.mxu0 (!%p142_p2), %v1124_v2  ;;  %1100 = vmatprep.subr.bf16.mxu1 (!%p142_p2), %v1124_v2 }
   0xd   : > { %s1308_s16 = smov (!%p170_p3, %s852_s16), 63  ;;  %s1310_s13 = smov (!%p181_p4, %s1164_s13), 1 }
   0xe   : > { %s853_s21 = sshll.u32 %s1308_s16, 3  ;;  %s855_s8 = sshll.u32 %s1308_s16, 2 }
   0xf   : > { %s1184_s24 = scalar_lea.vmem %s1303_s0, %s853_s21  ;;  %1055 = vmatpush3.bf16.msra.mxu0 %v1124_v2  ;;  %1108 = vmatpush3.bf16.msra.mxu1 %v1124_v2  ;;  %s1237_s11 = scalar_lea.vmem %s1305_s2, %s855_s8 }
  0x10   : > { %v186_v4 = vld [vmem:[%s1184_s24] sm:$0xff]  ;;  %v187_v5 = vld [vmem:[%s1184_s24 + $0x8] sm:$0xff]  ;;  %1056 = vmatprep.subr.bf16.mxu0 %v1125_v3  ;;  %1101 = vmatprep.subr.bf16.mxu1 %v1125_v3  ;;  %v188_v14 = vld [vmem:[%s1184_s24 + $0x10] sm:$0xff]  ;;  %s856_s14 = sshll.u32 %s1310_s13, 1 }
  0x11   : > { %v218_v6 = vpack.c.bf16 %v187_v5, %v186_v4  ;;  %v202_v8 = vld [vmem:[%s1184_s24 + $0x80] sm:$0xff]  ;;  %v203_v9 = vld [vmem:[%s1184_s24 + $0x88] sm:$0xff]  ;;  %v189_v15 = vld [vmem:[%s1184_s24 + $0x18] sm:$0xff]  ;;  %s184_s17 = scalar_lea.vmem %s1306_s3, %s856_s14 }
  0x12   : > { %v226_v10 = vpack.c.bf16 %v203_v9, %v202_v8  ;;  %v190_v16 = vld [vmem:[%s1184_s24 + $0x20] sm:$0xff]  ;;  %v191_v17 = vld [vmem:[%s1184_s24 + $0x28] sm:$0xff]  ;;  %v204_v18 = vld [vmem:[%s1184_s24 + $0x90] sm:$0xff]  ;;  %v219_v22 = vpack.c.bf16 %v189_v15, %v188_v14 }
  0x13   : > { %1066 = vmatprep.mubr.bf16.mxu0 %v218_v6  ;;  %1057 = vmatpush3.bf16.msra.mxu0 %v1125_v3  ;;  %v205_v19 = vld [vmem:[%s1184_s24 + $0x98] sm:$0xff]  ;;  %v206_v20 = vld [vmem:[%s1184_s24 + $0xa0] sm:$0xff]  ;;  %v207_v21 = vld [vmem:[%s1184_s24 + $0xa8] sm:$0xff]  ;;  %v220_v23 = vpack.c.bf16 %v191_v17, %v190_v16 }
  0x14   : > { %1058 = vmatprep.subr.bf16.mxu0 %v1126_v7  ;;  %1109 = vmatpush3.bf16.msra.mxu1 %v1125_v3  ;;  %v227_v24 = vpack.c.bf16 %v205_v19, %v204_v18  ;;  %v228_v25 = vpack.c.bf16 %v207_v21, %v206_v20  ;;  %v192_v26 = vld [vmem:[%s1184_s24 + $0x30] sm:$0xff]  ;;  %v193_v27 = vld [vmem:[%s1184_s24 + $0x38] sm:$0xff]  ;;  %v194_v28 = vld [vmem:[%s1184_s24 + $0x40] sm:$0xff] }
  0x15   : > { %1102 = vmatprep.subr.bf16.mxu1 %v1126_v7  ;;  %1082 = vmatprep.mubr.bf16.mxu1 %v226_v10  ;;  %v195_v29 = vld [vmem:[%s1184_s24 + $0x48] sm:$0xff]  ;;  %v208_v30 = vld [vmem:[%s1184_s24 + $0xb0] sm:$0xff]  ;;  %v209_v31 = vld [vmem:[%s1184_s24 + $0xb8] sm:$0xff]  ;;  %v221_v34 = vpack.c.bf16 %v193_v27, %v192_v26 }
  0x16   : > { %v210_v32 = vld [vmem:[%s1184_s24 + $0xc0] sm:$0xff]  ;;  %v211_v33 = vld [vmem:[%s1184_s24 + $0xc8] sm:$0xff]  ;;  %v222_v35 = vpack.c.bf16 %v195_v29, %v194_v28  ;;  %v229_v36 = vpack.c.bf16 %v209_v31, %v208_v30  ;;  %v196_v38 = vld [vmem:[%s1184_s24 + $0x50] sm:$0xff] }
  0x17   : > { %1059 = vmatpush3.bf16.msra.mxu0 %v1126_v7  ;;  %v230_v37 = vpack.c.bf16 %v211_v33, %v210_v32  ;;  %v197_v39 = vld [vmem:[%s1184_s24 + $0x58] sm:$0xff]  ;;  %v198_v40 = vld [vmem:[%s1184_s24 + $0x60] sm:$0xff]  ;;  %v199_v41 = vld [vmem:[%s1184_s24 + $0x68] sm:$0xff] }
  0x18   : > { %1060 = vmatprep.subr.bf16.mxu0 %v1127_v11  ;;  %1110 = vmatpush3.bf16.msra.mxu1 %v1126_v7  ;;  %v212_v42 = vld [vmem:[%s1184_s24 + $0xd0] sm:$0xff]  ;;  %v213_v43 = vld [vmem:[%s1184_s24 + $0xd8] sm:$0xff]  ;;  %v214_v44 = vld [vmem:[%s1184_s24 + $0xe0] sm:$0xff]  ;;  %v223_v46 = vpack.c.bf16 %v197_v39, %v196_v38  ;;  %v224_v47 = vpack.c.bf16 %v199_v41, %v198_v40 }
  0x19   : > { %1103 = vmatprep.subr.bf16.mxu1 %v1127_v11  ;;  %v215_v45 = vld [vmem:[%s1184_s24 + $0xe8] sm:$0xff]  ;;  %v231_v48 = vpack.c.bf16 %v213_v43, %v212_v42  ;;  %v200_v50 = vld [vmem:[%s1184_s24 + $0x70] sm:$0xff]  ;;  %v201_v51 = vld [vmem:[%s1184_s24 + $0x78] sm:$0xff] }
  0x1a   : > { %v232_v49 = vpack.c.bf16 %v215_v45, %v214_v44  ;;  %v216_v52 = vld [vmem:[%s1184_s24 + $0xf0] sm:$0xff]  ;;  %v217_v53 = vld [vmem:[%s1184_s24 + $0xf8] sm:$0xff]  ;;  %v225_v54 = vpack.c.bf16 %v201_v51, %v200_v50 }
  0x1b   : > { %1061 = vmatpush3.bf16.msra.mxu0 %v1127_v11  ;;  %v233_v55 = vpack.c.bf16 %v217_v53, %v216_v52 }
  0x1c   : > { %1062 = vmatprep.subr.bf16.mxu0 %v1128_v12  ;;  %1111 = vmatpush3.bf16.msra.mxu1 %v1127_v11 }
  0x1d   : > { %1104 = vmatprep.subr.bf16.mxu1 %v1128_v12 }
  0x1f   : > { %1063 = vmatpush3.bf16.msra.mxu0 %v1128_v12 }
  0x20   : > { %1064 = vmatprep.subr.bf16.mxu0 %v1129_v13  ;;  %1112 = vmatpush3.bf16.msra.mxu1 %v1128_v12 }
  0x21   : > { %1105 = vmatprep.subr.bf16.mxu1 %v1129_v13 }
  0x23   : > { %1065 = vmatpush3.bf16.msra.mxu0 %v1129_v13 }
  0x24   : > { %1113 = vmatpush3.bf16.msra.mxu1 %v1129_v13 }
  0x26   : > { %1067 = vmatmul.mubr.bf16.vlgmr.msra.gmra.mrb[0].mxu0 %v219_v22 }
  0x27   : > { %1070 = vmatprep.mubr.bf16.mxu0 %v220_v23  ;;  %1083 = vmatmul.mubr.bf16.vlgmr.msra.gmra.mrb[0].mxu1 %v227_v24 }
  0x28   : > { %1086 = vmatprep.mubr.bf16.mxu1 %v228_v25 }
  0x2e   : > { %1071 = vmatmul.mubr.bf16.gmra.mrb[4].mxu0 %v221_v34 }
  0x2f   : > { %1074 = vmatprep.mubr.bf16.mxu0 %v222_v35  ;;  %1087 = vmatmul.mubr.bf16.gmra.mrb[4].mxu1 %v229_v36 }
  0x30   : > { %1090 = vmatprep.mubr.bf16.mxu1 %v230_v37 }
  0x36   : > { %1075 = vmatmul.mubr.bf16.gmra.mrb[8].mxu0 %v223_v46 }
  0x37   : > { %1078 = vmatprep.mubr.bf16.mxu0 %v224_v47  ;;  %1091 = vmatmul.mubr.bf16.gmra.mrb[8].mxu1 %v231_v48 }
  0x38   : > { %1094 = vmatprep.mubr.bf16.mxu1 %v232_v49 }
  0x3e   : > { %1079 = vmatmul.mubr.bf16.gmra.mrb[12].mxu0 %v225_v54 }
  0x3f   : > { %1095 = vmatmul.mubr.bf16.gmra.mrb[12].mxu1 %v233_v55 }
  0xf9   : > { %v1068_v56 = vpop.f32.mrb[0].mxu0 }
  0xfa   : > { %v332_v57 = vpop.f32.mrb[1].mxu0  ;;  %v1084_v58 = vpop.f32.mrb[0].mxu1 }
  0xfb   : > { %v1069_v59 = vpop.f32.mrb[2].mxu0  ;;  %v396_v60 = vpop.f32.mrb[1].mxu1 }
  0xfc   : > { %v460_v61 = vpack.c.bf16 %v1069_v59, %v1068_v56  ;;  %v335_v62 = vpop.f32.mrb[3].mxu0  ;;  %v1085_v63 = vpop.f32.mrb[2].mxu1 }
  0xfd   : > { %v459_v0 = vpack.c.bf16 %v335_v62, %v332_v57  ;;  %v1239_v1 = vpack.c.bf16 %v1085_v63, %v1084_v58  ;;  %v399_v2 = vpop.f32.mrb[3].mxu1 }
  0xfe   : > { %1011 = vst [vmem:[%s1237_s11 + $0x8] sm:$0xff] %v460_v61   ;;  %v1242_v3 = vpack.c.bf16 %v399_v2, %v396_v60  ;;  %v621_v4 = vunpack.c.l.bf16 %v460_v61  ;;  %v622_v7 = vunpack.c.h.bf16 %v460_v61 }
  0xff   : > { %935 = vst [vmem:[%s1237_s11] sm:$0xff] %v459_v0   ;;  %v619_v5 = vunpack.c.l.bf16 %v459_v0  ;;  %v620_v6 = vunpack.c.h.bf16 %v459_v0  ;;  %1019 = vst [vmem:[%s1237_s11 + $0x48] sm:$0xff] %v1239_v1  }
 0x100   : > { %1018 = vst [vmem:[%s1237_s11 + $0x40] sm:$0xff] %v1242_v3   ;;  %v690_v14 = vmul.f32 %v621_v4, %v621_v4  ;;  %v691_v19 = vmul.f32 %v622_v7, %v622_v7 }
 0x101   : > { %v651_v8 = vadd.f32 %v620_v6, %v619_v5  ;;  %v688_v9 = vmul.f32 %v619_v5, %v619_v5  ;;  %v689_v10 = vmul.f32 %v620_v6, %v620_v6  ;;  %v1072_v11 = vpop.f32.mrb[4].mxu0 }
 0x102   : > { %v348_v12 = vpop.f32.mrb[5].mxu0  ;;  %v1088_v13 = vpop.f32.mrb[4].mxu1 }
 0x103   : > { %v652_v15 = vadd.f32 %v651_v8, %v621_v4  ;;  %v720_v16 = vadd.f32 %v689_v10, %v688_v9  ;;  %v1073_v17 = vpop.f32.mrb[6].mxu0  ;;  %v412_v18 = vpop.f32.mrb[5].mxu1 }
 0x104   : > { %v462_v20 = vpack.c.bf16 %v1073_v17, %v1072_v11  ;;  %v351_v21 = vpop.f32.mrb[7].mxu0  ;;  %v1089_v22 = vpop.f32.mrb[6].mxu1 }
 0x105   : > { %v721_v23 = vadd.f32 %v720_v16, %v690_v14  ;;  %v461_v24 = vpack.c.bf16 %v351_v21, %v348_v12  ;;  %v653_v25 = vadd.f32 %v652_v15, %v622_v7  ;;  %v1249_v26 = vpack.c.bf16 %v1089_v22, %v1088_v13  ;;  %v415_v27 = vpop.f32.mrb[7].mxu1 }
 0x106   : > { %1013 = vst [vmem:[%s1237_s11 + $0x18] sm:$0xff] %v462_v20   ;;  %v1252_v28 = vpack.c.bf16 %v415_v27, %v412_v18  ;;  %v625_v32 = vunpack.c.l.bf16 %v462_v20  ;;  %v626_v36 = vunpack.c.h.bf16 %v462_v20 }
 0x107   : > { %1012 = vst [vmem:[%s1237_s11 + $0x10] sm:$0xff] %v461_v24   ;;  %v623_v29 = vunpack.c.l.bf16 %v461_v24  ;;  %v624_v30 = vunpack.c.h.bf16 %v461_v24  ;;  %v722_v31 = vadd.f32 %v721_v23, %v691_v19  ;;  %1021 = vst [vmem:[%s1237_s11 + $0x58] sm:$0xff] %v1249_v26  }
 0x108   : > { %1020 = vst [vmem:[%s1237_s11 + $0x50] sm:$0xff] %v1252_v28   ;;  %v694_v44 = vmul.f32 %v625_v32, %v625_v32  ;;  %v695_v53 = vmul.f32 %v626_v36, %v626_v36 }
 0x109   : > { %v654_v33 = vadd.f32 %v653_v25, %v623_v29  ;;  %v692_v34 = vmul.f32 %v623_v29, %v623_v29  ;;  %v1076_v35 = vpop.f32.mrb[8].mxu0  ;;  %v693_v40 = vmul.f32 %v624_v30, %v624_v30 }
 0x10a   : > { %v364_v37 = vpop.f32.mrb[9].mxu0  ;;  %v1092_v38 = vpop.f32.mrb[8].mxu1 }
 0x10b   : > { %v655_v39 = vadd.f32 %v654_v33, %v624_v30  ;;  %v723_v41 = vadd.f32 %v722_v31, %v692_v34  ;;  %v1077_v42 = vpop.f32.mrb[10].mxu0  ;;  %v428_v43 = vpop.f32.mrb[9].mxu1 }
 0x10c   : > { %v464_v45 = vpack.c.bf16 %v1077_v42, %v1076_v35  ;;  %v367_v46 = vpop.f32.mrb[11].mxu0  ;;  %v1093_v47 = vpop.f32.mrb[10].mxu1 }
 0x10d   : > { %v656_v48 = vadd.f32 %v655_v39, %v625_v32  ;;  %v724_v49 = vadd.f32 %v723_v41, %v693_v40  ;;  %v463_v50 = vpack.c.bf16 %v367_v46, %v364_v37  ;;  %v1259_v51 = vpack.c.bf16 %v1093_v47, %v1092_v38  ;;  %v431_v52 = vpop.f32.mrb[11].mxu1 }
 0x10e   : > { %1015 = vst [vmem:[%s1237_s11 + $0x28] sm:$0xff] %v464_v45   ;;  %v1262_v54 = vpack.c.bf16 %v431_v52, %v428_v43  ;;  %v629_v59 = vunpack.c.l.bf16 %v464_v45  ;;  %v630_v0 = vunpack.c.h.bf16 %v464_v45  ;;  %v635_v38 = vunpack.c.l.bf16 %v1242_v3 }
 0x10f   : > { %v725_v55 = vadd.f32 %v724_v49, %v694_v44  ;;  %1014 = vst [vmem:[%s1237_s11 + $0x20] sm:$0xff] %v463_v50   ;;  %v627_v56 = vunpack.c.l.bf16 %v463_v50  ;;  %v628_v57 = vunpack.c.h.bf16 %v463_v50  ;;  %v657_v58 = vadd.f32 %v656_v48, %v626_v36  ;;  %1023 = vst [vmem:[%s1237_s11 + $0x68] sm:$0xff] %v1259_v51  }
 0x110   : > { %1022 = vst [vmem:[%s1237_s11 + $0x60] sm:$0xff] %v1262_v54   ;;  %v698_v10 = vmul.f32 %v629_v59, %v629_v59  ;;  %v699_v19 = vmul.f32 %v630_v0, %v630_v0  ;;  %v636_v41 = vunpack.c.h.bf16 %v1242_v3  ;;  %v637_v43 = vunpack.c.l.bf16 %v1239_v1 }
 0x111   : > { %v658_v60 = vadd.f32 %v657_v58, %v627_v56  ;;  %v696_v61 = vmul.f32 %v627_v56, %v627_v56  ;;  %v726_v62 = vadd.f32 %v725_v55, %v695_v53  ;;  %v1080_v63 = vpop.f32.mrb[12].mxu0  ;;  %v697_v6 = vmul.f32 %v628_v57, %v628_v57 }
 0x112   : > { %v380_v2 = vpop.f32.mrb[13].mxu0  ;;  %v1096_v4 = vpop.f32.mrb[12].mxu1  ;;  %v704_v45 = vmul.f32 %v635_v38, %v635_v38  ;;  %v638_v47 = vunpack.c.h.bf16 %v1239_v1  ;;  %v705_v49 = vmul.f32 %v636_v41, %v636_v41  ;;  %v706_v52 = vmul.f32 %v637_v43, %v637_v43 }
 0x113   : > { %v659_v5 = vadd.f32 %v658_v60, %v628_v57  ;;  %v727_v7 = vadd.f32 %v726_v62, %v696_v61  ;;  %v1081_v8 = vpop.f32.mrb[14].mxu0  ;;  %v444_v9 = vpop.f32.mrb[13].mxu1  ;;  %v639_v56 = vunpack.c.l.bf16 %v1252_v28  ;;  %v640_v3 = vunpack.c.h.bf16 %v1252_v28 }
 0x114   : > { %v466_v11 = vpack.c.bf16 %v1081_v8, %v1080_v63  ;;  %v383_v12 = vpop.f32.mrb[15].mxu0  ;;  %v1097_v13 = vpop.f32.mrb[14].mxu1  ;;  %v707_v57 = vmul.f32 %v638_v47, %v638_v47  ;;  %v641_v60 = vunpack.c.l.bf16 %v1249_v26  ;;  %v642_v1 = vunpack.c.h.bf16 %v1249_v26 }
 0x115   : > { %v660_v14 = vadd.f32 %v659_v5, %v629_v59  ;;  %v728_v15 = vadd.f32 %v727_v7, %v697_v6  ;;  %v465_v16 = vpack.c.bf16 %v383_v12, %v380_v2  ;;  %v1269_v17 = vpack.c.bf16 %v1097_v13, %v1096_v4  ;;  %v447_v18 = vpop.f32.mrb[15].mxu1 }
 0x116   : > { %1017 = vst [vmem:[%s1237_s11 + $0x38] sm:$0xff] %v466_v11   ;;  %v1272_v20 = vpack.c.bf16 %v447_v18, %v444_v9  ;;  %v633_v25 = vunpack.c.l.bf16 %v466_v11  ;;  %v634_v31 = vunpack.c.h.bf16 %v466_v11  ;;  %v708_v62 = vmul.f32 %v639_v56, %v639_v56 }
 0x117   : > { %v729_v21 = vadd.f32 %v728_v15, %v698_v10  ;;  %1016 = vst [vmem:[%s1237_s11 + $0x30] sm:$0xff] %v465_v16   ;;  %v631_v22 = vunpack.c.l.bf16 %v465_v16  ;;  %v632_v23 = vunpack.c.h.bf16 %v465_v16  ;;  %v661_v24 = vadd.f32 %v660_v14, %v630_v0  ;;  %1025 = vst [vmem:[%s1237_s11 + $0x78] sm:$0xff] %v1269_v17  }
 0x118   : > { %1024 = vst [vmem:[%s1237_s11 + $0x70] sm:$0xff] %v1272_v20   ;;  %v702_v35 = vmul.f32 %v633_v25, %v633_v25  ;;  %v703_v39 = vmul.f32 %v634_v31, %v634_v31  ;;  %v709_v2 = vmul.f32 %v640_v3, %v640_v3  ;;  %v710_v5 = vmul.f32 %v641_v60, %v641_v60 }
 0x119   : > { %v662_v27 = vadd.f32 %v661_v24, %v631_v22  ;;  %v700_v29 = vmul.f32 %v631_v22, %v631_v22  ;;  %v730_v30 = vadd.f32 %v729_v21, %v699_v19  ;;  %v701_v33 = vmul.f32 %v632_v23, %v632_v23 }
 0x11a   : > { %v643_v8 = vunpack.c.l.bf16 %v1262_v54  ;;  %v711_v9 = vmul.f32 %v642_v1, %v642_v1  ;;  %v644_v28 = vunpack.c.h.bf16 %v1262_v54  ;;  %v645_v12 = vunpack.c.l.bf16 %v1259_v51 }
 0x11b   : > { %v663_v32 = vadd.f32 %v662_v27, %v632_v23  ;;  %v731_v34 = vadd.f32 %v730_v30, %v700_v29  ;;  %v646_v26 = vunpack.c.h.bf16 %v1259_v51  ;;  %v647_v24 = vunpack.c.l.bf16 %v1272_v20 }
 0x11c   : > { %v712_v14 = vmul.f32 %v643_v8, %v643_v8  ;;  %v713_v18 = vmul.f32 %v644_v28, %v644_v28  ;;  %v714_v21 = vmul.f32 %v645_v12, %v645_v12  ;;  %v648_v54 = vunpack.c.h.bf16 %v1272_v20 }
 0x11d   : > { %v664_v36 = vadd.f32 %v663_v32, %v633_v25  ;;  %v732_v37 = vadd.f32 %v731_v34, %v701_v33  ;;  %v715_v25 = vmul.f32 %v646_v26, %v646_v26  ;;  %v649_v30 = vunpack.c.l.bf16 %v1269_v17 }
 0x11e   : > { %v716_v32 = vmul.f32 %v647_v24, %v647_v24  ;;  %v650_v51 = vunpack.c.h.bf16 %v1269_v17 }
 0x11f   : > { %v733_v40 = vadd.f32 %v732_v37, %v702_v35  ;;  %v665_v42 = vadd.f32 %v664_v36, %v634_v31  ;;  %v717_v35 = vmul.f32 %v648_v54, %v648_v54  ;;  %v718_v37 = vmul.f32 %v649_v30, %v649_v30 }
 0x121   : > { %v666_v44 = vadd.f32 %v665_v42, %v635_v38  ;;  %v734_v46 = vadd.f32 %v733_v40, %v703_v39  ;;  %v719_v40 = vmul.f32 %v650_v51, %v650_v51 }
 0x123   : > { %v667_v48 = vadd.f32 %v666_v44, %v636_v41  ;;  %v735_v50 = vadd.f32 %v734_v46, %v704_v45 }
 0x125   : > { %v668_v53 = vadd.f32 %v667_v48, %v637_v43  ;;  %v736_v55 = vadd.f32 %v735_v50, %v705_v49 }
 0x127   : > { %v737_v58 = vadd.f32 %v736_v55, %v706_v52  ;;  %v669_v59 = vadd.f32 %v668_v53, %v638_v47 }
 0x129   : > { %v670_v61 = vadd.f32 %v669_v59, %v639_v56  ;;  %v738_v63 = vadd.f32 %v737_v58, %v707_v57 }
 0x12b   : > { %v671_v0 = vadd.f32 %v670_v61, %v640_v3  ;;  %v739_v4 = vadd.f32 %v738_v63, %v708_v62 }
 0x12d   : > { %v672_v6 = vadd.f32 %v671_v0, %v641_v60  ;;  %v740_v7 = vadd.f32 %v739_v4, %v709_v2 }
 0x12f   : > { %v741_v10 = vadd.f32 %v740_v7, %v710_v5  ;;  %v673_v11 = vadd.f32 %v672_v6, %v642_v1 }
 0x131   : > { %v674_v13 = vadd.f32 %v673_v11, %v643_v8  ;;  %v742_v15 = vadd.f32 %v741_v10, %v711_v9 }
 0x133   : > { %v675_v16 = vadd.f32 %v674_v13, %v644_v28  ;;  %v743_v19 = vadd.f32 %v742_v15, %v712_v14 }
 0x135   : > { %v676_v22 = vadd.f32 %v675_v16, %v645_v12  ;;  %v744_v23 = vadd.f32 %v743_v19, %v713_v18 }
 0x137   : > { %v745_v27 = vadd.f32 %v744_v23, %v714_v21  ;;  %v677_v29 = vadd.f32 %v676_v22, %v646_v26 }
 0x139   : > { %v678_v31 = vadd.f32 %v677_v29, %v647_v24  ;;  %v746_v33 = vadd.f32 %v745_v27, %v715_v25 }
 0x13b   : > { %v679_v34 = vadd.f32 %v678_v31, %v648_v54  ;;  %v747_v36 = vadd.f32 %v746_v33, %v716_v32 }
 0x13d   : > { %v680_v38 = vadd.f32 %v679_v34, %v649_v30  ;;  %v748_v39 = vadd.f32 %v747_v36, %v717_v35 }
 0x13f   : > { %v681_v41 = vadd.f32 %v680_v38, %v650_v51  ;;  %v749_v42 = vadd.f32 %v748_v39, %v718_v37 }
 0x141   : > { %v682_v20 = vrot.slane %v681_v41, 4  ;;  %v750_v43 = vadd.f32 %v749_v42, %v719_v40 }
 0x143   : > { %v683_v44 = vadd.f32 %v682_v20, %v681_v41  ;;  %v751_v45 = vrot.slane %v750_v43, 4 }
 0x145   : > { %v684_v46 = vrot.slane %v683_v44, 2  ;;  %v752_v47 = vadd.f32 %v751_v45, %v750_v43 }
 0x147   : > { %v685_v48 = vadd.f32 %v684_v46, %v683_v44  ;;  %v753_v17 = vrot.slane %v752_v47, 2 }
 0x149   : > { %v686_v49 = vrot.slane %v685_v48, 1  ;;  %v754_v50 = vadd.f32 %v753_v17, %v752_v47 }
 0x14b   : > { %v755_v52 = vrot.slane %v754_v50, 1  ;;  %v687_v53 = vadd.f32 %v686_v49, %v685_v48 }
 0x14d   : > { %v756_v55 = vadd.f32 %v755_v52, %v754_v50 }
 0x14f   : > { %v758_v56 = vsel %vm757_vm0, %v687_v53, %v756_v55 }
 0x150   : > { %759 = vst [vmem:[%s184_s17] sm:$0x3] %v758_v56 }
 0x151 PF: > { %s14_s12 = sadd.s32 1, %s1136_s12  }
 0x152   : > { %p11_p5 = scmp.ge.s32.totalorder %s14_s12, 4  }
 0x154   :  { %13 = sbr.rel (!%p11_p5) target bundleno = 1 (0x1), region = 70 }

// kernel: bottleneck_forward.6
= control target key start
LH: loop header
LB: loop body
LE: loop exit
PB: predicated region body
PF: predicated region fallthrough
CT: control target
= control target key end

     0   :  { %s1445_s18 = smov 0   ;;  %s1676_s0 = inlined_call_operand.vmem [shape: bf16[512,128], index: 0, kind: input, shape index: {}]   ;;  %s1677_s1 = inlined_call_operand.vmem [shape: bf16[128,128], index: 1, kind: input, shape index: {}]   ;;  %s1678_s2 = inlined_call_operand.vmem [shape: f32[1,128], index: 2, kind: input, shape index: {}]   ;;  %s1679_s3 = inlined_call_operand.vmem [shape: f32[1,128], index: 3, kind: input, shape index: {}]   ;;  %s1680_s4 = inlined_call_operand.vmem [shape: bf16[512,128], index: 4, kind: output, shape index: {0}]   ;;  %s1681_s5 = inlined_call_operand.vmem [shape: f32[2,2,128], index: 5, kind: output, shape index: {1}]  }
   0x1 LB: > { %s1451_s19 = sadd.s32 4294967295, %s1413_s18   ;;  %p1047_p0 = scmp.ge.s32.totalorder %s1413_s18, 1  ;;  %s1413_s18 = sphi %s1445_s18, %s16_s18  }
   0x2   : > { %p191_p1 = scmp.lt.s32.totalorder %s1413_s18, 3 }
   0x4   : > { %p192_p2 = pnand %p1047_p0, %p191_p1 }
   0x5   : > { %v1399_v0 = vld [vmem:[%s1677_s1] sm:$0xff] (!%p192_p2)   ;;  %s1048_s22 = sshll.u32 (!%p192_p2), %s1451_s19, 5  ;;  %v1400_v1 = vld [vmem:[%s1677_s1 + $0x8] sm:$0xff] (!%p192_p2)   ;;  %v1401_v2 = vld [vmem:[%s1677_s1 + $0x10] sm:$0xff] (!%p192_p2)   ;;  %p235_p4 = scmp.lt.s32.totalorder (!%p192_p2), %s1451_s19, 1  ;;  %vm953_vm0 = vcmask (!%p192_p2), 1040384  }
   0x6   : > { %195 = sbr.rel (%p192_p2) target bundleno = 337 (0x151), region = 36  ;;  %p224_p3 = scmp.lt.s32.totalorder (!%p192_p2), %s1048_s22, 63  ;;  %1327 = vmatprep.subr.bf16.mxu0 (!%p192_p2), %v1399_v0  ;;  %1375 = vmatprep.subr.bf16.mxu1 (!%p192_p2), %v1399_v0  ;;  %v1402_v3 = vld [vmem:[%s1677_s1 + $0x18] sm:$0xff] (!%p192_p2)   ;;  %v1482_v5 = vld [vmem:[%s1678_s2] ss:$0 sm:$0xff] (!%p192_p2)  ;;  %v1404_v34 = vld [vmem:[%s1677_s1 + $0x28] sm:$0xff] (!%p192_p2)  }
   0x7   : > { %1328 = vmatpush3.bf16.msra.mxu0 (!%p192_p2), %v1399_v0  ;;  %1383 = vmatpush3.bf16.msra.mxu1 (!%p192_p2), %v1399_v0  ;;  %v1490_v11 = vld [vmem:[%s1679_s3] ss:$0 sm:$0xff] (!%p192_p2)  ;;  %v1405_v49 = vld [vmem:[%s1677_s1 + $0x30] sm:$0xff] (!%p192_p2)   ;;  %v1406_v63 = vld [vmem:[%s1677_s1 + $0x38] sm:$0xff] (!%p192_p2)  }
   0x8   : > { %1329 = vmatprep.subr.bf16.mxu0 (!%p192_p2), %v1400_v1  ;;  %1376 = vmatprep.subr.bf16.mxu1 (!%p192_p2), %v1400_v1  ;;  %v1403_v20 = vld [vmem:[%s1677_s1 + $0x20] sm:$0xff] (!%p192_p2)  }
   0xb   : > { %1330 = vmatpush3.bf16.msra.mxu0 (!%p192_p2), %v1400_v1  ;;  %1384 = vmatpush3.bf16.msra.mxu1 (!%p192_p2), %v1400_v1 }
   0xc   : > { %1331 = vmatprep.subr.bf16.mxu0 (!%p192_p2), %v1401_v2  ;;  %1377 = vmatprep.subr.bf16.mxu1 (!%p192_p2), %v1401_v2 }
   0xd   : > { %s1683_s22 = smov (!%p224_p3, %s1048_s22), 63  ;;  %s1685_s19 = smov (!%p235_p4, %s1451_s19), 1 }
   0xe   : > { %s1049_s27 = sshll.u32 %s1683_s22, 2  ;;  %s1052_s22 = sshll.u32 %s1685_s19, 1 }
   0xf   : > { %s1473_s30 = scalar_lea.vmem %s1676_s0, %s1049_s27  ;;  %1332 = vmatpush3.bf16.msra.mxu0 %v1401_v2  ;;  %1385 = vmatpush3.bf16.msra.mxu1 %v1401_v2  ;;  %s1615_s25 = scalar_lea.vmem %s1680_s4, %s1049_s27 }
  0x10   : > { %v1130_v4 = vld [vmem:[%s1473_s30] sm:$0xff]   ;;  %v1273_v8 = vld [vmem:[%s1473_s30 + $0x8] sm:$0xff]   ;;  %v1274_v9 = vld [vmem:[%s1473_s30 + $0x10] sm:$0xff]   ;;  %1333 = vmatprep.subr.bf16.mxu0 %v1402_v3  ;;  %1378 = vmatprep.subr.bf16.mxu1 %v1402_v3  ;;  %s238_s28 = scalar_lea.vmem %s1681_s5, %s1052_s22 }
  0x11   : > { %v1131_v6 = vunpack.c.l.bf16 %v1130_v4  ;;  %v1132_v7 = vunpack.c.h.bf16 %v1130_v4  ;;  %v1275_v10 = vld [vmem:[%s1473_s30 + $0x18] sm:$0xff]   ;;  %v1135_v12 = vunpack.c.l.bf16 %v1273_v8  ;;  %v1136_v13 = vunpack.c.h.bf16 %v1273_v8  ;;  %v1276_v29 = vld [vmem:[%s1473_s30 + $0x20] sm:$0xff]   ;;  %v1277_v33 = vld [vmem:[%s1473_s30 + $0x28] sm:$0xff]  }
  0x12   : > { %v1139_v14 = vunpack.c.l.bf16 %v1274_v9  ;;  %v1140_v15 = vunpack.c.h.bf16 %v1274_v9  ;;  %v1143_v18 = vunpack.c.l.bf16 %v1275_v10  ;;  %v1144_v19 = vunpack.c.h.bf16 %v1275_v10  ;;  %v1278_v42 = vld [vmem:[%s1473_s30 + $0x30] sm:$0xff]   ;;  %v1519_v48 = vld [vmem:[%s1473_s30 + $0x38] sm:$0xff]   ;;  %v1280_v60 = vld [vmem:[%s1473_s30 + $0x40] sm:$0xff]  }
  0x13   : > { %v311_v16 = vmul.f32 %v1131_v6, %v1482_v5  ;;  %v312_v17 = vmul.f32 %v1132_v7, %v1482_v5  ;;  %v313_v21 = vmul.f32 %v1135_v12, %v1482_v5  ;;  %v314_v22 = vmul.f32 %v1136_v13, %v1482_v5  ;;  %1334 = vmatpush3.bf16.msra.mxu0 %v1402_v3  ;;  %v1282_v9 = vld [vmem:[%s1473_s30 + $0x50] sm:$0xff]  }
  0x14   : > { %v315_v23 = vmul.f32 %v1139_v14, %v1482_v5  ;;  %v316_v24 = vmul.f32 %v1140_v15, %v1482_v5  ;;  %v317_v27 = vmul.f32 %v1143_v18, %v1482_v5  ;;  %v318_v28 = vmul.f32 %v1144_v19, %v1482_v5  ;;  %1386 = vmatpush3.bf16.msra.mxu1 %v1402_v3  ;;  %v1281_v3 = vld [vmem:[%s1473_s30 + $0x48] sm:$0xff]   ;;  %v1283_v19 = vld [vmem:[%s1473_s30 + $0x58] sm:$0xff]  }
  0x15   : > { %v350_v25 = vadd.f32 %v1490_v11, %v311_v16  ;;  %v351_v26 = vadd.f32 %v1490_v11, %v312_v17  ;;  %v352_v32 = vadd.f32 %v1490_v11, %v313_v21  ;;  %1335 = vmatprep.subr.bf16.mxu0 %v1403_v20  ;;  %v353_v35 = vadd.f32 %v1490_v11, %v314_v22 }
  0x16   : > { %v354_v36 = vadd.f32 %v1490_v11, %v315_v23  ;;  %v355_v37 = vadd.f32 %v1490_v11, %v316_v24  ;;  %1379 = vmatprep.subr.bf16.mxu1 %v1403_v20  ;;  %v356_v39 = vadd.f32 %v1490_v11, %v317_v27  ;;  %v357_v40 = vadd.f32 %v1490_v11, %v318_v28 }
  0x17   : > { %v382_v30 = vmax.f32 %v350_v25, 0.0  ;;  %v383_v31 = vmax.f32 %v351_v26, 0.0  ;;  %v1147_v41 = vunpack.c.l.bf16 %v1276_v29  ;;  %v1148_v43 = vunpack.c.h.bf16 %v1276_v29  ;;  %1336 = vmatpush3.bf16.msra.mxu0 %v1403_v20 }
  0x18   : > { %v1151_v44 = vunpack.c.l.bf16 %v1277_v33  ;;  %v384_v45 = vmax.f32 %v352_v32, 0.0  ;;  %v1152_v47 = vunpack.c.h.bf16 %v1277_v33  ;;  %1337 = vmatprep.subr.bf16.mxu0 %v1404_v34  ;;  %v385_v50 = vmax.f32 %v353_v35, 0.0  ;;  %1387 = vmatpush3.bf16.msra.mxu1 %v1403_v20  ;;  %v1284_v32 = vld [vmem:[%s1473_s30 + $0x60] sm:$0xff]  }
  0x19   : > { %v414_v38 = vpack.c.bf16 %v383_v31, %v382_v30  ;;  %v319_v46 = vmul.f32 %v1147_v41, %v1482_v5  ;;  %v386_v51 = vmax.f32 %v354_v36, 0.0  ;;  %v387_v52 = vmax.f32 %v355_v37, 0.0  ;;  %1380 = vmatprep.subr.bf16.mxu1 %v1404_v34 }
  0x1a   : > { %v1155_v53 = vunpack.c.l.bf16 %v1278_v42  ;;  %v388_v54 = vmax.f32 %v356_v39, 0.0  ;;  %v389_v55 = vmax.f32 %v357_v40, 0.0  ;;  %v320_v56 = vmul.f32 %v1148_v43, %v1482_v5 }
  0x1b   : > { %1343 = vmatprep.mubr.bf16.mxu0 %v414_v38  ;;  %v321_v57 = vmul.f32 %v1151_v44, %v1482_v5  ;;  %v1156_v58 = vunpack.c.h.bf16 %v1278_v42  ;;  %v1159_v59 = vunpack.c.l.bf16 %v1519_v48  ;;  %1338 = vmatpush3.bf16.msra.mxu0 %v1404_v34  ;;  %v1529_v61 = vadd.f32 %v1490_v11, %v319_v46 }
  0x1c   : > { %v322_v62 = vmul.f32 %v1152_v47, %v1482_v5  ;;  %1339 = vmatprep.subr.bf16.mxu0 %v1405_v49  ;;  %v415_v0 = vpack.c.bf16 %v385_v50, %v384_v45  ;;  %v416_v1 = vpack.c.bf16 %v387_v52, %v386_v51  ;;  %1388 = vmatpush3.bf16.msra.mxu1 %v1404_v34  ;;  %v1160_v7 = vunpack.c.h.bf16 %v1519_v48  ;;  %v1285_v45 = vld [vmem:[%s1473_s30 + $0x68] sm:$0xff]  }
  0x1d   : > { %v323_v2 = vmul.f32 %v1155_v53, %v1482_v5  ;;  %v1537_v4 = vpack.c.bf16 %v389_v55, %v388_v54  ;;  %v1540_v6 = vadd.f32 %v1490_v11, %v320_v56  ;;  %1381 = vmatprep.subr.bf16.mxu1 %v1405_v49  ;;  %v1163_v8 = vunpack.c.l.bf16 %v1280_v60  ;;  %v1286_v55 = vld [vmem:[%s1473_s30 + $0x70] sm:$0xff]  }
  0x1e   : > { %v1545_v10 = vadd.f32 %v1490_v11, %v321_v57  ;;  %v1548_v12 = vmul.f32 %v1156_v58, %v1482_v5  ;;  %v1551_v13 = vmul.f32 %v1159_v59, %v1482_v5  ;;  %v1164_v14 = vunpack.c.h.bf16 %v1280_v60 }
  0x1f   : > { %1340 = vmatpush3.bf16.msra.mxu0 %v1405_v49  ;;  %v390_v15 = vmax.f32 %v1529_v61, 0.0  ;;  %v1555_v16 = vadd.f32 %v1490_v11, %v322_v62  ;;  %v327_v17 = vmul.f32 %v1163_v8, %v1482_v5  ;;  %v1167_v18 = vunpack.c.l.bf16 %v1281_v3 }
  0x20   : > { %1341 = vmatprep.subr.bf16.mxu0 %v1406_v63  ;;  %1389 = vmatpush3.bf16.msra.mxu1 %v1405_v49  ;;  %v1560_v20 = vadd.f32 %v1490_v11, %v323_v2  ;;  %v328_v21 = vmul.f32 %v1164_v14, %v1482_v5  ;;  %v1168_v22 = vunpack.c.h.bf16 %v1281_v3  ;;  %v1171_v23 = vunpack.c.l.bf16 %v1282_v9 }
  0x21   : > { %v391_v24 = vmax.f32 %v1540_v6, 0.0  ;;  %1382 = vmatprep.subr.bf16.mxu1 %v1406_v63  ;;  %v366_v25 = vadd.f32 %v1490_v11, %v327_v17  ;;  %v329_v26 = vmul.f32 %v1167_v18, %v1482_v5  ;;  %v1172_v27 = vunpack.c.h.bf16 %v1282_v9  ;;  %v1287_v17 = vld [vmem:[%s1473_s30 + $0x78] sm:$0xff]  }
  0x22   : > { %v367_v28 = vadd.f32 %v1490_v11, %v328_v21  ;;  %v330_v29 = vmul.f32 %v1168_v22, %v1482_v5  ;;  %v331_v30 = vmul.f32 %v1171_v23, %v1482_v5  ;;  %v1175_v31 = vunpack.c.l.bf16 %v1283_v19 }
  0x23   : > { %1342 = vmatpush3.bf16.msra.mxu0 %v1406_v63  ;;  %v398_v33 = vmax.f32 %v366_v25, 0.0  ;;  %v368_v34 = vadd.f32 %v1490_v11, %v329_v26  ;;  %v332_v35 = vmul.f32 %v1172_v27, %v1482_v5  ;;  %v1176_v36 = vunpack.c.h.bf16 %v1283_v19 }
  0x24   : > { %1390 = vmatpush3.bf16.msra.mxu1 %v1406_v63  ;;  %v399_v37 = vmax.f32 %v367_v28, 0.0  ;;  %v369_v38 = vadd.f32 %v1490_v11, %v330_v29  ;;  %v370_v39 = vadd.f32 %v1490_v11, %v331_v30  ;;  %v333_v40 = vmul.f32 %v1175_v31, %v1482_v5 }
  0x25   : > { %v400_v41 = vmax.f32 %v368_v34, 0.0  ;;  %v371_v42 = vadd.f32 %v1490_v11, %v332_v35  ;;  %v334_v43 = vmul.f32 %v1176_v36, %v1482_v5  ;;  %v1179_v44 = vunpack.c.l.bf16 %v1284_v32 }
  0x26   : > { %1344 = vmatmul.mubr.bf16.vlgmr.msra.gmra.mrb[0].mxu0 %v415_v0  ;;  %v422_v46 = vpack.c.bf16 %v399_v37, %v398_v33  ;;  %v401_v47 = vmax.f32 %v369_v38, 0.0  ;;  %v402_v49 = vmax.f32 %v370_v39, 0.0  ;;  %v372_v50 = vadd.f32 %v1490_v11, %v333_v40 }
  0x27   : > { %1347 = vmatprep.mubr.bf16.mxu0 %v416_v1  ;;  %v403_v51 = vmax.f32 %v371_v42, 0.0  ;;  %v373_v52 = vadd.f32 %v1490_v11, %v334_v43  ;;  %v1180_v53 = vunpack.c.h.bf16 %v1284_v32  ;;  %v335_v54 = vmul.f32 %v1179_v44, %v1482_v5 }
  0x28   : > { %1359 = vmatprep.mubr.bf16.mxu1 %v422_v46  ;;  %v423_v56 = vpack.c.bf16 %v401_v47, %v400_v41  ;;  %v404_v57 = vmax.f32 %v372_v50, 0.0  ;;  %v1183_v58 = vunpack.c.l.bf16 %v1285_v45  ;;  %v1184_v59 = vunpack.c.h.bf16 %v1285_v45 }
  0x29   : > { %v424_v60 = vpack.c.bf16 %v403_v51, %v402_v49  ;;  %v405_v61 = vmax.f32 %v373_v52, 0.0  ;;  %v336_v62 = vmul.f32 %v1180_v53, %v1482_v5  ;;  %v374_v63 = vadd.f32 %v1490_v11, %v335_v54 }
  0x2a   : > { %1360 = vmatmul.mubr.bf16.vlgmr.msra.gmra.mrb[0].mxu1 %v423_v56  ;;  %v337_v0 = vmul.f32 %v1183_v58, %v1482_v5  ;;  %v338_v1 = vmul.f32 %v1184_v59, %v1482_v5  ;;  %v1187_v2 = vunpack.c.l.bf16 %v1286_v55  ;;  %v1188_v3 = vunpack.c.h.bf16 %v1286_v55 }
  0x2b   : > { %v418_v6 = vpack.c.bf16 %v391_v24, %v390_v15  ;;  %v363_v8 = vadd.f32 %v1490_v11, %v1548_v12  ;;  %1363 = vmatprep.mubr.bf16.mxu1 %v424_v60  ;;  %v375_v9 = vadd.f32 %v1490_v11, %v336_v62  ;;  %v406_v14 = vmax.f32 %v374_v63, 0.0 }
  0x2c   : > { %v392_v18 = vmax.f32 %v1545_v10, 0.0  ;;  %v326_v19 = vmul.f32 %v1160_v7, %v1482_v5  ;;  %v339_v21 = vmul.f32 %v1187_v2, %v1482_v5  ;;  %v340_v22 = vmul.f32 %v1188_v3, %v1482_v5 }
  0x2d   : > { %v393_v15 = vmax.f32 %v1555_v16, 0.0  ;;  %v394_v23 = vmax.f32 %v1560_v20, 0.0  ;;  %v425_v12 = vpack.c.bf16 %v405_v61, %v404_v57  ;;  %v407_v24 = vmax.f32 %v375_v9, 0.0 }
  0x2e   : > { %1348 = vmatmul.mubr.bf16.gmra.mrb[4].mxu0 %v1537_v4  ;;  %v376_v25 = vadd.f32 %v1490_v11, %v337_v0  ;;  %v377_v10 = vadd.f32 %v1490_v11, %v338_v1  ;;  %v1191_v26 = vunpack.c.l.bf16 %v1287_v17  ;;  %v1192_v27 = vunpack.c.h.bf16 %v1287_v17 }
  0x2f   : > { %1351 = vmatprep.mubr.bf16.mxu0 %v418_v6  ;;  %v395_v48 = vmax.f32 %v363_v8, 0.0  ;;  %v426_v7 = vpack.c.bf16 %v407_v24, %v406_v14  ;;  %v378_v28 = vadd.f32 %v1490_v11, %v339_v21  ;;  %v379_v29 = vadd.f32 %v1490_v11, %v340_v22 }
  0x30   : > { %v419_v16 = vpack.c.bf16 %v393_v15, %v392_v18  ;;  %v364_v20 = vadd.f32 %v1490_v11, %v1551_v13  ;;  %v365_v30 = vadd.f32 %v1490_v11, %v326_v19  ;;  %v408_v4 = vmax.f32 %v376_v25, 0.0 }
  0x31   : > { %v409_v31 = vmax.f32 %v377_v10, 0.0  ;;  %v341_v32 = vmul.f32 %v1191_v26, %v1482_v5  ;;  %v342_v33 = vmul.f32 %v1192_v27, %v1482_v5  ;;  %v420_v34 = vpack.c.bf16 %v395_v48, %v394_v23 }
  0x32   : > { %1364 = vmatmul.mubr.bf16.gmra.mrb[4].mxu1 %v425_v12  ;;  %v410_v35 = vmax.f32 %v378_v28, 0.0  ;;  %v411_v36 = vmax.f32 %v379_v29, 0.0  ;;  %v396_v37 = vmax.f32 %v364_v20, 0.0  ;;  %v397_v38 = vmax.f32 %v365_v30, 0.0 }
  0x33   : > { %1367 = vmatprep.mubr.bf16.mxu1 %v426_v7  ;;  %v427_v39 = vpack.c.bf16 %v409_v31, %v408_v4  ;;  %v380_v13 = vadd.f32 %v1490_v11, %v341_v32  ;;  %v381_v40 = vadd.f32 %v1490_v11, %v342_v33 }
  0x34   : > { %v428_v41 = vpack.c.bf16 %v411_v36, %v410_v35  ;;  %v421_v42 = vpack.c.bf16 %v397_v38, %v396_v37 }
  0x35   : > { %v412_v43 = vmax.f32 %v380_v13, 0.0  ;;  %v413_v44 = vmax.f32 %v381_v40, 0.0 }
  0x36   : > { %1352 = vmatmul.mubr.bf16.gmra.mrb[8].mxu0 %v419_v16 }
  0x37   : > { %1355 = vmatprep.mubr.bf16.mxu0 %v420_v34  ;;  %v429_v5 = vpack.c.bf16 %v413_v44, %v412_v43 }
  0x3a   : > { %1368 = vmatmul.mubr.bf16.gmra.mrb[8].mxu1 %v427_v39 }
  0x3b   : > { %1371 = vmatprep.mubr.bf16.mxu1 %v428_v41 }
  0x3e   : > { %1356 = vmatmul.mubr.bf16.gmra.mrb[12].mxu0 %v421_v42 }
  0x42   : > { %1372 = vmatmul.mubr.bf16.gmra.mrb[12].mxu1 %v429_v5 }
  0xf9   : > { %v1345_v45 = vpop.f32.mrb[0].mxu0 }
  0xfa   : > { %v528_v46 = vpop.f32.mrb[1].mxu0 }
  0xfb   : > { %v1346_v11 = vpop.f32.mrb[2].mxu0 }
  0xfc   : > { %v656_v47 = vpack.c.bf16 %v1346_v11, %v1345_v45  ;;  %v531_v49 = vpop.f32.mrb[3].mxu0 }
  0xfd   : > { %v655_v50 = vpack.c.bf16 %v531_v49, %v528_v46  ;;  %v1361_v51 = vpop.f32.mrb[0].mxu1 }
  0xfe   : > { %1288 = vst [vmem:[%s1615_s25 + $0x8] sm:$0xff] %v656_v47   ;;  %v592_v52 = vpop.f32.mrb[1].mxu1  ;;  %v817_v53 = vunpack.c.l.bf16 %v656_v47  ;;  %v818_v57 = vunpack.c.h.bf16 %v656_v47 }
  0xff   : > { %1197 = vst [vmem:[%s1615_s25] sm:$0xff] %v655_v50   ;;  %v815_v54 = vunpack.c.l.bf16 %v655_v50  ;;  %v816_v55 = vunpack.c.h.bf16 %v655_v50  ;;  %v1362_v56 = vpop.f32.mrb[2].mxu1 }
 0x100   : > { %v1619_v58 = vpack.c.bf16 %v1362_v56, %v1361_v51  ;;  %v595_v59 = vpop.f32.mrb[3].mxu1  ;;  %v886_v2 = vmul.f32 %v817_v53, %v817_v53  ;;  %v887_v17 = vmul.f32 %v818_v57, %v818_v57 }
 0x101   : > { %v847_v60 = vadd.f32 %v816_v55, %v815_v54  ;;  %v884_v61 = vmul.f32 %v815_v54, %v815_v54  ;;  %v885_v62 = vmul.f32 %v816_v55, %v816_v55  ;;  %v1349_v63 = vpop.f32.mrb[4].mxu0  ;;  %v1621_v0 = vpack.c.bf16 %v595_v59, %v592_v52 }
 0x102   : > { %v544_v1 = vpop.f32.mrb[5].mxu0  ;;  %1296 = vst [vmem:[%s1615_s25 + $0x48] sm:$0xff] %v1619_v58  }
 0x103   : > { %v848_v3 = vadd.f32 %v847_v60, %v817_v53  ;;  %v916_v6 = vadd.f32 %v885_v62, %v884_v61  ;;  %v1350_v8 = vpop.f32.mrb[6].mxu0  ;;  %1295 = vst [vmem:[%s1615_s25 + $0x40] sm:$0xff] %v1621_v0  }
 0x104   : > { %v658_v9 = vpack.c.bf16 %v1350_v8, %v1349_v63  ;;  %v547_v14 = vpop.f32.mrb[7].mxu0 }
 0x105   : > { %v917_v18 = vadd.f32 %v916_v6, %v886_v2  ;;  %v657_v19 = vpack.c.bf16 %v547_v14, %v544_v1  ;;  %v849_v21 = vadd.f32 %v848_v3, %v818_v57  ;;  %v1365_v22 = vpop.f32.mrb[4].mxu1 }
 0x106   : > { %1290 = vst [vmem:[%s1615_s25 + $0x18] sm:$0xff] %v658_v9   ;;  %v608_v15 = vpop.f32.mrb[5].mxu1  ;;  %v821_v27 = vunpack.c.l.bf16 %v658_v9  ;;  %v822_v16 = vunpack.c.h.bf16 %v658_v9 }
 0x107   : > { %1289 = vst [vmem:[%s1615_s25 + $0x10] sm:$0xff] %v657_v19   ;;  %v819_v23 = vunpack.c.l.bf16 %v657_v19  ;;  %v820_v12 = vunpack.c.h.bf16 %v657_v19  ;;  %v918_v24 = vadd.f32 %v917_v18, %v887_v17  ;;  %v1366_v25 = vpop.f32.mrb[6].mxu1 }
 0x108   : > { %v1629_v10 = vpack.c.bf16 %v1366_v25, %v1365_v22  ;;  %v611_v26 = vpop.f32.mrb[7].mxu1  ;;  %v890_v35 = vmul.f32 %v821_v27, %v821_v27  ;;  %v891_v13 = vmul.f32 %v822_v16, %v822_v16 }
 0x109   : > { %v850_v48 = vadd.f32 %v849_v21, %v819_v23  ;;  %v888_v7 = vmul.f32 %v819_v23, %v819_v23  ;;  %v1353_v28 = vpop.f32.mrb[8].mxu0  ;;  %v1631_v29 = vpack.c.bf16 %v611_v26, %v608_v15  ;;  %v889_v4 = vmul.f32 %v820_v12, %v820_v12 }
 0x10a   : > { %v560_v20 = vpop.f32.mrb[9].mxu0  ;;  %1298 = vst [vmem:[%s1615_s25 + $0x58] sm:$0xff] %v1629_v10  }
 0x10b   : > { %v851_v30 = vadd.f32 %v850_v48, %v820_v12  ;;  %v919_v31 = vadd.f32 %v918_v24, %v888_v7  ;;  %v1354_v32 = vpop.f32.mrb[10].mxu0  ;;  %1297 = vst [vmem:[%s1615_s25 + $0x50] sm:$0xff] %v1631_v29  }
 0x10c   : > { %v660_v33 = vpack.c.bf16 %v1354_v32, %v1353_v28  ;;  %v563_v34 = vpop.f32.mrb[11].mxu0  ;;  %v832_v32 = vunpack.c.h.bf16 %v1621_v0 }
 0x10d   : > { %v852_v36 = vadd.f32 %v851_v30, %v821_v27  ;;  %v920_v37 = vadd.f32 %v919_v31, %v889_v4  ;;  %v659_v38 = vpack.c.bf16 %v563_v34, %v560_v20  ;;  %v1369_v39 = vpop.f32.mrb[8].mxu1  ;;  %v831_v30 = vunpack.c.l.bf16 %v1621_v0 }
 0x10e   : > { %1292 = vst [vmem:[%s1615_s25 + $0x28] sm:$0xff] %v660_v33   ;;  %v624_v40 = vpop.f32.mrb[9].mxu1  ;;  %v825_v11 = vunpack.c.l.bf16 %v660_v33  ;;  %v826_v52 = vunpack.c.h.bf16 %v660_v33  ;;  %v833_v34 = vunpack.c.l.bf16 %v1619_v58  ;;  %v836_v0 = vunpack.c.h.bf16 %v1631_v29 }
 0x10f   : > { %v921_v41 = vadd.f32 %v920_v37, %v890_v35  ;;  %1291 = vst [vmem:[%s1615_s25 + $0x20] sm:$0xff] %v659_v38   ;;  %v823_v42 = vunpack.c.l.bf16 %v659_v38  ;;  %v824_v43 = vunpack.c.h.bf16 %v659_v38  ;;  %v853_v44 = vadd.f32 %v852_v36, %v822_v16  ;;  %v1370_v5 = vpop.f32.mrb[10].mxu1 }
 0x110   : > { %v1639_v45 = vpack.c.bf16 %v1370_v5, %v1369_v39  ;;  %v627_v46 = vpop.f32.mrb[11].mxu1  ;;  %v894_v62 = vmul.f32 %v825_v11, %v825_v11  ;;  %v895_v6 = vmul.f32 %v826_v52, %v826_v52  ;;  %v900_v36 = vmul.f32 %v831_v30, %v831_v30 }
 0x111   : > { %v854_v47 = vadd.f32 %v853_v44, %v823_v42  ;;  %v892_v49 = vmul.f32 %v823_v42, %v823_v42  ;;  %v922_v50 = vadd.f32 %v921_v41, %v891_v13  ;;  %v1357_v51 = vpop.f32.mrb[12].mxu0  ;;  %v1643_v54 = vpack.c.bf16 %v627_v46, %v624_v40 }
 0x112   : > { %v576_v53 = vpop.f32.mrb[13].mxu0  ;;  %1300 = vst [vmem:[%s1615_s25 + $0x68] sm:$0xff] %v1639_v45   ;;  %v893_v56 = vmul.f32 %v824_v43, %v824_v43  ;;  %v834_v38 = vunpack.c.h.bf16 %v1619_v58  ;;  %v901_v13 = vmul.f32 %v832_v32, %v832_v32  ;;  %v902_v41 = vmul.f32 %v833_v34, %v833_v34 }
 0x113   : > { %v855_v55 = vadd.f32 %v854_v47, %v824_v43  ;;  %v923_v57 = vadd.f32 %v922_v50, %v892_v49  ;;  %v1358_v59 = vpop.f32.mrb[14].mxu0  ;;  %1299 = vst [vmem:[%s1615_s25 + $0x60] sm:$0xff] %v1643_v54   ;;  %v835_v44 = vunpack.c.l.bf16 %v1631_v29  ;;  %v837_v47 = vunpack.c.l.bf16 %v1629_v10 }
 0x114   : > { %v662_v60 = vpack.c.bf16 %v1358_v59, %v1357_v51  ;;  %v579_v61 = vpop.f32.mrb[15].mxu0  ;;  %v903_v5 = vmul.f32 %v834_v38, %v834_v38  ;;  %v838_v58 = vunpack.c.h.bf16 %v1629_v10  ;;  %v840_v29 = vunpack.c.h.bf16 %v1643_v54 }
 0x115   : > { %v856_v63 = vadd.f32 %v855_v55, %v825_v11  ;;  %v924_v1 = vadd.f32 %v923_v57, %v893_v56  ;;  %v661_v2 = vpack.c.bf16 %v579_v61, %v576_v53  ;;  %v1373_v3 = vpop.f32.mrb[12].mxu1  ;;  %v904_v50 = vmul.f32 %v835_v44, %v835_v44 }
 0x116   : > { %1294 = vst [vmem:[%s1615_s25 + $0x38] sm:$0xff] %v662_v60   ;;  %v640_v8 = vpop.f32.mrb[13].mxu1  ;;  %v829_v15 = vunpack.c.l.bf16 %v662_v60  ;;  %v830_v26 = vunpack.c.h.bf16 %v662_v60  ;;  %v905_v53 = vmul.f32 %v836_v0, %v836_v0  ;;  %v906_v56 = vmul.f32 %v837_v47, %v837_v47 }
 0x117   : > { %v925_v9 = vadd.f32 %v924_v1, %v894_v62  ;;  %1293 = vst [vmem:[%s1615_s25 + $0x30] sm:$0xff] %v661_v2   ;;  %v827_v14 = vunpack.c.l.bf16 %v661_v2  ;;  %v828_v17 = vunpack.c.h.bf16 %v661_v2  ;;  %v857_v18 = vadd.f32 %v856_v63, %v826_v52  ;;  %v1374_v19 = vpop.f32.mrb[14].mxu1 }
 0x118   : > { %v1649_v21 = vpack.c.bf16 %v1374_v19, %v1373_v3  ;;  %v643_v22 = vpop.f32.mrb[15].mxu1  ;;  %v898_v28 = vmul.f32 %v829_v15, %v829_v15  ;;  %v899_v4 = vmul.f32 %v830_v26, %v830_v26  ;;  %v839_v60 = vunpack.c.l.bf16 %v1643_v54 }
 0x119   : > { %v858_v23 = vadd.f32 %v857_v18, %v827_v14  ;;  %v896_v12 = vmul.f32 %v827_v14, %v827_v14  ;;  %v926_v24 = vadd.f32 %v925_v9, %v895_v6  ;;  %v669_v25 = vpack.c.bf16 %v643_v22, %v640_v8 }
 0x11a   : > { %1302 = vst [vmem:[%s1615_s25 + $0x78] sm:$0xff] %v1649_v21   ;;  %v897_v48 = vmul.f32 %v828_v17, %v828_v17  ;;  %v907_v61 = vmul.f32 %v838_v58, %v838_v58  ;;  %v841_v1 = vunpack.c.l.bf16 %v1639_v45  ;;  %v908_v3 = vmul.f32 %v839_v60, %v839_v60 }
 0x11b   : > { %v859_v27 = vadd.f32 %v858_v23, %v828_v17  ;;  %v927_v7 = vadd.f32 %v926_v24, %v896_v12  ;;  %1301 = vst [vmem:[%s1615_s25 + $0x70] sm:$0xff] %v669_v25   ;;  %v842_v10 = vunpack.c.h.bf16 %v1639_v45  ;;  %v909_v9 = vmul.f32 %v840_v29, %v840_v29 }
 0x11c   : > { %v910_v17 = vmul.f32 %v841_v1, %v841_v1  ;;  %v843_v22 = vunpack.c.l.bf16 %v669_v25  ;;  %v844_v12 = vunpack.c.h.bf16 %v669_v25  ;;  %v845_v54 = vunpack.c.l.bf16 %v1649_v21 }
 0x11d   : > { %v860_v16 = vadd.f32 %v859_v27, %v829_v15  ;;  %v928_v20 = vadd.f32 %v927_v7, %v897_v48  ;;  %v911_v15 = vmul.f32 %v842_v10, %v842_v10  ;;  %v846_v7 = vunpack.c.h.bf16 %v1649_v21 }
 0x11e   : > { %v912_v27 = vmul.f32 %v843_v22, %v843_v22 }
 0x11f   : > { %v929_v31 = vadd.f32 %v928_v20, %v898_v28  ;;  %v861_v33 = vadd.f32 %v860_v16, %v830_v26  ;;  %v913_v28 = vmul.f32 %v844_v12, %v844_v12  ;;  %v914_v20 = vmul.f32 %v845_v54, %v845_v54 }
 0x121   : > { %v862_v35 = vadd.f32 %v861_v33, %v831_v30  ;;  %v930_v37 = vadd.f32 %v929_v31, %v899_v4  ;;  %v915_v31 = vmul.f32 %v846_v7, %v846_v7 }
 0x123   : > { %v863_v39 = vadd.f32 %v862_v35, %v832_v32  ;;  %v931_v40 = vadd.f32 %v930_v37, %v900_v36 }
 0x125   : > { %v864_v42 = vadd.f32 %v863_v39, %v833_v34  ;;  %v932_v43 = vadd.f32 %v931_v40, %v901_v13 }
 0x127   : > { %v933_v46 = vadd.f32 %v932_v43, %v902_v41  ;;  %v865_v11 = vadd.f32 %v864_v42, %v834_v38 }
 0x129   : > { %v866_v49 = vadd.f32 %v865_v11, %v835_v44  ;;  %v934_v51 = vadd.f32 %v933_v46, %v903_v5 }
 0x12b   : > { %v867_v52 = vadd.f32 %v866_v49, %v836_v0  ;;  %v935_v55 = vadd.f32 %v934_v51, %v904_v50 }
 0x12d   : > { %v868_v57 = vadd.f32 %v867_v52, %v837_v47  ;;  %v936_v59 = vadd.f32 %v935_v55, %v905_v53 }
 0x12f   : > { %v937_v62 = vadd.f32 %v936_v59, %v906_v56  ;;  %v869_v63 = vadd.f32 %v868_v57, %v838_v58 }
 0x131   : > { %v870_v2 = vadd.f32 %v869_v63, %v839_v60  ;;  %v938_v6 = vadd.f32 %v937_v62, %v907_v61 }
 0x133   : > { %v871_v8 = vadd.f32 %v870_v2, %v840_v29  ;;  %v939_v14 = vadd.f32 %v938_v6, %v908_v3 }
 0x135   : > { %v872_v18 = vadd.f32 %v871_v8, %v841_v1  ;;  %v940_v19 = vadd.f32 %v939_v14, %v909_v9 }
 0x137   : > { %v941_v23 = vadd.f32 %v940_v19, %v910_v17  ;;  %v873_v24 = vadd.f32 %v872_v18, %v842_v10 }
 0x139   : > { %v874_v26 = vadd.f32 %v873_v24, %v843_v22  ;;  %v942_v48 = vadd.f32 %v941_v23, %v911_v15 }
 0x13b   : > { %v875_v45 = vadd.f32 %v874_v26, %v844_v12  ;;  %v943_v16 = vadd.f32 %v942_v48, %v912_v27 }
 0x13d   : > { %v876_v30 = vadd.f32 %v875_v45, %v845_v54  ;;  %v944_v4 = vadd.f32 %v943_v16, %v913_v28 }
 0x13f   : > { %v877_v32 = vadd.f32 %v876_v30, %v846_v7  ;;  %v945_v33 = vadd.f32 %v944_v4, %v914_v20 }
 0x141   : > { %v878_v25 = vrot.slane %v877_v32, 4  ;;  %v946_v34 = vadd.f32 %v945_v33, %v915_v31 }
 0x143   : > { %v879_v35 = vadd.f32 %v878_v25, %v877_v32  ;;  %v947_v36 = vrot.slane %v946_v34, 4 }
 0x145   : > { %v880_v37 = vrot.slane %v879_v35, 2  ;;  %v948_v38 = vadd.f32 %v947_v36, %v946_v34 }
 0x147   : > { %v881_v39 = vadd.f32 %v880_v37, %v879_v35  ;;  %v949_v21 = vrot.slane %v948_v38, 2 }
 0x149   : > { %v882_v13 = vrot.slane %v881_v39, 1  ;;  %v950_v40 = vadd.f32 %v949_v21, %v948_v38 }
 0x14b   : > { %v951_v41 = vrot.slane %v950_v40, 1  ;;  %v883_v42 = vadd.f32 %v882_v13, %v881_v39 }
 0x14d   : > { %v952_v43 = vadd.f32 %v951_v41, %v950_v40 }
 0x14f   : > { %v954_v44 = vsel %vm953_vm0, %v883_v42, %v952_v43 }
 0x150   : > { %955 = vst [vmem:[%s238_s28] sm:$0x3] %v954_v44 }
 0x151 PF: > { %s16_s18 = sadd.s32 1, %s1413_s18  }
 0x152   : > { %p13_p5 = scmp.ge.s32.totalorder %s16_s18, 4  }
 0x154   :  { %15 = sbr.rel (!%p13_p5) target bundleno = 1 (0x1), region = 78 }

// kernel: bottleneck_forward.5
= control target key start
LH: loop header
LB: loop body
LE: loop exit
PB: predicated region body
PF: predicated region fallthrough
CT: control target
= control target key end

     0   :  { %s5054_s18 = smov 0   ;;  %s6062_s0 = inlined_call_operand.vmem [shape: bf16[2,256,128], index: 0, kind: input, shape index: {}]   ;;  %s6063_s1 = inlined_call_operand.vmem [shape: f32[1,128], index: 1, kind: input, shape index: {}]   ;;  %s6064_s2 = inlined_call_operand.vmem [shape: f32[1,128], index: 2, kind: input, shape index: {}]   ;;  %s6065_s3 = inlined_call_operand.vmem [shape: bf16[3,3,128,128], index: 3, kind: input, shape index: {}]   ;;  %s6066_s4 = inlined_call_operand.vmem [shape: bf16[2,256,128], index: 4, kind: output, shape index: {0}]   ;;  %s6067_s5 = inlined_call_operand.vmem [shape: f32[2,2,128], index: 5, kind: output, shape index: {1}]  }
   0x1 LB: > { %s3547_s19 = sadd.s32 4294967295, %s5021_s18   ;;  %p3551_p0 = scmp.ge.s32.totalorder %s5021_s18, 1  ;;  %s5021_s18 = sphi %s5054_s18, %s16_s18  }
   0x2   : > { %p190_p1 = scmp.lt.s32.totalorder %s5021_s18, 3 }
   0x4   : > { %p191_p2 = pnand %p3551_p0, %p190_p1 }
   0x6   : > { %194 = sbr.rel (%p191_p2) target bundleno = 577 (0x241), region = 36 }
   0xd   : > { %v4930_v0 = vld [vmem:[%s6065_s3 + $0x40] sm:$0xff]   ;;  %v5023_v2 = vmov 0.0   ;;  %v4932_v3 = vld [vmem:[%s6065_s3 + $0x48] sm:$0xff]   ;;  %p222_p3 = scmp.lt.s32.totalorder %s3547_s19, 1  ;;  %v4934_v5 = vld [vmem:[%s6065_s3 + $0x50] sm:$0xff]   ;;  %vm621_vm0 = vcmask 1046528  }
   0xe   : > { %v4931_v1 = vld [vmem:[%s6065_s3 + $0x100] sm:$0xff]   ;;  %411 = vst [vmem:[#allocation2] sm:$0xff] %v5023_v2  ;;  %412 = vst [vmem:[#allocation2 + $0x8] sm:$0xff] %v5023_v2  ;;  %4217 = vmatprep.subr.bf16.mxu1 %v4930_v0  ;;  %v4933_v4 = vld [vmem:[%s6065_s3 + $0x108] sm:$0xff]   ;;  %v623_v12 = vrot.slane %v5023_v2, 1  ;;  %vm1185_vm1 = vcmask 1045504  }
   0xf   : > { %413 = vst [vmem:[#allocation2 + $0x10] sm:$0x3] %v5023_v2  ;;  %415 = vst [vmem:[#allocation2 + $0x198] sm:$0xff] %v5023_v2  ;;  %4409 = vmatprep.subr.bf16.mxu0 %v4931_v1  ;;  %4218 = vmatpush3.bf16.msra.mxu1 %v4930_v0  ;;  %v4935_v6 = vld [vmem:[%s6065_s3 + $0x110] sm:$0xff]   ;;  %s6118_s19 = smov (!%p222_p3, %s3547_s19), 1  ;;  %v4936_v7 = vld [vmem:[%s6065_s3 + $0x58] sm:$0xff]  }
  0x10   : > { %417 = vst [vmem:[#allocation2 + $0x1a8] sm:$0x3] %v5023_v2  ;;  %419 = vst [vmem:[#allocation2 + $0x18] sm:$0x1] %v5023_v2  ;;  %4410 = vmatpush3.bf16.msra.mxu0 %v4931_v1  ;;  %4219 = vmatprep.subr.bf16.mxu1 %v4932_v3  ;;  %v4937_v8 = vld [vmem:[%s6065_s3 + $0x118] sm:$0xff]   ;;  %s3793_s11 = sshll.u32 %s6118_s19, 7 }
  0x11   : > { %420 = vst [vmem:[#allocation2 + $0x30] sm:$0x1] %v5023_v2  ;;  %421 = vst [vmem:[#allocation2 + $0x48] sm:$0x1] %v5023_v2  ;;  %4411 = vmatprep.subr.bf16.mxu0 %v4933_v4  ;;  %v4938_v9 = vld [vmem:[%s6065_s3 + $0x60] sm:$0xff]   ;;  %s5145_s20 = scalar_lea.vmem %s6062_s0, %s3793_s11  ;;  %v4940_v11 = vld [vmem:[%s6065_s3 + $0x68] sm:$0xff]   ;;  %s6033_s17 = scalar_lea.vmem %s6066_s4, %s3793_s11 }
  0x12   : > { %422 = vst [vmem:[#allocation2 + $0x60] sm:$0x1] %v5023_v2  ;;  %423 = vst [vmem:[#allocation2 + $0x78] sm:$0x1] %v5023_v2  ;;  %v4939_v10 = vld [vmem:[%s6065_s3 + $0x120] sm:$0xff]   ;;  %v4941_v16 = vld [vmem:[%s6065_s3 + $0x128] sm:$0xff]  }
  0x13   : > { %424 = vst [vmem:[#allocation2 + $0x90] sm:$0x1] %v5023_v2  ;;  %425 = vst [vmem:[#allocation2 + $0xa8] sm:$0x1] %v5023_v2  ;;  %4220 = vmatpush3.bf16.msra.mxu1 %v4932_v3  ;;  %v3828_v15 = vld [vmem:[%s5145_s20] sm:$0xff]   ;;  %v3971_v26 = vld [vmem:[%s5145_s20 + $0x8] sm:$0xff]  }
  0x14   : > { %426 = vst [vmem:[#allocation2 + $0xc0] sm:$0x1] %v5023_v2  ;;  %427 = vst [vmem:[#allocation2 + $0xd8] sm:$0x1] %v5023_v2  ;;  %4412 = vmatpush3.bf16.msra.mxu0 %v4933_v4  ;;  %4221 = vmatprep.subr.bf16.mxu1 %v4934_v5  ;;  %v3829_v19 = vunpack.c.l.bf16 %v3828_v15  ;;  %v5158_v20 = vld [vmem:[%s6063_s1] ss:$0 sm:$0xff]  ;;  %v3830_v21 = vunpack.c.h.bf16 %v3828_v15  ;;  %v3833_v30 = vunpack.c.l.bf16 %v3971_v26  ;;  %v3834_v31 = vunpack.c.h.bf16 %v3971_v26 }
  0x15   : > { %428 = vst [vmem:[#allocation2 + $0xf0] sm:$0x1] %v5023_v2  ;;  %429 = vst [vmem:[#allocation2 + $0x108] sm:$0x1] %v5023_v2  ;;  %4413 = vmatprep.subr.bf16.mxu0 %v4935_v6  ;;  %v5163_v22 = vld [vmem:[%s6064_s2] ss:$0 sm:$0xff] }
  0x16   : > { %430 = vst [vmem:[#allocation2 + $0x120] sm:$0x1] %v5023_v2  ;;  %431 = vst [vmem:[#allocation2 + $0x138] sm:$0x1] %v5023_v2  ;;  %v308_v25 = vmul.f32 %v3829_v19, %v5158_v20  ;;  %v4942_v27 = vld [vmem:[%s6065_s3 + $0x70] sm:$0xff]   ;;  %v309_v29 = vmul.f32 %v3830_v21, %v5158_v20  ;;  %v310_v36 = vmul.f32 %v3833_v30, %v5158_v20  ;;  %v3973_v39 = vld [vmem:[%s5145_s20 + $0x18] sm:$0xff]  }
  0x17   : > { %432 = vst [vmem:[#allocation2 + $0x150] sm:$0x1] %v5023_v2  ;;  %433 = vst [vmem:[#allocation2 + $0x168] sm:$0x1] %v5023_v2  ;;  %4222 = vmatpush3.bf16.msra.mxu1 %v4934_v5  ;;  %v4943_v32 = vld [vmem:[%s6065_s3 + $0x130] sm:$0xff]   ;;  %v311_v37 = vmul.f32 %v3834_v31, %v5158_v20  ;;  %v4944_v40 = vld [vmem:[%s6065_s3 + $0x78] sm:$0xff]   ;;  %v3841_v43 = vunpack.c.l.bf16 %v3973_v39  ;;  %v3842_v44 = vunpack.c.h.bf16 %v3973_v39 }
  0x18   : > { %434 = vst [vmem:[#allocation2 + $0x180] sm:$0x1] %v5023_v2  ;;  %437 = vst [vmem:[#allocation2 + $0x29] sm:$0x1] %v5023_v2  ;;  %4414 = vmatpush3.bf16.msra.mxu0 %v4935_v6  ;;  %4223 = vmatprep.subr.bf16.mxu1 %v4936_v7  ;;  %v347_v33 = vadd.f32 %v5163_v22, %v308_v25  ;;  %v3972_v34 = vld [vmem:[%s5145_s20 + $0x10] sm:$0xff]   ;;  %v348_v35 = vadd.f32 %v5163_v22, %v309_v29  ;;  %v4945_v45 = vld [vmem:[%s6065_s3 + $0x138] sm:$0xff]  }
  0x19   : > { %438 = vst [vmem:[#allocation2 + $0x41] sm:$0x1] %v5023_v2  ;;  %439 = vst [vmem:[#allocation2 + $0x59] sm:$0x1] %v5023_v2  ;;  %4415 = vmatprep.subr.bf16.mxu0 %v4937_v8  ;;  %v3837_v38 = vunpack.c.l.bf16 %v3972_v34  ;;  %v3838_v42 = vunpack.c.h.bf16 %v3972_v34  ;;  %v349_v47 = vadd.f32 %v5163_v22, %v310_v36  ;;  %v350_v48 = vadd.f32 %v5163_v22, %v311_v37  ;;  %v3974_v53 = vld [vmem:[%s5145_s20 + $0x20] sm:$0xff]   ;;  %v3975_v58 = vld [vmem:[%s5145_s20 + $0x28] sm:$0xff]  }
  0x1a   : > { %440 = vst [vmem:[#allocation2 + $0x71] sm:$0x1] %v5023_v2  ;;  %441 = vst [vmem:[#allocation2 + $0x89] sm:$0x1] %v5023_v2  ;;  %v379_v41 = vmax.f32 %v347_v33, 0.0  ;;  %v380_v46 = vmax.f32 %v348_v35, 0.0  ;;  %v314_v51 = vmul.f32 %v3841_v43, %v5158_v20  ;;  %v315_v52 = vmul.f32 %v3842_v44, %v5158_v20 }
  0x1b   : > { %442 = vst [vmem:[#allocation2 + $0xa1] sm:$0x1] %v5023_v2  ;;  %443 = vst [vmem:[#allocation2 + $0xb9] sm:$0x1] %v5023_v2  ;;  %4224 = vmatpush3.bf16.msra.mxu1 %v4936_v7  ;;  %v312_v49 = vmul.f32 %v3837_v38, %v5158_v20  ;;  %v313_v50 = vmul.f32 %v3838_v42, %v5158_v20  ;;  %v381_v54 = vmax.f32 %v349_v47, 0.0  ;;  %v382_v55 = vmax.f32 %v350_v48, 0.0 }
  0x1c   : > { %444 = vst [vmem:[#allocation2 + $0xd1] sm:$0x1] %v5023_v2  ;;  %445 = vst [vmem:[#allocation2 + $0xe9] sm:$0x1] %v5023_v2  ;;  %4416 = vmatpush3.bf16.msra.mxu0 %v4937_v8  ;;  %4225 = vmatprep.subr.bf16.mxu1 %v4938_v9  ;;  %v3845_v57 = vunpack.c.l.bf16 %v3974_v53  ;;  %v353_v60 = vadd.f32 %v5163_v22, %v314_v51  ;;  %v354_v61 = vadd.f32 %v5163_v22, %v315_v52  ;;  %v5203_v63 = vld [vmem:[%s6065_s3] sm:$0xff]   ;;  %v3976_v4 = vld [vmem:[%s5145_s20 + $0x30] sm:$0xff]  }
  0x1d   : > { %446 = vst [vmem:[#allocation2 + $0x101] sm:$0x1] %v5023_v2  ;;  %447 = vst [vmem:[#allocation2 + $0x119] sm:$0x1] %v5023_v2  ;;  %4417 = vmatprep.subr.bf16.mxu0 %v4939_v10  ;;  %v351_v56 = vadd.f32 %v5163_v22, %v312_v49  ;;  %v352_v59 = vadd.f32 %v5163_v22, %v313_v50  ;;  %v3846_v62 = vunpack.c.h.bf16 %v3974_v53  ;;  %v3850_v3 = vunpack.c.h.bf16 %v3975_v58  ;;  %v5210_v5 = vld [vmem:[%s6065_s3 + $0x140] sm:$0xff]   ;;  %v4949_v47 = vld [vmem:[%s6065_s3 + $0x8] sm:$0xff]  }
  0x1e   : > { %448 = vst [vmem:[#allocation2 + $0x131] sm:$0x1] %v5023_v2  ;;  %449 = vst [vmem:[#allocation2 + $0x149] sm:$0x1] %v5023_v2  ;;  %v316_v1 = vmul.f32 %v3845_v57, %v5158_v20  ;;  %v385_v7 = vmax.f32 %v353_v60, 0.0  ;;  %v386_v8 = vmax.f32 %v354_v61, 0.0 }
  0x1f   : > { %450 = vst [vmem:[#allocation2 + $0x161] sm:$0x1] %v5023_v2  ;;  %451 = vst [vmem:[#allocation2 + $0x179] sm:$0x1] %v5023_v2  ;;  %4226 = vmatpush3.bf16.msra.mxu1 %v4938_v9  ;;  %v383_v0 = vmax.f32 %v351_v56, 0.0  ;;  %v384_v6 = vmax.f32 %v352_v59, 0.0  ;;  %v317_v9 = vmul.f32 %v3846_v62, %v5158_v20 }
  0x20   : > { %452 = vst [vmem:[#allocation2 + $0x191] sm:$0x1] %v5023_v2  ;;  %418 = vst [vmem:[#allocation2] sm:$0x1] %v5023_v2  ;;  %4418 = vmatpush3.bf16.msra.mxu0 %v4939_v10  ;;  %4227 = vmatprep.subr.bf16.mxu1 %v4940_v11  ;;  %v355_v10 = vadd.f32 %v5163_v22, %v316_v1  ;;  %s3556_s11 = sshll.u32 %s6118_s19, 1  ;;  %vm3458_vm2 = vcmask 1040384  }
  0x21   : > { %436 = vst [vmem:[#allocation2 + $0x11] sm:$0x1] %v5023_v2  ;;  %435 = vst [vmem:[#allocation2 + $0x198] sm:$0x1] %v5023_v2  ;;  %4419 = vmatprep.subr.bf16.mxu0 %v4941_v16  ;;  %v356_v15 = vadd.f32 %v5163_v22, %v317_v9  ;;  %s235_s22 = scalar_lea.vmem %s6067_s5, %s3556_s11 }
  0x22   : > { %453 = vst [vmem:[#allocation2 + $0x1a9] sm:$0x1] %v5023_v2  ;;  %455 = vst [vmem:[#allocation2 + $0x19] sm:$0xff] %v379_v41  ;;  %v3849_v2 = vunpack.c.l.bf16 %v3975_v58 }
  0x23   : > { %4228 = vmatpush3.bf16.msra.mxu1 %v4940_v11  ;;  %456 = vst [vmem:[#allocation2 + $0x21] sm:$0xff] %v380_v46  ;;  %457 = vst [vmem:[#allocation2 + $0x31] sm:$0xff] %v381_v54 }
  0x24   : > { %4420 = vmatpush3.bf16.msra.mxu0 %v4941_v16  ;;  %4229 = vmatprep.subr.bf16.mxu1 %v4942_v27  ;;  %458 = vst [vmem:[#allocation2 + $0x39] sm:$0xff] %v382_v55  ;;  %459 = vst [vmem:[#allocation2 + $0x49] sm:$0xff] %v383_v0  ;;  %v318_v11 = vmul.f32 %v3849_v2, %v5158_v20  ;;  %v3854_v16 = vunpack.c.h.bf16 %v3976_v4  ;;  %v4948_v0 = vld [vmem:[%s6065_s3 + $0x148] sm:$0xff]  }
  0x25   : > { %4421 = vmatprep.subr.bf16.mxu0 %v4943_v32  ;;  %460 = vst [vmem:[#allocation2 + $0x51] sm:$0xff] %v384_v6  ;;  %461 = vst [vmem:[#allocation2 + $0x61] sm:$0xff] %v385_v7  ;;  %v3978_v6 = vld [vmem:[%s5145_s20 + $0x40] sm:$0xff]  }
  0x26   : > { %462 = vst [vmem:[#allocation2 + $0x69] sm:$0xff] %v386_v8  ;;  %v357_v19 = vadd.f32 %v5163_v22, %v318_v11 }
  0x27   : > { %v487_v13 = vld [vmem:[#allocation2] sm:$0xff]  ;;  %4230 = vmatpush3.bf16.msra.mxu1 %v4942_v27  ;;  %v388_v27 = vmax.f32 %v356_v15, 0.0 }
  0x28   : > { %v489_v14 = vld [vmem:[#allocation2 + $0x10] sm:$0x3]  ;;  %v622_v17 = vrot.slane %v487_v13, 1  ;;  %4422 = vmatpush3.bf16.msra.mxu0 %v4943_v32  ;;  %4231 = vmatprep.subr.bf16.mxu1 %v4944_v40  ;;  %v3853_v13 = vunpack.c.l.bf16 %v3976_v4  ;;  %v389_v37 = vmax.f32 %v357_v19, 0.0  ;;  %v5305_v19 = vld [vmem:[%s5145_s20 + $0x48] sm:$0xff]  }
  0x29   : > { %v625_v18 = vrot.slane %v489_v14, 1  ;;  %4423 = vmatprep.subr.bf16.mxu0 %v4945_v45  ;;  %v3977_v14 = vld [vmem:[%s5145_s20 + $0x38] sm:$0xff]   ;;  %464 = vst [vmem:[#allocation2 + $0x81] sm:$0xff] %v388_v27 }
  0x2a   : > { %v624_v23 = vsel %vm621_vm0, %v622_v17, %v623_v12  ;;  %v5218_v17 = vld [vmem:[#allocation2 + $0x18] sm:$0xff]  ;;  %v5226_v25 = vld [vmem:[#allocation2 + $0x28] sm:$0x3]  ;;  %v3857_v29 = vunpack.c.l.bf16 %v3977_v14  ;;  %v3858_v33 = vunpack.c.h.bf16 %v3977_v14  ;;  %v5237_v34 = vld [vmem:[#allocation2 + $0x30] sm:$0xff]  ;;  %465 = vst [vmem:[#allocation2 + $0x91] sm:$0xff] %v389_v37 }
  0x2b   : > { %v626_v24 = vsel %vm621_vm0, %v623_v12, %v625_v18  ;;  %v319_v12 = vmul.f32 %v3850_v3, %v5158_v20  ;;  %4232 = vmatpush3.bf16.msra.mxu1 %v4944_v40  ;;  %v387_v18 = vmax.f32 %v355_v10, 0.0  ;;  %v627_v26 = vrot.slane %v5218_v17, 1  ;;  %v5239_v35 = vld [vmem:[#allocation2 + $0x38] sm:$0xff]  ;;  %v5241_v36 = vld [vmem:[#allocation2 + $0x40] sm:$0x3]  ;;  %v5249_v46 = vld [vmem:[#allocation2 + $0x48] sm:$0xff] }
  0x2c   : > { %v734_v28 = vpack.c.bf16 %v626_v24, %v624_v23  ;;  %4424 = vmatpush3.bf16.msra.mxu0 %v4945_v45  ;;  %4265 = vmatprep.subr.bf16.mxu1 %v5203_v63  ;;  %v320_v23 = vmul.f32 %v3853_v13, %v5158_v20  ;;  %v5224_v24 = vld [vmem:[#allocation2 + $0x20] sm:$0xff]  ;;  %v630_v32 = vrot.slane %v5226_v25, 1  ;;  %v632_v42 = vrot.slane %v5237_v34, 1  ;;  %v5257_v51 = vld [vmem:[#allocation2 + $0x50] sm:$0xff]  ;;  %v5259_v52 = vld [vmem:[#allocation2 + $0x58] sm:$0x3] }
  0x2d   : > { %v358_v21 = vadd.f32 %v5163_v22, %v319_v12  ;;  %4457 = vmatprep.subr.bf16.mxu0 %v5210_v5  ;;  %v5233_v30 = vpack.c.bf16 %v5224_v24, %v5218_v17  ;;  %v628_v31 = vrot.slane %v5224_v24, 1  ;;  %463 = vst [vmem:[#allocation2 + $0x79] sm:$0xff] %v387_v18  ;;  %v633_v43 = vrot.slane %v5239_v35, 1  ;;  %v5262_v54 = vld [vmem:[#allocation2 + $0x60] sm:$0xff]  ;;  %v5268_v59 = vld [vmem:[#allocation2 + $0x68] sm:$0xff]  ;;  %v4952_v3 = vld [vmem:[%s6065_s3 + $0x10] sm:$0xff]  }
  0x2e   : > { %4233 = vmatprep.mubr.bf16.mxu1 %v734_v28  ;;  %v321_v28 = vmul.f32 %v3854_v16, %v5158_v20  ;;  %v359_v39 = vadd.f32 %v5163_v22, %v320_v23  ;;  %v635_v45 = vrot.slane %v5241_v36, 1  ;;  %v322_v49 = vmul.f32 %v3857_v29, %v5158_v20  ;;  %v5270_v60 = vld [vmem:[#allocation2 + $0x70] sm:$0x3] }
  0x2f   : > { %v390_v38 = vmax.f32 %v358_v21, 0.0  ;;  %v629_v40 = vsel %vm621_vm0, %v627_v26, %v628_v31  ;;  %v631_v41 = vsel %vm621_vm0, %v628_v31, %v630_v32  ;;  %v634_v50 = vsel %vm621_vm0, %v632_v42, %v633_v43  ;;  %v4950_v14 = vld [vmem:[%s6065_s3 + $0x150] sm:$0xff]  }
  0x30   : > { %v735_v44 = vpack.c.bf16 %v631_v41, %v629_v40  ;;  %v360_v48 = vadd.f32 %v5163_v22, %v321_v28  ;;  %v637_v53 = vrot.slane %v5249_v46, 1  ;;  %v323_v55 = vmul.f32 %v3858_v33, %v5158_v20  ;;  %v5301_v16 = vld [vmem:[#allocation2 + $0x88] sm:$0x3] }
  0x31   : > { %466 = vst [vmem:[#allocation2 + $0x99] sm:$0xff] %v390_v38  ;;  %v636_v56 = vsel %vm621_vm0, %v633_v43, %v635_v45  ;;  %v638_v57 = vrot.slane %v5257_v51, 1  ;;  %v640_v58 = vrot.slane %v5259_v52, 1  ;;  %v642_v61 = vrot.slane %v5262_v54, 1  ;;  %v5312_v27 = vld [vmem:[#allocation2 + $0x90] sm:$0xff] }
  0x32   : > { %4425 = vmatprep.mubr.bf16.mxu0 %v735_v44  ;;  %4234 = vmatmul.mubr.bf16.vlgmr.msra.gmra.mrb[0].mxu1 %v735_v44  ;;  %v5273_v62 = vpack.c.bf16 %v636_v56, %v634_v50  ;;  %v643_v1 = vrot.slane %v5268_v59, 1  ;;  %v645_v2 = vrot.slane %v5270_v60, 1  ;;  %v391_v4 = vmax.f32 %v359_v39, 0.0  ;;  %v4955_v39 = vld [vmem:[%s6065_s3 + $0x18] sm:$0xff]  }
  0x33   : > { %4266 = vmatpush3.bf16.msra.mxu1 %v5203_v63  ;;  %v639_v7 = vsel %vm621_vm0, %v637_v53, %v638_v57  ;;  %v641_v8 = vsel %vm621_vm0, %v638_v57, %v640_v58  ;;  %v392_v9 = vmax.f32 %v360_v48, 0.0  ;;  %v361_v10 = vadd.f32 %v5163_v22, %v322_v49  ;;  %v4951_v53 = vld [vmem:[%s6065_s3 + $0x158] sm:$0xff]  }
  0x34   : > { %6089 = vst [vmem:[#allocation3_spill] sm:$0xff] %v5273_v62  ;;  %4267 = vmatprep.subr.bf16.mxu1 %v4949_v47  ;;  %v5287_v63 = vld [vmem:[#allocation2 + $0x78] sm:$0xff]  ;;  %4426 = vmatmul.mubr.bf16.vlgmr.msra.gmra.mrb[0].mxu0 %v5273_v62  ;;  %v5292_v11 = vpack.c.bf16 %v641_v8, %v639_v7  ;;  %v644_v12 = vsel %vm621_vm0, %v642_v61, %v643_v1  ;;  %v5299_v15 = vld [vmem:[#allocation2 + $0x80] sm:$0xff]  ;;  %467 = vst [vmem:[#allocation2 + $0xa9] sm:$0xff] %v391_v4  ;;  %v650_v23 = vrot.slane %v5301_v16, 1 }
  0x35   : > { %4237 = vmatprep.mubr.bf16.mxu1 %v5273_v62  ;;  %v646_v13 = vsel %vm621_vm0, %v643_v1, %v645_v2  ;;  %v647_v18 = vrot.slane %v5287_v63, 1  ;;  %4458 = vmatpush3.bf16.msra.mxu0 %v5210_v5  ;;  %v648_v21 = vrot.slane %v5299_v15, 1  ;;  %468 = vst [vmem:[#allocation2 + $0xb1] sm:$0xff] %v392_v9  ;;  %v362_v26 = vadd.f32 %v5163_v22, %v323_v55  ;;  %v4958_v4 = vld [vmem:[%s6065_s3 + $0x20] sm:$0xff]  }
  0x36   : > { %6090 = vst [vmem:[#allocation4_spill] sm:$0xff] %v5292_v11  ;;  %4459 = vmatprep.subr.bf16.mxu0 %v4948_v0  ;;  %4429 = vmatprep.mubr.bf16.mxu0 %v5292_v11  ;;  %v393_v31 = vmax.f32 %v361_v10, 0.0  ;;  %v3861_v32 = vunpack.c.l.bf16 %v3978_v6  ;;  %v3862_v33 = vunpack.c.h.bf16 %v3978_v6  ;;  %v5318_v5 = vpack.c.bf16 %v646_v13, %v644_v12 }
  0x37   : > { %4268 = vmatpush3.bf16.msra.mxu1 %v4949_v47  ;;  %v649_v37 = vsel %vm621_vm0, %v647_v18, %v648_v21  ;;  %v651_v38 = vsel %vm621_vm0, %v648_v21, %v650_v23  ;;  %v652_v40 = vrot.slane %v5312_v27, 1  ;;  %v394_v43 = vmax.f32 %v362_v26, 0.0 }
  0x38   : > { %v5314_v28 = vld [vmem:[#allocation2 + $0x98] sm:$0xff]  ;;  %v5316_v29 = vld [vmem:[#allocation2 + $0xa0] sm:$0x3]  ;;  %6091 = vst [vmem:[#allocation5_spill] sm:$0xff] %v5318_v5  ;;  %4269 = vmatprep.subr.bf16.mxu1 %v4952_v3  ;;  %469 = vst [vmem:[#allocation2 + $0xc1] sm:$0xff] %v393_v31  ;;  %v5329_v44 = vpack.c.bf16 %v651_v38, %v649_v37  ;;  %v324_v45 = vmul.f32 %v3861_v32, %v5158_v20  ;;  %v325_v47 = vmul.f32 %v3862_v33, %v5158_v20 }
  0x39   : > { %v653_v41 = vrot.slane %v5314_v28, 1  ;;  %v655_v42 = vrot.slane %v5316_v29, 1  ;;  %4460 = vmatpush3.bf16.msra.mxu0 %v4948_v0  ;;  %v3865_v48 = vunpack.c.l.bf16 %v5305_v19  ;;  %v1194_v49 = vrot.slane %v5226_v25, 2  ;;  %470 = vst [vmem:[#allocation2 + $0xc9] sm:$0xff] %v394_v43  ;;  %v4960_v32 = vld [vmem:[%s6065_s3 + $0x28] sm:$0xff]  }
  0x3a   : > { %4238 = vmatmul.mubr.bf16.gmra.mrb[4].mxu1 %v5292_v11  ;;  %6092 = vst [vmem:[#allocation6_spill] sm:$0xff] %v5329_v44  ;;  %v1196_v50 = vrot.slane %v5237_v34, 2  ;;  %4461 = vmatprep.subr.bf16.mxu0 %v4950_v14  ;;  %v1191_v55 = vrot.slane %v5218_v17, 2  ;;  %v3866_v56 = vunpack.c.h.bf16 %v5305_v19  ;;  %v1192_v58 = vrot.slane %v5224_v24, 2  ;;  %v4953_v17 = vld [vmem:[%s6065_s3 + $0x160] sm:$0xff]   ;;  %v3980_v19 = vld [vmem:[%s5145_s20 + $0x50] sm:$0xff]  }
  0x3b   : > { %4241 = vmatprep.mubr.bf16.mxu1 %v5318_v5  ;;  %4270 = vmatpush3.bf16.msra.mxu1 %v4952_v3  ;;  %v5342_v57 = vld [vmem:[#allocation2 + $0xa8] sm:$0xff]  ;;  %v363_v25 = vadd.f32 %v5163_v22, %v324_v45  ;;  %v364_v61 = vadd.f32 %v5163_v22, %v325_v47  ;;  %v654_v0 = vsel %vm621_vm0, %v652_v40, %v653_v41  ;;  %v1197_v12 = vrot.slane %v5239_v35, 2  ;;  %v3981_v47 = vld [vmem:[%s5145_s20 + $0x58] sm:$0xff]  }
  0x3c   : > { %4430 = vmatmul.mubr.bf16.gmra.mrb[4].mxu0 %v5318_v5  ;;  %v656_v1 = vsel %vm621_vm0, %v653_v41, %v655_v42  ;;  %v5353_v2 = vld [vmem:[#allocation2 + $0xb0] sm:$0xff]  ;;  %v5355_v3 = vld [vmem:[#allocation2 + $0xb8] sm:$0x3]  ;;  %v657_v24 = vrot.slane %v5342_v57, 1  ;;  %4271 = vmatprep.subr.bf16.mxu1 %v4955_v39  ;;  %v326_v6 = vmul.f32 %v3865_v48, %v5158_v20  ;;  %v327_v13 = vmul.f32 %v3866_v56, %v5158_v20  ;;  %v4954_v48 = vld [vmem:[%s6065_s3 + $0x168] sm:$0xff]  }
  0x3d   : > { %4462 = vmatpush3.bf16.msra.mxu0 %v4950_v14  ;;  %4433 = vmatprep.mubr.bf16.mxu0 %v5329_v44  ;;  %v658_v7 = vrot.slane %v5353_v2, 1  ;;  %v660_v8 = vrot.slane %v5355_v3, 1  ;;  %v395_v9 = vmax.f32 %v363_v25, 0.0  ;;  %v396_v10 = vmax.f32 %v364_v61, 0.0 }
  0x3e   : > { %4463 = vmatprep.subr.bf16.mxu0 %v4951_v53  ;;  %v365_v18 = vadd.f32 %v5163_v22, %v326_v6  ;;  %v1199_v21 = vrot.slane %v5241_v36, 2  ;;  %v1193_v31 = vsel %vm1185_vm1, %v1191_v55, %v1192_v58  ;;  %v5378_v33 = vpack.c.bf16 %v656_v1, %v654_v0  ;;  %v4962_v1 = vld [vmem:[%s6065_s3 + $0x30] sm:$0xff]  }
  0x3f   : > { %v659_v14 = vsel %vm621_vm0, %v657_v24, %v658_v7  ;;  %v661_v23 = vsel %vm621_vm0, %v658_v7, %v660_v8  ;;  %v5372_v26 = vld [vmem:[#allocation2 + $0xc0] sm:$0xff]  ;;  %4272 = vmatpush3.bf16.msra.mxu1 %v4955_v39  ;;  %471 = vst [vmem:[#allocation2 + $0xd9] sm:$0xff] %v395_v9  ;;  %472 = vst [vmem:[#allocation2 + $0xe1] sm:$0xff] %v396_v10  ;;  %v366_v37 = vadd.f32 %v5163_v22, %v327_v13  ;;  %v4956_v8 = vld [vmem:[%s6065_s3 + $0x170] sm:$0xff]  }
  0x40   : > { %6093 = vst [vmem:[#allocation7_spill] sm:$0xff] %v5378_v33  ;;  %v662_v36 = vrot.slane %v5372_v26, 1  ;;  %4273 = vmatprep.subr.bf16.mxu1 %v4958_v4  ;;  %v397_v38 = vmax.f32 %v365_v18, 0.0  ;;  %v5383_v39 = vpack.c.bf16 %v661_v23, %v659_v14  ;;  %v5385_v40 = vld [vmem:[#allocation2 + $0xc8] sm:$0xff]  ;;  %v5387_v41 = vld [vmem:[#allocation2 + $0xd0] sm:$0x3]  ;;  %v1195_v42 = vsel %vm1185_vm1, %v1192_v58, %v1194_v49 }
  0x41   : > { %4464 = vmatpush3.bf16.msra.mxu0 %v4951_v53  ;;  %v3869_v43 = vunpack.c.l.bf16 %v3980_v19  ;;  %v3870_v45 = vunpack.c.h.bf16 %v3980_v19  ;;  %v663_v53 = vrot.slane %v5385_v40, 1  ;;  %v665_v55 = vrot.slane %v5387_v41, 1  ;;  %v3982_v14 = vld [vmem:[%s5145_s20 + $0x60] sm:$0xff]  }
  0x42   : > { %4242 = vmatmul.mubr.bf16.gmra.mrb[8].mxu1 %v5329_v44  ;;  %6094 = vst [vmem:[#allocation8_spill] sm:$0xff] %v5383_v39  ;;  %4465 = vmatprep.subr.bf16.mxu0 %v4953_v17  ;;  %v1198_v56 = vsel %vm1185_vm1, %v1196_v50, %v1197_v12  ;;  %v398_v25 = vmax.f32 %v366_v37, 0.0  ;;  %473 = vst [vmem:[#allocation2 + $0xf1] sm:$0xff] %v397_v38  ;;  %v1200_v49 = vsel %vm1185_vm1, %v1197_v12, %v1199_v21 }
  0x43   : > { %4245 = vmatprep.mubr.bf16.mxu1 %v5378_v33  ;;  %4274 = vmatpush3.bf16.msra.mxu1 %v4958_v4  ;;  %v1201_v58 = vrot.slane %v5249_v46, 2  ;;  %v328_v61 = vmul.f32 %v3869_v43, %v5158_v20  ;;  %v329_v0 = vmul.f32 %v3870_v45, %v5158_v20  ;;  %v664_v24 = vsel %vm621_vm0, %v662_v36, %v663_v53 }
  0x44   : > { %4434 = vmatmul.mubr.bf16.gmra.mrb[8].mxu0 %v5378_v33  ;;  %474 = vst [vmem:[#allocation2 + $0xf9] sm:$0xff] %v398_v25  ;;  %v1202_v50 = vrot.slane %v5257_v51, 2  ;;  %v1204_v6 = vrot.slane %v5259_v52, 2  ;;  %4275 = vmatprep.subr.bf16.mxu1 %v4960_v32  ;;  %v3873_v4 = vunpack.c.l.bf16 %v3981_v47  ;;  %v666_v7 = vsel %vm621_vm0, %v663_v53, %v665_v55  ;;  %v4957_v53 = vld [vmem:[%s6065_s3 + $0x178] sm:$0xff]  }
  0x45   : > { %4466 = vmatpush3.bf16.msra.mxu0 %v4953_v17  ;;  %4437 = vmatprep.mubr.bf16.mxu0 %v5383_v39  ;;  %v367_v9 = vadd.f32 %v5163_v22, %v328_v61  ;;  %v368_v10 = vadd.f32 %v5163_v22, %v329_v0  ;;  %v3874_v12 = vunpack.c.h.bf16 %v3981_v47  ;;  %v5416_v13 = vpack.c.bf16 %v1195_v42, %v1193_v31  ;;  %v4964_v47 = vld [vmem:[%s6065_s3 + $0x38] sm:$0xff]  }
  0x46   : > { %4467 = vmatprep.subr.bf16.mxu0 %v4954_v48  ;;  %v5418_v52 = vld [vmem:[#allocation2 + $0xd8] sm:$0xff]  ;;  %v5420_v18 = vld [vmem:[#allocation2 + $0xe0] sm:$0xff]  ;;  %v5422_v17 = vld [vmem:[#allocation2 + $0xe8] sm:$0x3]  ;;  %v5424_v19 = vpack.c.bf16 %v1200_v49, %v1198_v56  ;;  %v330_v21 = vmul.f32 %v3873_v4, %v5158_v20  ;;  %v5431_v31 = vpack.c.bf16 %v666_v7, %v664_v24  ;;  %v1203_v56 = vsel %vm1185_vm1, %v1201_v58, %v1202_v50 }
  0x47   : > { %v667_v23 = vrot.slane %v5418_v52, 1  ;;  %v668_v36 = vrot.slane %v5420_v18, 1  ;;  %v670_v37 = vrot.slane %v5422_v17, 1  ;;  %v399_v38 = vmax.f32 %v367_v9, 0.0  ;;  %4276 = vmatpush3.bf16.msra.mxu1 %v4960_v32  ;;  %v3983_v49 = vld [vmem:[%s5145_s20 + $0x68] sm:$0xff]  }
  0x48   : > { %6095 = vst [vmem:[#allocation9_spill] sm:$0xff] %v5431_v31  ;;  %v400_v42 = vmax.f32 %v368_v10, 0.0  ;;  %v331_v43 = vmul.f32 %v3874_v12, %v5158_v20  ;;  %v369_v45 = vadd.f32 %v5163_v22, %v330_v21  ;;  %4277 = vmatprep.subr.bf16.mxu1 %v4962_v1  ;;  %v1205_v25 = vsel %vm1185_vm1, %v1202_v50, %v1204_v6  ;;  %v5461_v10 = vld [vmem:[%s6065_s3 + $0x80] sm:$0xff]  }
  0x49   : > { %4468 = vmatpush3.bf16.msra.mxu0 %v4954_v48  ;;  %v669_v32 = vsel %vm621_vm0, %v667_v23, %v668_v36  ;;  %v5443_v55 = vld [vmem:[#allocation2 + $0xf0] sm:$0xff]  ;;  %475 = vst [vmem:[#allocation2 + $0x109] sm:$0xff] %v399_v38  ;;  %v671_v48 = vsel %vm621_vm0, %v668_v36, %v670_v37  ;;  %v1206_v58 = vrot.slane %v5262_v54, 2  ;;  %v1207_v50 = vrot.slane %v5268_v59, 2 }
  0x4a   : > { %4246 = vmatmul.mubr.bf16.gmra.mrb[12].mxu1 %v5383_v39  ;;  %4469 = vmatprep.subr.bf16.mxu0 %v4956_v8  ;;  %v672_v61 = vrot.slane %v5443_v55, 1  ;;  %476 = vst [vmem:[#allocation2 + $0x111] sm:$0xff] %v400_v42  ;;  %v370_v0 = vadd.f32 %v5163_v22, %v331_v43  ;;  %v401_v24 = vmax.f32 %v369_v45, 0.0  ;;  %v3877_v6 = vunpack.c.l.bf16 %v3982_v14  ;;  %v4959_v42 = vld [vmem:[%s6065_s3 + $0x180] sm:$0xff]  }
  0x4b   : > { %4249 = vmatprep.mubr.bf16.mxu1 %v5431_v31  ;;  %v5452_v4 = vld [vmem:[#allocation2 + $0xf8] sm:$0xff]  ;;  %v5454_v7 = vld [vmem:[#allocation2 + $0x100] sm:$0x3]  ;;  %v3878_v9 = vunpack.c.h.bf16 %v3982_v14  ;;  %4278 = vmatpush3.bf16.msra.mxu1 %v4962_v1  ;;  %v1209_v23 = vrot.slane %v5270_v60, 2  ;;  %v5468_v1 = vpack.c.bf16 %v671_v48, %v669_v32  ;;  %v1211_v14 = vrot.slane %v5287_v63, 2 }
  0x4c   : > { %4438 = vmatmul.mubr.bf16.gmra.mrb[12].mxu0 %v5431_v31  ;;  %v673_v12 = vrot.slane %v5452_v4, 1  ;;  %v675_v21 = vrot.slane %v5454_v7, 1  ;;  %v402_v36 = vmax.f32 %v370_v0, 0.0  ;;  %477 = vst [vmem:[#allocation2 + $0x121] sm:$0xff] %v401_v24  ;;  %4279 = vmatprep.subr.bf16.mxu1 %v4964_v47  ;;  %v332_v37 = vmul.f32 %v3877_v6, %v5158_v20 }
  0x4d   : > { %4470 = vmatpush3.bf16.msra.mxu0 %v4956_v8  ;;  %4473 = vmatprep.mubr.bf16.mxu0 %v5416_v13  ;;  %6096 = vst [vmem:[#allocation10_spill] sm:$0xff] %v5468_v1  ;;  %v333_v38 = vmul.f32 %v3878_v9, %v5158_v20  ;;  %v1212_v43 = vrot.slane %v5299_v15, 2  ;;  %v3881_v45 = vunpack.c.l.bf16 %v3983_v49  ;;  %v1214_v48 = vrot.slane %v5301_v16, 2 }
  0x4e   : > { %4471 = vmatprep.subr.bf16.mxu0 %v4957_v53  ;;  %v674_v60 = vsel %vm621_vm0, %v672_v61, %v673_v12  ;;  %v676_v8 = vsel %vm621_vm0, %v673_v12, %v675_v21  ;;  %478 = vst [vmem:[#allocation2 + $0x129] sm:$0xff] %v402_v36  ;;  %v371_v0 = vadd.f32 %v5163_v22, %v332_v37  ;;  %v4961_v12 = vld [vmem:[%s6065_s3 + $0x188] sm:$0xff]   ;;  %v3882_v21 = vunpack.c.h.bf16 %v3983_v49 }
  0x4f   : > { %v5479_v32 = vpack.c.bf16 %v676_v8, %v674_v60  ;;  %v372_v24 = vadd.f32 %v5163_v22, %v333_v38  ;;  %4280 = vmatpush3.bf16.msra.mxu1 %v4964_v47  ;;  %v5484_v6 = vpack.c.bf16 %v1205_v25, %v1203_v56  ;;  %v1208_v61 = vsel %vm1185_vm1, %v1206_v58, %v1207_v50  ;;  %v3984_v60 = vld [vmem:[%s5145_s20 + $0x70] sm:$0xff]  }
  0x50   : > { %v5486_v9 = vld [vmem:[#allocation2 + $0x108] sm:$0xff]  ;;  %v334_v36 = vmul.f32 %v3881_v45, %v5158_v20  ;;  %4313 = vmatprep.subr.bf16.mxu1 %v5461_v10  ;;  %v1210_v25 = vsel %vm1185_vm1, %v1207_v50, %v1209_v23  ;;  %v403_v58 = vmax.f32 %v371_v0, 0.0  ;;  %v1215_v31 = vsel %vm1185_vm1, %v1212_v43, %v1214_v48 }
  0x51   : > { %6097 = vst [vmem:[#allocation11_spill] sm:$0xff] %v5479_v32  ;;  %4472 = vmatpush3.bf16.msra.mxu0 %v4957_v53  ;;  %v5496_v16 = vld [vmem:[#allocation2 + $0x110] sm:$0xff]  ;;  %v5498_v47 = vld [vmem:[#allocation2 + $0x118] sm:$0x3]  ;;  %v677_v56 = vrot.slane %v5486_v9, 1  ;;  %v404_v37 = vmax.f32 %v372_v24, 0.0  ;;  %v335_v53 = vmul.f32 %v3882_v21, %v5158_v20  ;;  %v3885_v50 = vunpack.c.l.bf16 %v3984_v60 }
  0x52   : > { %4250 = vmatmul.mubr.bf16.gmra.mrb[16].mxu1 %v5468_v1  ;;  %4505 = vmatprep.subr.bf16.mxu0 %v4959_v42  ;;  %v678_v49 = vrot.slane %v5496_v16, 1  ;;  %v680_v38 = vrot.slane %v5498_v47, 1  ;;  %v373_v8 = vadd.f32 %v5163_v22, %v334_v36  ;;  %v1213_v1 = vsel %vm1185_vm1, %v1211_v14, %v1212_v43  ;;  %479 = vst [vmem:[#allocation2 + $0x139] sm:$0xff] %v403_v58 }
  0x53   : > { %4253 = vmatprep.mubr.bf16.mxu1 %v5479_v32  ;;  %v5507_v45 = vld [vmem:[#allocation2 + $0x120] sm:$0xff]  ;;  %480 = vst [vmem:[#allocation2 + $0x141] sm:$0xff] %v404_v37  ;;  %v3886_v23 = vunpack.c.h.bf16 %v3984_v60  ;;  %v374_v36 = vadd.f32 %v5163_v22, %v335_v53  ;;  %v5523_v58 = vpack.c.bf16 %v1210_v25, %v1208_v61  ;;  %v1216_v53 = vrot.slane %v5312_v27, 2 }
  0x54   : > { %4474 = vmatmul.mubr.bf16.vlgmr.msra.gmra.mrb[0].mxu0 %v5424_v19  ;;  %v679_v0 = vsel %vm621_vm0, %v677_v56, %v678_v49  ;;  %v681_v24 = vsel %vm621_vm0, %v678_v49, %v680_v38  ;;  %v682_v21 = vrot.slane %v5507_v45, 1  ;;  %v405_v60 = vmax.f32 %v373_v8, 0.0 }
  0x55   : > { %4506 = vmatpush3.bf16.msra.mxu0 %v4959_v42  ;;  %4477 = vmatprep.mubr.bf16.mxu0 %v5484_v6  ;;  %v5517_v14 = vpack.c.bf16 %v681_v24, %v679_v0  ;;  %v5519_v43 = vld [vmem:[#allocation2 + $0x128] sm:$0xff]  ;;  %v5521_v48 = vld [vmem:[#allocation2 + $0x130] sm:$0x3]  ;;  %v406_v49 = vmax.f32 %v374_v36, 0.0  ;;  %v5530_v38 = vpack.c.bf16 %v1215_v31, %v1213_v1  ;;  %v336_v0 = vmul.f32 %v3885_v50, %v5158_v20 }
  0x56   : > { %4507 = vmatprep.subr.bf16.mxu0 %v4961_v12  ;;  %v683_v56 = vrot.slane %v5519_v43, 1  ;;  %v685_v37 = vrot.slane %v5521_v48, 1  ;;  %v4963_v42 = vld [vmem:[%s6065_s3 + $0x190] sm:$0xff]   ;;  %481 = vst [vmem:[#allocation2 + $0x151] sm:$0xff] %v405_v60  ;;  %v337_v61 = vmul.f32 %v3886_v23, %v5158_v20  ;;  %v1217_v24 = vrot.slane %v5314_v28, 2  ;;  %v4965_v23 = vld [vmem:[%s6065_s3 + $0x198] sm:$0xff]  }
  0x57   : > { %6098 = vst [vmem:[#allocation12_spill] sm:$0xff] %v5517_v14  ;;  %v1219_v32 = vrot.slane %v5316_v29, 2  ;;  %482 = vst [vmem:[#allocation2 + $0x159] sm:$0xff] %v406_v49  ;;  %v1221_v1 = vrot.slane %v5342_v57, 2  ;;  %v375_v50 = vadd.f32 %v5163_v22, %v336_v0  ;;  %v1224_v60 = vrot.slane %v5355_v3, 2 }
  0x58   : > { %v684_v25 = vsel %vm621_vm0, %v682_v21, %v683_v56  ;;  %v686_v8 = vsel %vm621_vm0, %v683_v56, %v685_v37  ;;  %v376_v20 = vadd.f32 %v5163_v22, %v337_v61  ;;  %v1218_v0 = vsel %vm1185_vm1, %v1216_v53, %v1217_v24  ;;  %v4967_v53 = vld [vmem:[%s6065_s3 + $0x1a0] sm:$0xff]  }
  0x59   : > { %4508 = vmatpush3.bf16.msra.mxu0 %v4961_v12  ;;  %v5540_v31 = vpack.c.bf16 %v686_v8, %v684_v25  ;;  %v5548_v21 = vld [vmem:[#allocation2 + $0x138] sm:$0xff]  ;;  %v1222_v12 = vrot.slane %v5353_v2, 2  ;;  %v407_v49 = vmax.f32 %v375_v50, 0.0  ;;  %v1220_v8 = vsel %vm1185_vm1, %v1217_v24, %v1219_v32 }
  0x5a   : > { %4254 = vmatmul.mubr.bf16.gmra.mrb[20].mxu1 %v5517_v14  ;;  %v5550_v36 = vld [vmem:[#allocation2 + $0x140] sm:$0xff]  ;;  %v5552_v29 = vld [vmem:[#allocation2 + $0x148] sm:$0x3]  ;;  %4509 = vmatprep.subr.bf16.mxu0 %v4963_v42  ;;  %v687_v56 = vrot.slane %v5548_v21, 1  ;;  %v408_v61 = vmax.f32 %v376_v20, 0.0  ;;  %v5577_v20 = vpack.c.bf16 %v5239_v35, %v5237_v34  ;;  %v5592_v34 = vpack.c.bf16 %v5257_v51, %v5249_v46 }
  0x5b   : > { %6099 = vst [vmem:[#allocation13_spill] sm:$0xff] %v5540_v31  ;;  %4257 = vmatprep.mubr.bf16.mxu1 %v5540_v31  ;;  %v688_v22 = vrot.slane %v5550_v36, 1  ;;  %v690_v37 = vrot.slane %v5552_v29, 1  ;;  %483 = vst [vmem:[#allocation2 + $0x169] sm:$0xff] %v407_v49  ;;  %v1223_v50 = vsel %vm1185_vm1, %v1221_v1, %v1222_v12  ;;  %v1225_v39 = vsel %vm1185_vm1, %v1222_v12, %v1224_v60  ;;  %v4969_v51 = vld [vmem:[%s6065_s3 + $0x1a8] sm:$0xff]  }
  0x5c   : > { %4478 = vmatmul.mubr.bf16.gmra.mrb[4].mxu0 %v5523_v58  ;;  %484 = vst [vmem:[#allocation2 + $0x171] sm:$0xff] %v408_v61  ;;  %v1226_v1 = vrot.slane %v5372_v26, 2  ;;  %v1227_v12 = vrot.slane %v5385_v40, 2  ;;  %v5586_v60 = vpack.c.bf16 %v1220_v8, %v1218_v0  ;;  %v5595_v35 = vpack.c.bf16 %v1225_v39, %v1223_v50 }
  0x5d   : > { %4481 = vmatprep.mubr.bf16.mxu0 %v5530_v38  ;;  %v689_v25 = vsel %vm621_vm0, %v687_v56, %v688_v22  ;;  %v691_v3 = vsel %vm621_vm0, %v688_v22, %v690_v37  ;;  %4510 = vmatpush3.bf16.msra.mxu0 %v4963_v42  ;;  %v5568_v14 = vld [vmem:[#allocation2 + $0x150] sm:$0xff]  ;;  %v1229_v37 = vrot.slane %v5387_v41, 2  ;;  %v1231_v49 = vrot.slane %v5418_v52, 2 }
  0x5e   : > { %v5566_v31 = vpack.c.bf16 %v691_v3, %v689_v25  ;;  %4511 = vmatprep.subr.bf16.mxu0 %v4965_v23  ;;  %v5579_v32 = vld [vmem:[#allocation2 + $0x158] sm:$0xff]  ;;  %v5581_v42 = vld [vmem:[#allocation2 + $0x160] sm:$0x3]  ;;  %v692_v24 = vrot.slane %v5568_v14, 1  ;;  %6101 = vst [vmem:[#allocation15_spill] sm:$0xff] %v5595_v35  ;;  %v1232_v25 = vrot.slane %v5420_v18, 2  ;;  %v5610_v39 = vpack.c.bf16 %v5268_v59, %v5262_v54 }
  0x5f   : > { %v693_v56 = vrot.slane %v5579_v32, 1  ;;  %v695_v22 = vrot.slane %v5581_v42, 1  ;;  %v1234_v3 = vrot.slane %v5422_v17, 2  ;;  %v1236_v17 = vrot.slane %v5443_v55, 2 }
  0x60   : > { %6100 = vst [vmem:[#allocation14_spill] sm:$0xff] %v5566_v31  ;;  %v5619_v8 = vpack.c.bf16 %v5299_v15, %v5287_v63  ;;  %v4971_v63 = vld [vmem:[%s6065_s3 + $0x1b0] sm:$0xff]   ;;  %v3985_v15 = vld [vmem:[%s5145_s20 + $0x78] sm:$0xff]   ;;  %v1242_v33 = vrot.slane %v5496_v16, 2  ;;  %v5649_v44 = vpack.c.bf16 %v5314_v28, %v5312_v27 }
  0x61   : > { %4512 = vmatpush3.bf16.msra.mxu0 %v4965_v23  ;;  %v694_v0 = vsel %vm621_vm0, %v692_v24, %v693_v56  ;;  %v696_v61 = vsel %vm621_vm0, %v693_v56, %v695_v22  ;;  %v1228_v23 = vsel %vm1185_vm1, %v1226_v1, %v1227_v12  ;;  %v1230_v24 = vsel %vm1185_vm1, %v1227_v12, %v1229_v37  ;;  %v5641_v12 = vld [vmem:[#allocation2] sm:$0xff] }
  0x62   : > { %4258 = vmatmul.mubr.bf16.gmra.mrb[24].mxu1 %v5566_v31  ;;  %4513 = vmatprep.subr.bf16.mxu0 %v4967_v53  ;;  %v5603_v46 = vpack.c.bf16 %v696_v61, %v694_v0  ;;  %v5613_v41 = vld [vmem:[#allocation2 + $0x168] sm:$0xff]  ;;  %v1237_v1 = vrot.slane %v5452_v4, 2  ;;  %v1239_v56 = vrot.slane %v5454_v7, 2  ;;  %v1233_v61 = vsel %vm1185_vm1, %v1231_v49, %v1232_v25 }
  0x63   : > { %v5623_v50 = vld [vmem:[#allocation2 + $0x170] sm:$0xff]  ;;  %v5625_v54 = vld [vmem:[#allocation2 + $0x178] sm:$0x3]  ;;  %v697_v59 = vrot.slane %v5613_v41, 1  ;;  %v5639_v31 = vld [vmem:[#allocation2 + $0x8] sm:$0xff]  ;;  %v1241_v37 = vrot.slane %v5486_v9, 2  ;;  %v3889_v27 = vunpack.c.l.bf16 %v3985_v15  ;;  %v3890_v28 = vunpack.c.h.bf16 %v3985_v15 }
  0x64   : > { %6102 = vst [vmem:[#allocation16_spill] sm:$0xff] %v5603_v46  ;;  %4482 = vmatmul.mubr.bf16.gmra.mrb[8].mxu0 %v5586_v60  ;;  %4261 = vmatprep.mubr.bf16.mxu1 %v5603_v46  ;;  %v698_v22 = vrot.slane %v5623_v50, 1  ;;  %v700_v0 = vrot.slane %v5625_v54, 1  ;;  %v1235_v46 = vsel %vm1185_vm1, %v1232_v25, %v1234_v3  ;;  %v541_v7 = vpack.c.bf16 %v5639_v31, %v5641_v12 }
  0x65   : > { %4485 = vmatprep.mubr.bf16.mxu0 %v5595_v35  ;;  %4514 = vmatpush3.bf16.msra.mxu0 %v4967_v53  ;;  %v5653_v25 = vpack.c.bf16 %v1230_v24, %v1228_v23  ;;  %v1244_v3 = vrot.slane %v5498_v47, 2  ;;  %v5658_v11 = vpack.c.bf16 %v1235_v46, %v1233_v61  ;;  %v1238_v62 = vsel %vm1185_vm1, %v1236_v17, %v1237_v1  ;;  %v4973_v47 = vld [vmem:[%s6065_s3 + $0x1b8] sm:$0xff]  }
  0x66   : > { %4515 = vmatprep.subr.bf16.mxu0 %v4969_v51  ;;  %v699_v49 = vsel %vm621_vm0, %v697_v59, %v698_v22  ;;  %v701_v53 = vsel %vm621_vm0, %v698_v22, %v700_v0  ;;  %v5663_v35 = vpack.c.bf16 %v5353_v2, %v5342_v57  ;;  %v1240_v23 = vsel %vm1185_vm1, %v1237_v1, %v1239_v56  ;;  %v5004_v2 = vld [vmem:[%s6063_s1] ss:$0 sm:$0xff] }
  0x67   : > { %v5656_v5 = vpack.c.bf16 %v701_v53, %v699_v49  ;;  %v1243_v59 = vsel %vm1185_vm1, %v1241_v37, %v1242_v33  ;;  %v5673_v46 = vpack.c.bf16 %v5385_v40, %v5372_v26  ;;  %v1245_v57 = vsel %vm1185_vm1, %v1242_v33, %v1244_v3  ;;  %v5688_v26 = vld [vmem:[%s6065_s3 + $0x1c0] sm:$0xff]   ;;  %v4968_v37 = vld [vmem:[%s6065_s3 + $0x88] sm:$0xff]  }
  0x68   : > { %v339_v17 = vmul.f32 %v5004_v2, %v3890_v28  ;;  %v5683_v24 = vpack.c.bf16 %v5420_v18, %v5418_v52  ;;  %v5692_v33 = vpack.c.bf16 %v5452_v4, %v5443_v55  ;;  %v5696_v40 = vpack.c.bf16 %v5496_v16, %v5486_v9  ;;  %v5005_v52 = vld [vmem:[%s6064_s2] ss:$0 sm:$0xff] }
  0x69   : > { %4516 = vmatpush3.bf16.msra.mxu0 %v4969_v51  ;;  %v338_v51 = vmul.f32 %v5004_v2, %v3889_v27  ;;  %v5700_v1 = vpack.c.bf16 %v5519_v43, %v5507_v45  ;;  %v5707_v15 = vpack.c.bf16 %v5550_v36, %v5548_v21  ;;  %v5711_v55 = vpack.c.bf16 %v5579_v32, %v5568_v14 }
  0x6a   : > { %4262 = vmatmul.mubr.bf16.gmra.mrb[28].mxu1 %v5656_v5  ;;  %4517 = vmatprep.subr.bf16.mxu0 %v4971_v63  ;;  %v378_v56 = vadd.f32 %v5005_v52, %v339_v17  ;;  %v5715_v4 = vpack.c.bf16 %v5623_v50, %v5613_v41  ;;  %v5717_v9 = vpack.c.bf16 %v1240_v23, %v1238_v62  ;;  %v1246_v0 = vrot.slane %v5507_v45, 2 }
  0x6b   : > { %4281 = vmatprep.mubr.bf16.mxu1 %v541_v7  ;;  %v377_v18 = vadd.f32 %v5005_v52, %v338_v51  ;;  %v5719_v22 = vpack.c.bf16 %v1245_v57, %v1243_v59  ;;  %v1247_v61 = vrot.slane %v5519_v43, 2  ;;  %v1249_v7 = vrot.slane %v5521_v48, 2  ;;  %v4970_v48 = vld [vmem:[%s6065_s3 + $0x90] sm:$0xff]   ;;  %v4972_v57 = vld [vmem:[%s6065_s3 + $0x98] sm:$0xff]  }
  0x6c   : > { %4486 = vmatmul.mubr.bf16.gmra.mrb[12].mxu0 %v5653_v25  ;;  %v1251_v49 = vrot.slane %v5548_v21, 2  ;;  %v1252_v53 = vrot.slane %v5550_v36, 2  ;;  %v1254_v62 = vrot.slane %v5552_v29, 2  ;;  %v1256_v3 = vrot.slane %v5568_v14, 2 }
  0x6d   : > { %4489 = vmatprep.mubr.bf16.mxu0 %v5658_v11  ;;  %4518 = vmatpush3.bf16.msra.mxu0 %v4971_v63  ;;  %v409_v16 = vmax.f32 %v377_v18, 0.0  ;;  %v410_v63 = vmax.f32 %v378_v56, 0.0  ;;  %v1248_v45 = vsel %vm1185_vm1, %v1246_v0, %v1247_v61  ;;  %v1250_v43 = vsel %vm1185_vm1, %v1247_v61, %v1249_v7 }
  0x6e   : > { %4519 = vmatprep.subr.bf16.mxu0 %v4973_v47  ;;  %v1253_v21 = vsel %vm1185_vm1, %v1251_v49, %v1252_v53  ;;  %v1255_v36 = vsel %vm1185_vm1, %v1252_v53, %v1254_v62  ;;  %v5743_v29 = vpack.c.bf16 %v1250_v43, %v1248_v45  ;;  %v1257_v27 = vrot.slane %v5579_v32, 2  ;;  %v4978_v53 = vld [vmem:[%s6065_s3 + $0xb0] sm:$0xff]  }
  0x6f   : > { %485 = vst [vmem:[#allocation2 + $0x181] sm:$0xff] %v409_v16  ;;  %486 = vst [vmem:[#allocation2 + $0x189] sm:$0xff] %v410_v63  ;;  %v1259_v28 = vrot.slane %v5581_v42, 2  ;;  %v1261_v23 = vrot.slane %v5613_v41, 2  ;;  %v1262_v59 = vrot.slane %v5623_v50, 2  ;;  %v4974_v42 = vld [vmem:[%s6065_s3 + $0xa0] sm:$0xff]  }
  0x70   : > { %v1258_v14 = vsel %vm1185_vm1, %v1256_v3, %v1257_v27  ;;  %v4976_v63 = vld [vmem:[%s6065_s3 + $0xa8] sm:$0xff]  }
  0x71   : > { %4520 = vmatpush3.bf16.msra.mxu0 %v4973_v47  ;;  %v1264_v47 = vrot.slane %v5625_v54, 2  ;;  %v1260_v32 = vsel %vm1185_vm1, %v1257_v27, %v1259_v28  ;;  %v1263_v41 = vsel %vm1185_vm1, %v1261_v23, %v1262_v59  ;;  %v4977_v3 = vld [vmem:[%s6065_s3 + $0x1c8] sm:$0xff]   ;;  %v4979_v27 = vld [vmem:[%s6065_s3 + $0x1d0] sm:$0xff]   ;;  %v4981_v28 = vld [vmem:[%s6065_s3 + $0x1d8] sm:$0xff]  }
  0x72   : > { %4282 = vmatmul.mubr.bf16.vlgmr.msra.gmra.mrb[0].mxu1 %v5233_v30  ;;  %4553 = vmatprep.subr.bf16.mxu0 %v5688_v26  ;;  %v5771_v17 = vpack.c.bf16 %v1260_v32, %v1258_v14  ;;  %v5006_v23 = vld [vmem:[#allocation2 + $0x10] sm:$0x3]  ;;  %v4985_v14 = vld [vmem:[%s6065_s3 + $0x1e8] sm:$0xff]  }
  0x73   : > { %4314 = vmatpush3.bf16.msra.mxu1 %v5461_v10  ;;  %4285 = vmatprep.mubr.bf16.mxu1 %v5577_v20  ;;  %v5745_v10 = vpack.c.bf16 %v1255_v36, %v1253_v21  ;;  %v1265_v50 = vsel %vm1185_vm1, %v1262_v59, %v1264_v47  ;;  %v4980_v21 = vld [vmem:[%s6065_s3 + $0xb8] sm:$0xff]   ;;  %v4982_v36 = vld [vmem:[%s6065_s3 + $0xc0] sm:$0xff]   ;;  %v1189_v59 = vrot.slane %v5006_v23, 2  ;;  %v1186_v47 = vrot.slane %v5641_v12, 2  ;;  %v4987_v12 = vld [vmem:[%s6065_s3 + $0x1f0] sm:$0xff]  }
  0x74   : > { %4490 = vmatmul.mubr.bf16.gmra.mrb[16].mxu0 %v5717_v9  ;;  %4315 = vmatprep.subr.bf16.mxu1 %v4968_v37  ;;  %v5773_v52 = vpack.c.bf16 %v1265_v50, %v1263_v41  ;;  %v4989_v50 = vld [vmem:[%s6065_s3 + $0x1f8] sm:$0xff]   ;;  %v6106_v23 = vld [vmem:[#allocation5_spill] sm:$0xff] }
  0x75   : > { %4493 = vmatprep.mubr.bf16.mxu0 %v5719_v22 }
  0x76   : > { %v5767_v54 = vld [vmem:[#allocation2 + $0x180] sm:$0xff]  ;;  %v5769_v2 = vld [vmem:[#allocation2 + $0x188] sm:$0xff]  ;;  %v537_v51 = vld [vmem:[#allocation2 + $0x190] sm:$0x3] }
  0x77   : > { %4316 = vmatpush3.bf16.msra.mxu1 %v4968_v37  ;;  %v2100_v18 = vrot.slane %v5767_v54, 2  ;;  %v2101_v56 = vrot.slane %v5769_v2, 2  ;;  %v2103_v16 = vrot.slane %v537_v51, 2  ;;  %v1834_v0 = vrot.slane %v5767_v54, 1 }
  0x78   : > { %4317 = vmatprep.subr.bf16.mxu1 %v4970_v48  ;;  %v1835_v61 = vrot.slane %v5769_v2, 1  ;;  %v1837_v7 = vrot.slane %v537_v51, 1  ;;  %v4991_v51 = vld [vmem:[%s6065_s3 + $0x200] sm:$0xff]  }
  0x79   : > { %v2102_v37 = vsel %vm1185_vm1, %v2100_v18, %v2101_v56  ;;  %v2104_v49 = vsel %vm1185_vm1, %v2101_v56, %v2103_v16  ;;  %v4984_v18 = vld [vmem:[%s6065_s3 + $0xc8] sm:$0xff]   ;;  %v4986_v56 = vld [vmem:[%s6065_s3 + $0xd0] sm:$0xff]   ;;  %v4988_v16 = vld [vmem:[%s6065_s3 + $0xd8] sm:$0xff]  }
  0x7a   : > { %4286 = vmatmul.mubr.bf16.gmra.mrb[4].mxu1 %v5592_v34  ;;  %v1836_v62 = vsel %vm621_vm0, %v1834_v0, %v1835_v61  ;;  %v1838_v45 = vsel %vm621_vm0, %v1835_v61, %v1837_v7  ;;  %v4992_v0 = vld [vmem:[%s6065_s3 + $0xe8] sm:$0xff]   ;;  %v5881_v61 = vld [vmem:[#allocation2 + $0x198] sm:$0xff] }
  0x7b   : > { %4289 = vmatprep.mubr.bf16.mxu1 %v5610_v39  ;;  %4318 = vmatpush3.bf16.msra.mxu1 %v4970_v48  ;;  %v5793_v43 = vpack.c.bf16 %v1838_v45, %v1836_v62  ;;  %v5795_v48 = vpack.c.bf16 %v2104_v49, %v2102_v37  ;;  %v2894_v7 = vrot.slane %v5881_v61, 2  ;;  %v2366_v49 = vpack.c.bf16 %v5639_v31, %v5881_v61  ;;  %v4996_v45 = vld [vmem:[%s6065_s3 + $0xf8] sm:$0xff]  }
  0x7c   : > { %4494 = vmatmul.mubr.bf16.gmra.mrb[20].mxu0 %v5743_v29  ;;  %4319 = vmatprep.subr.bf16.mxu1 %v4972_v57 }
  0x7d   : > { %4497 = vmatprep.mubr.bf16.mxu0 %v5745_v10 }
  0x7f   : > { %4320 = vmatpush3.bf16.msra.mxu1 %v4972_v57  ;;  %v1187_v57 = vrot.slane %v5639_v31, 2 }
  0x80   : > { %4321 = vmatprep.subr.bf16.mxu1 %v4974_v42 }
  0x81   : > { %v1188_v32 = vsel %vm1185_vm1, %v1186_v47, %v1187_v57  ;;  %v4997_v47 = vld [vmem:[%s6065_s3 + $0x218] sm:$0xff]  }
  0x82   : > { %4290 = vmatmul.mubr.bf16.gmra.mrb[8].mxu1 %v5619_v8 }
  0x83   : > { %4293 = vmatprep.mubr.bf16.mxu1 %v5649_v44  ;;  %4322 = vmatpush3.bf16.msra.mxu1 %v4974_v42  ;;  %v1190_v42 = vsel %vm1185_vm1, %v1187_v57, %v1189_v59  ;;  %v4995_v59 = vld [vmem:[%s6065_s3 + $0x210] sm:$0xff]  }
  0x84   : > { %4498 = vmatmul.mubr.bf16.gmra.mrb[24].mxu0 %v5771_v17  ;;  %4323 = vmatprep.subr.bf16.mxu1 %v4976_v63  ;;  %v1298_v41 = vpack.c.bf16 %v1190_v42, %v1188_v32  ;;  %v4998_v32 = vld [vmem:[%s6065_s3 + $0x220] sm:$0xff]   ;;  %v4999_v42 = vld [vmem:[%s6065_s3 + $0x228] sm:$0xff]  }
  0x85   : > { %4501 = vmatprep.mubr.bf16.mxu0 %v5773_v52 }
  0x87   : > { %4324 = vmatpush3.bf16.msra.mxu1 %v4976_v63  ;;  %v5873_v63 = vpack.c.bf16 %v5769_v2, %v5767_v54  ;;  %v4994_v54 = vld [vmem:[%s6065_s3 + $0xf0] sm:$0xff]   ;;  %v5888_v2 = vld [vmem:[#allocation2 + $0x1a8] sm:$0x3] }
  0x88   : > { %4325 = vmatprep.subr.bf16.mxu1 %v4978_v53  ;;  %v2897_v37 = vrot.slane %v5888_v2, 2 }
  0x8a   : > { %4294 = vmatmul.mubr.bf16.gmra.mrb[12].mxu1 %v5663_v35  ;;  %v5897_v62 = vsel %vm1185_vm1, %v1187_v57, %v2897_v37  ;;  %v2629_v37 = vrot.slane %v5639_v31, 1 }
  0x8b   : > { %4297 = vmatprep.mubr.bf16.mxu1 %v5673_v46  ;;  %4326 = vmatpush3.bf16.msra.mxu1 %v4978_v53  ;;  %v5894_v53 = vsel %vm1185_vm1, %v2894_v7, %v1187_v57  ;;  %v6107_v57 = vld [vmem:[#allocation6_spill] sm:$0xff]  ;;  %v5010_v7 = vld [vmem:[%s6065_s3 + $0x118] sm:$0xff]  }
  0x8c   : > { %4502 = vmatmul.mubr.bf16.gmra.mrb[28].mxu0 %v5795_v48  ;;  %4327 = vmatprep.subr.bf16.mxu1 %v4980_v21 }
  0x8d   : > { %4521 = vmatprep.mubr.bf16.mxu0 %v5577_v20 }
  0x8f   : > { %4328 = vmatpush3.bf16.msra.mxu1 %v4980_v21  ;;  %v2901_v21 = vpack.c.bf16 %v5897_v62, %v5894_v53 }
  0x90   : > { %4361 = vmatprep.subr.bf16.mxu1 %v4982_v36 }
  0x92   : > { %4298 = vmatmul.mubr.bf16.gmra.mrb[16].mxu1 %v5683_v24 }
  0x93   : > { %4301 = vmatprep.mubr.bf16.mxu1 %v5692_v33 }
  0x94   : > { %4522 = vmatmul.mubr.bf16.vlgmr.msra.gmra.mrb[0].mxu0 %v5592_v34 }
  0x95   : > { %4554 = vmatpush3.bf16.msra.mxu0 %v5688_v26  ;;  %4525 = vmatprep.mubr.bf16.mxu0 %v5610_v39  ;;  %v4983_v26 = vld [vmem:[%s6065_s3 + $0x1e0] sm:$0xff]  }
  0x96   : > { %4555 = vmatprep.subr.bf16.mxu0 %v4977_v3 }
  0x99   : > { %4556 = vmatpush3.bf16.msra.mxu0 %v4977_v3  ;;  %v6104_v3 = vld [vmem:[#allocation3_spill] sm:$0xff] }
  0x9a   : > { %4557 = vmatprep.subr.bf16.mxu0 %v4979_v27  ;;  %4302 = vmatmul.mubr.bf16.gmra.mrb[20].mxu1 %v5696_v40 }
  0x9b   : > { %4305 = vmatprep.mubr.bf16.mxu1 %v5700_v1 }
  0x9c   : > { %4526 = vmatmul.mubr.bf16.gmra.mrb[4].mxu0 %v5619_v8 }
  0x9d   : > { %4529 = vmatprep.mubr.bf16.mxu0 %v5649_v44  ;;  %4558 = vmatpush3.bf16.msra.mxu0 %v4979_v27  ;;  %v4993_v27 = vld [vmem:[%s6065_s3 + $0x208] sm:$0xff]  }
  0x9e   : > { %4559 = vmatprep.subr.bf16.mxu0 %v4981_v28 }
  0xa1   : > { %4560 = vmatpush3.bf16.msra.mxu0 %v4981_v28  ;;  %v5007_v28 = vld [vmem:[%s6065_s3 + $0x100] sm:$0xff]  }
  0xa2   : > { %4561 = vmatprep.subr.bf16.mxu0 %v4983_v26  ;;  %4306 = vmatmul.mubr.bf16.gmra.mrb[24].mxu1 %v5707_v15 }
  0xa3   : > { %4309 = vmatprep.mubr.bf16.mxu1 %v5711_v55 }
  0xa4   : > { %4530 = vmatmul.mubr.bf16.gmra.mrb[8].mxu0 %v5663_v35 }
  0xa5   : > { %4533 = vmatprep.mubr.bf16.mxu0 %v5673_v46  ;;  %4562 = vmatpush3.bf16.msra.mxu0 %v4983_v26  ;;  %v6105_v26 = vld [vmem:[#allocation4_spill] sm:$0xff] }
  0xa6   : > { %4563 = vmatprep.subr.bf16.mxu0 %v4985_v14 }
  0xa9   : > { %4564 = vmatpush3.bf16.msra.mxu0 %v4985_v14  ;;  %v6108_v14 = vld [vmem:[#allocation7_spill] sm:$0xff] }
  0xaa   : > { %4565 = vmatprep.subr.bf16.mxu0 %v4987_v12  ;;  %4310 = vmatmul.mubr.bf16.gmra.mrb[28].mxu1 %v5715_v4 }
  0xab   : > { %4329 = vmatprep.mubr.bf16.mxu1 %v1298_v41  ;;  %v6110_v41 = vld [vmem:[#allocation9_spill] sm:$0xff] }
  0xac   : > { %4534 = vmatmul.mubr.bf16.gmra.mrb[12].mxu0 %v5683_v24 }
  0xad   : > { %4537 = vmatprep.mubr.bf16.mxu0 %v5692_v33  ;;  %4566 = vmatpush3.bf16.msra.mxu0 %v4987_v12  ;;  %v6109_v12 = vld [vmem:[#allocation8_spill] sm:$0xff] }
  0xae   : > { %4567 = vmatprep.subr.bf16.mxu0 %v4989_v50 }
  0xb1   : > { %4568 = vmatpush3.bf16.msra.mxu0 %v4989_v50  ;;  %v5000_v50 = vld [vmem:[%s6065_s3 + $0x230] sm:$0xff]  }
  0xb2   : > { %4601 = vmatprep.subr.bf16.mxu0 %v4991_v51  ;;  %4330 = vmatmul.mubr.bf16.vlgmr.msra.gmra.mrb[0].mxu1 %v5416_v13  ;;  %v4990_v13 = vld [vmem:[%s6065_s3 + $0xe0] sm:$0xff]  }
  0xb3   : > { %4362 = vmatpush3.bf16.msra.mxu1 %v4982_v36  ;;  %4333 = vmatprep.mubr.bf16.mxu1 %v5424_v19  ;;  %v6103_v36 = vld [vmem:[#allocation15_spill] sm:$0xff] }
  0xb4   : > { %4538 = vmatmul.mubr.bf16.gmra.mrb[16].mxu0 %v5696_v40  ;;  %4363 = vmatprep.subr.bf16.mxu1 %v4984_v18 }
  0xb5   : > { %4541 = vmatprep.mubr.bf16.mxu0 %v5700_v1 }
  0xb7   : > { %4364 = vmatpush3.bf16.msra.mxu1 %v4984_v18  ;;  %v6111_v18 = vld [vmem:[#allocation10_spill] sm:$0xff] }
  0xb8   : > { %4365 = vmatprep.subr.bf16.mxu1 %v4986_v56 }
  0xba   : > { %4334 = vmatmul.mubr.bf16.gmra.mrb[4].mxu1 %v5484_v6 }
  0xbb   : > { %4337 = vmatprep.mubr.bf16.mxu1 %v5523_v58  ;;  %4366 = vmatpush3.bf16.msra.mxu1 %v4986_v56  ;;  %v6112_v56 = vld [vmem:[#allocation11_spill] sm:$0xff] }
  0xbc   : > { %4542 = vmatmul.mubr.bf16.gmra.mrb[20].mxu0 %v5707_v15  ;;  %4367 = vmatprep.subr.bf16.mxu1 %v4988_v16 }
  0xbd   : > { %4545 = vmatprep.mubr.bf16.mxu0 %v5711_v55 }
  0xbf   : > { %4368 = vmatpush3.bf16.msra.mxu1 %v4988_v16  ;;  %v6113_v16 = vld [vmem:[#allocation12_spill] sm:$0xff] }
  0xc0   : > { %4369 = vmatprep.subr.bf16.mxu1 %v4990_v13 }
  0xc2   : > { %4338 = vmatmul.mubr.bf16.gmra.mrb[8].mxu1 %v5530_v38 }
  0xc3   : > { %4341 = vmatprep.mubr.bf16.mxu1 %v5586_v60  ;;  %4370 = vmatpush3.bf16.msra.mxu1 %v4990_v13  ;;  %v6114_v13 = vld [vmem:[#allocation13_spill] sm:$0xff] }
  0xc4   : > { %4546 = vmatmul.mubr.bf16.gmra.mrb[24].mxu0 %v5715_v4  ;;  %4371 = vmatprep.subr.bf16.mxu1 %v4992_v0 }
  0xc5   : > { %4549 = vmatprep.mubr.bf16.mxu0 %v5873_v63 }
  0xc7   : > { %4372 = vmatpush3.bf16.msra.mxu1 %v4992_v0  ;;  %v5008_v0 = vld [vmem:[%s6065_s3 + $0x108] sm:$0xff]  }
  0xc8   : > { %4373 = vmatprep.subr.bf16.mxu1 %v4994_v54 }
  0xca   : > { %4342 = vmatmul.mubr.bf16.gmra.mrb[12].mxu1 %v6103_v36 }
  0xcb   : > { %4345 = vmatprep.mubr.bf16.mxu1 %v5653_v25  ;;  %4374 = vmatpush3.bf16.msra.mxu1 %v4994_v54  ;;  %v2628_v54 = vrot.slane %v5881_v61, 1  ;;  %v5012_v61 = vld [vmem:[%s6065_s3 + $0x128] sm:$0xff]  }
  0xcc   : > { %4550 = vmatmul.mubr.bf16.gmra.mrb[28].mxu0 %v2366_v49  ;;  %4375 = vmatprep.subr.bf16.mxu1 %v4996_v45  ;;  %v2631_v49 = vrot.slane %v5888_v2, 1 }
  0xcd   : > { %4569 = vmatprep.mubr.bf16.mxu0 %v6104_v3 }
  0xce   : > { %v2632_v31 = vsel %vm621_vm0, %v2629_v37, %v2631_v49 }
  0xcf   : > { %4376 = vmatpush3.bf16.msra.mxu1 %v4996_v45 }
  0xd0   : > { %4649 = vmatprep.subr.bf16.mxu1 %v5007_v28 }
  0xd2   : > { %4346 = vmatmul.mubr.bf16.gmra.mrb[16].mxu1 %v5658_v11 }
  0xd3   : > { %4349 = vmatprep.mubr.bf16.mxu1 %v5717_v9 }
  0xd4   : > { %4570 = vmatmul.mubr.bf16.vlgmr.msra.gmra.mrb[0].mxu0 %v6105_v26 }
  0xd5   : > { %4602 = vmatpush3.bf16.msra.mxu0 %v4991_v51  ;;  %4573 = vmatprep.mubr.bf16.mxu0 %v6106_v23  ;;  %v5001_v51 = vld [vmem:[%s6065_s3 + $0x238] sm:$0xff]  }
  0xd6   : > { %4603 = vmatprep.subr.bf16.mxu0 %v4993_v27 }
  0xd9   : > { %4604 = vmatpush3.bf16.msra.mxu0 %v4993_v27 }
  0xda   : > { %4605 = vmatprep.subr.bf16.mxu0 %v4995_v59  ;;  %4350 = vmatmul.mubr.bf16.gmra.mrb[20].mxu1 %v5719_v22 }
  0xdb   : > { %4353 = vmatprep.mubr.bf16.mxu1 %v5743_v29 }
  0xdc   : > { %4574 = vmatmul.mubr.bf16.gmra.mrb[4].mxu0 %v6107_v57 }
  0xdd   : > { %4577 = vmatprep.mubr.bf16.mxu0 %v6108_v14  ;;  %4606 = vmatpush3.bf16.msra.mxu0 %v4995_v59 }
  0xde   : > { %4607 = vmatprep.subr.bf16.mxu0 %v4997_v47 }
  0xe1   : > { %4608 = vmatpush3.bf16.msra.mxu0 %v4997_v47 }
  0xe2   : > { %4609 = vmatprep.subr.bf16.mxu0 %v4998_v32  ;;  %4354 = vmatmul.mubr.bf16.gmra.mrb[24].mxu1 %v5745_v10 }
  0xe3   : > { %4357 = vmatprep.mubr.bf16.mxu1 %v5771_v17 }
  0xe4   : > { %4578 = vmatmul.mubr.bf16.gmra.mrb[8].mxu0 %v6109_v12 }
  0xe5   : > { %4581 = vmatprep.mubr.bf16.mxu0 %v6110_v41  ;;  %4610 = vmatpush3.bf16.msra.mxu0 %v4998_v32 }
  0xe6   : > { %4611 = vmatprep.subr.bf16.mxu0 %v4999_v42 }
  0xe9   : > { %4612 = vmatpush3.bf16.msra.mxu0 %v4999_v42 }
  0xea   : > { %4613 = vmatprep.subr.bf16.mxu0 %v5000_v50  ;;  %4358 = vmatmul.mubr.bf16.gmra.mrb[28].mxu1 %v5773_v52 }
  0xeb   : > { %4377 = vmatprep.mubr.bf16.mxu1 %v5233_v30  ;;  %v5009_v30 = vld [vmem:[%s6065_s3 + $0x110] sm:$0xff]  }
  0xec   : > { %4582 = vmatmul.mubr.bf16.gmra.mrb[12].mxu0 %v6111_v18 }
  0xed   : > { %4585 = vmatprep.mubr.bf16.mxu0 %v6112_v56  ;;  %4614 = vmatpush3.bf16.msra.mxu0 %v5000_v50 }
  0xee   : > { %4615 = vmatprep.subr.bf16.mxu0 %v5001_v51 }
  0xf1   : > { %4616 = vmatpush3.bf16.msra.mxu0 %v5001_v51 }
  0xf2   : > { %4378 = vmatmul.mubr.bf16.vlgmr.msra.gmra.mrb[0].mxu1 %v5577_v20  ;;  %v6115_v20 = vld [vmem:[#allocation14_spill] sm:$0xff] }
  0xf3   : > { %4657 = vmatpush3.bf16.msra.mxu1 %v5007_v28  ;;  %4381 = vmatprep.mubr.bf16.mxu1 %v5592_v34  ;;  %v6116_v34 = vld [vmem:[#allocation16_spill] sm:$0xff] }
  0xf4   : > { %4586 = vmatmul.mubr.bf16.gmra.mrb[16].mxu0 %v6113_v16  ;;  %4650 = vmatprep.subr.bf16.mxu1 %v5008_v0 }
  0xf5   : > { %4589 = vmatprep.mubr.bf16.mxu0 %v6114_v13 }
  0xf7   : > { %4658 = vmatpush3.bf16.msra.mxu1 %v5008_v0 }
  0xf8   : > { %4651 = vmatprep.subr.bf16.mxu1 %v5009_v30 }
  0xfa   : > { %4382 = vmatmul.mubr.bf16.gmra.mrb[4].mxu1 %v5610_v39  ;;  %v5011_v39 = vld [vmem:[%s6065_s3 + $0x120] sm:$0xff]  }
  0xfb   : > { %4385 = vmatprep.mubr.bf16.mxu1 %v5619_v8  ;;  %4659 = vmatpush3.bf16.msra.mxu1 %v5009_v30  ;;  %v2630_v8 = vsel %vm621_vm0, %v2628_v54, %v2629_v37 }
  0xfc   : > { %4590 = vmatmul.mubr.bf16.gmra.mrb[20].mxu0 %v6115_v20  ;;  %4652 = vmatprep.subr.bf16.mxu1 %v5010_v7  ;;  %v2635_v2 = vpack.c.bf16 %v2632_v31, %v2630_v8 }
  0xfd   : > { %4593 = vmatprep.mubr.bf16.mxu0 %v6116_v34 }
  0xff   : > { %4660 = vmatpush3.bf16.msra.mxu1 %v5010_v7 }
 0x100   : > { %4653 = vmatprep.subr.bf16.mxu1 %v5011_v39 }
 0x102   : > { %4386 = vmatmul.mubr.bf16.gmra.mrb[8].mxu1 %v5649_v44  ;;  %v5013_v44 = vld [vmem:[%s6065_s3 + $0x130] sm:$0xff]  }
 0x103   : > { %4389 = vmatprep.mubr.bf16.mxu1 %v5663_v35  ;;  %4661 = vmatpush3.bf16.msra.mxu1 %v5011_v39  ;;  %v5014_v35 = vld [vmem:[%s6065_s3 + $0x138] sm:$0xff]  }
 0x104   : > { %4594 = vmatmul.mubr.bf16.gmra.mrb[24].mxu0 %v5656_v5  ;;  %4654 = vmatprep.subr.bf16.mxu1 %v5012_v61 }
 0x105   : > { %4597 = vmatprep.mubr.bf16.mxu0 %v5793_v43 }
 0x107   : > { %4662 = vmatpush3.bf16.msra.mxu1 %v5012_v61 }
 0x108   : > { %4655 = vmatprep.subr.bf16.mxu1 %v5013_v44 }
 0x10a   : > { %4390 = vmatmul.mubr.bf16.gmra.mrb[12].mxu1 %v5673_v46 }
 0x10b   : > { %4393 = vmatprep.mubr.bf16.mxu1 %v5683_v24  ;;  %4663 = vmatpush3.bf16.msra.mxu1 %v5013_v44 }
 0x10c   : > { %4598 = vmatmul.mubr.bf16.gmra.mrb[28].mxu0 %v2635_v2  ;;  %4656 = vmatprep.subr.bf16.mxu1 %v5014_v35 }
 0x10d   : > { %4617 = vmatprep.mubr.bf16.mxu0 %v5424_v19 }
 0x10f   : > { %4664 = vmatpush3.bf16.msra.mxu1 %v5014_v35 }
 0x112   : > { %4394 = vmatmul.mubr.bf16.gmra.mrb[16].mxu1 %v5692_v33 }
 0x113   : > { %4397 = vmatprep.mubr.bf16.mxu1 %v5696_v40 }
 0x114   : > { %4618 = vmatmul.mubr.bf16.vlgmr.msra.gmra.mrb[0].mxu0 %v5484_v6 }
 0x115   : > { %4621 = vmatprep.mubr.bf16.mxu0 %v5523_v58 }
 0x11a   : > { %4398 = vmatmul.mubr.bf16.gmra.mrb[20].mxu1 %v5700_v1 }
 0x11b   : > { %4401 = vmatprep.mubr.bf16.mxu1 %v5707_v15 }
 0x11c   : > { %4622 = vmatmul.mubr.bf16.gmra.mrb[4].mxu0 %v5530_v38 }
 0x11d   : > { %4625 = vmatprep.mubr.bf16.mxu0 %v5586_v60 }
 0x122   : > { %4402 = vmatmul.mubr.bf16.gmra.mrb[24].mxu1 %v5711_v55 }
 0x123   : > { %4405 = vmatprep.mubr.bf16.mxu1 %v5715_v4 }
 0x124   : > { %4626 = vmatmul.mubr.bf16.gmra.mrb[8].mxu0 %v6103_v36 }
 0x125   : > { %4629 = vmatprep.mubr.bf16.mxu0 %v5653_v25 }
 0x12a   : > { %4406 = vmatmul.mubr.bf16.gmra.mrb[28].mxu1 %v5873_v63 }
 0x12b   : > { %4441 = vmatprep.mubr.bf16.mxu1 %v6111_v18 }
 0x12c   : > { %4630 = vmatmul.mubr.bf16.gmra.mrb[12].mxu0 %v5658_v11 }
 0x12d   : > { %4633 = vmatprep.mubr.bf16.mxu0 %v5717_v9 }
 0x132   : > { %4442 = vmatmul.mubr.bf16.vlgmr.msra.gmra.mrb[16].mxu1 %v6112_v56 }
 0x133   : > { %4445 = vmatprep.mubr.bf16.mxu1 %v6113_v16 }
 0x134   : > { %4634 = vmatmul.mubr.bf16.gmra.mrb[16].mxu0 %v5719_v22 }
 0x135   : > { %4637 = vmatprep.mubr.bf16.mxu0 %v5743_v29 }
 0x13a   : > { %4446 = vmatmul.mubr.bf16.gmra.mrb[20].mxu1 %v6114_v13 }
 0x13b   : > { %4449 = vmatprep.mubr.bf16.mxu1 %v6115_v20 }
 0x13c   : > { %4638 = vmatmul.mubr.bf16.gmra.mrb[20].mxu0 %v5745_v10 }
 0x13d   : > { %4641 = vmatprep.mubr.bf16.mxu0 %v5771_v17 }
 0x142   : > { %4450 = vmatmul.mubr.bf16.gmra.mrb[24].mxu1 %v6116_v34 }
 0x143   : > { %4453 = vmatprep.mubr.bf16.mxu1 %v5656_v5 }
 0x144   : > { %4642 = vmatmul.mubr.bf16.gmra.mrb[24].mxu0 %v5773_v52 }
 0x145   : > { %4645 = vmatprep.mubr.bf16.mxu0 %v5795_v48 }
 0x14a   : > { %4454 = vmatmul.mubr.bf16.gmra.mrb[28].mxu1 %v5793_v43 }
 0x14c   : > { %4646 = vmatmul.mubr.bf16.gmra.mrb[28].mxu0 %v2901_v21 }
 0x1c5   : > { %v4379_v11 = vpop.f32.mrb[0].mxu1 }
 0x1c6   : > { %v1672_v19 = vpop.f32.mrb[1].mxu1 }
 0x1c7   : > { %v4380_v6 = vpop.f32.mrb[2].mxu1 }
 0x1c8   : > { %v1675_v58 = vpop.f32.mrb[3].mxu1 }
 0x1cd   : > { %v4383_v38 = vpop.f32.mrb[4].mxu1 }
 0x1ce   : > { %v1688_v60 = vpop.f32.mrb[5].mxu1 }
 0x1cf   : > { %v4384_v25 = vpop.f32.mrb[6].mxu1 }
 0x1d0   : > { %v1691_v46 = vpop.f32.mrb[7].mxu1 }
 0x1d5   : > { %v4387_v24 = vpop.f32.mrb[8].mxu1 }
 0x1d6   : > { %v1704_v33 = vpop.f32.mrb[9].mxu1 }
 0x1d7   : > { %v4388_v5 = vpop.f32.mrb[10].mxu1 }
 0x1d8   : > { %v1707_v40 = vpop.f32.mrb[11].mxu1 }
 0x1dd   : > { %v6020_v1 = vpop.f32.mrb[12].mxu1 }
 0x1de   : > { %v6022_v15 = vpop.f32.mrb[13].mxu1 }
 0x1df   : > { %v6024_v55 = vpop.f32.mrb[14].mxu1 }
 0x1e0   : > { %v6026_v4 = vpop.f32.mrb[15].mxu1 }
 0x1e7   : > { %v4619_v9 = vpop.f32.mrb[0].mxu0 }
 0x1e8   : > { %v4665_v22 = vadd.f32 %v4619_v9, %v4379_v11  ;;  %v3001_v29 = vpop.f32.mrb[1].mxu0 }
 0x1e9   : > { %v4666_v10 = vadd.f32 %v3001_v29, %v1672_v19  ;;  %v4620_v17 = vpop.f32.mrb[2].mxu0 }
 0x1ea   : > { %v4667_v52 = vadd.f32 %v4620_v17, %v4380_v6  ;;  %v3004_v43 = vpop.f32.mrb[3].mxu0 }
 0x1eb   : > { %v4668_v48 = vadd.f32 %v3004_v43, %v1675_v58 }
 0x1ec   : > { %v3161_v63 = vpack.c.bf16 %v4667_v52, %v4665_v22 }
 0x1ed   : > { %v3160_v53 = vpack.c.bf16 %v4668_v48, %v4666_v10 }
 0x1ee   : > { %3986 = vst [vmem:[%s6033_s17 + $0x8] sm:$0xff] %v3161_v63   ;;  %v3322_v62 = vunpack.c.l.bf16 %v3161_v63  ;;  %v3323_v3 = vunpack.c.h.bf16 %v3161_v63 }
 0x1ef   : > { %3895 = vst [vmem:[%s6033_s17] sm:$0xff] %v3160_v53   ;;  %v3320_v45 = vunpack.c.l.bf16 %v3160_v53  ;;  %v3321_v21 = vunpack.c.h.bf16 %v3160_v53  ;;  %v4623_v36 = vpop.f32.mrb[4].mxu0 }
 0x1f0   : > { %v4669_v27 = vadd.f32 %v4623_v36, %v4383_v38  ;;  %v3017_v28 = vpop.f32.mrb[5].mxu0  ;;  %v3391_v42 = vmul.f32 %v3322_v62, %v3322_v62  ;;  %v3392_v18 = vmul.f32 %v3323_v3, %v3323_v3 }
 0x1f1   : > { %v3352_v26 = vadd.f32 %v3321_v21, %v3320_v45  ;;  %v3389_v23 = vmul.f32 %v3320_v45, %v3320_v45  ;;  %v3390_v59 = vmul.f32 %v3321_v21, %v3321_v21  ;;  %v4670_v47 = vadd.f32 %v3017_v28, %v1688_v60  ;;  %v4624_v57 = vpop.f32.mrb[6].mxu0 }
 0x1f2   : > { %v4671_v14 = vadd.f32 %v4624_v57, %v4384_v25  ;;  %v3020_v32 = vpop.f32.mrb[7].mxu0 }
 0x1f3   : > { %v3353_v12 = vadd.f32 %v3352_v26, %v3322_v62  ;;  %v3421_v41 = vadd.f32 %v3390_v59, %v3389_v23  ;;  %v4672_v50 = vadd.f32 %v3020_v32, %v1691_v46 }
 0x1f4   : > { %v3163_v51 = vpack.c.bf16 %v4671_v14, %v4669_v27 }
 0x1f5   : > { %v3422_v56 = vadd.f32 %v3421_v41, %v3391_v42  ;;  %v3162_v16 = vpack.c.bf16 %v4672_v50, %v4670_v47  ;;  %v3354_v13 = vadd.f32 %v3353_v12, %v3323_v3 }
 0x1f6   : > { %3988 = vst [vmem:[%s6033_s17 + $0x18] sm:$0xff] %v3163_v51   ;;  %v3326_v37 = vunpack.c.l.bf16 %v3163_v51  ;;  %v3327_v61 = vunpack.c.h.bf16 %v3163_v51 }
 0x1f7   : > { %3987 = vst [vmem:[%s6033_s17 + $0x10] sm:$0xff] %v3162_v16   ;;  %v3324_v0 = vunpack.c.l.bf16 %v3162_v16  ;;  %v3325_v30 = vunpack.c.h.bf16 %v3162_v16  ;;  %v3423_v20 = vadd.f32 %v3422_v56, %v3392_v18  ;;  %v4627_v34 = vpop.f32.mrb[8].mxu0 }
 0x1f8   : > { %v4673_v7 = vadd.f32 %v4627_v34, %v4387_v24  ;;  %v3033_v54 = vpop.f32.mrb[9].mxu0  ;;  %v3395_v38 = vmul.f32 %v3326_v37, %v3326_v37  ;;  %v3396_v24 = vmul.f32 %v3327_v61, %v3327_v61 }
 0x1f9   : > { %v3355_v49 = vadd.f32 %v3354_v13, %v3324_v0  ;;  %v3393_v39 = vmul.f32 %v3324_v0, %v3324_v0  ;;  %v4674_v8 = vadd.f32 %v3033_v54, %v1704_v33  ;;  %v4628_v31 = vpop.f32.mrb[10].mxu0  ;;  %v3394_v11 = vmul.f32 %v3325_v30, %v3325_v30 }
 0x1fa   : > { %v4675_v2 = vadd.f32 %v4628_v31, %v4388_v5  ;;  %v3036_v44 = vpop.f32.mrb[11].mxu0 }
 0x1fb   : > { %v3356_v35 = vadd.f32 %v3355_v49, %v3325_v30  ;;  %v3424_v19 = vadd.f32 %v3423_v20, %v3393_v39  ;;  %v4676_v6 = vadd.f32 %v3036_v44, %v1707_v40 }
 0x1fc   : > { %v3165_v58 = vpack.c.bf16 %v4675_v2, %v4673_v7 }
 0x1fd   : > { %v3357_v60 = vadd.f32 %v3356_v35, %v3326_v37  ;;  %v3425_v25 = vadd.f32 %v3424_v19, %v3394_v11  ;;  %v3164_v46 = vpack.c.bf16 %v4676_v6, %v4674_v8 }
 0x1fe   : > { %3990 = vst [vmem:[%s6033_s17 + $0x28] sm:$0xff] %v3165_v58   ;;  %v3330_v52 = vunpack.c.l.bf16 %v3165_v58  ;;  %v3331_v53 = vunpack.c.h.bf16 %v3165_v58 }
 0x1ff   : > { %v3426_v9 = vadd.f32 %v3425_v25, %v3395_v38  ;;  %3989 = vst [vmem:[%s6033_s17 + $0x20] sm:$0xff] %v3164_v46   ;;  %v3328_v22 = vunpack.c.l.bf16 %v3164_v46  ;;  %v3329_v33 = vunpack.c.h.bf16 %v3164_v46  ;;  %v3358_v29 = vadd.f32 %v3357_v60, %v3327_v61  ;;  %v4631_v10 = vpop.f32.mrb[12].mxu0 }
 0x200   : > { %v4677_v5 = vadd.f32 %v4631_v10, %v6020_v1  ;;  %v3049_v17 = vpop.f32.mrb[13].mxu0  ;;  %v3399_v26 = vmul.f32 %v3330_v52, %v3330_v52  ;;  %v3400_v57 = vmul.f32 %v3331_v53, %v3331_v53 }
 0x201   : > { %v3359_v43 = vadd.f32 %v3358_v29, %v3328_v22  ;;  %v3397_v48 = vmul.f32 %v3328_v22, %v3328_v22  ;;  %v3427_v40 = vadd.f32 %v3426_v9, %v3396_v24  ;;  %v4632_v63 = vpop.f32.mrb[14].mxu0  ;;  %v4678_v62 = vadd.f32 %v3049_v17, %v6022_v15 }
 0x202   : > { %v4679_v45 = vadd.f32 %v4632_v63, %v6024_v55  ;;  %v3052_v21 = vpop.f32.mrb[15].mxu0  ;;  %v3398_v3 = vmul.f32 %v3329_v33, %v3329_v33 }
 0x203   : > { %v3360_v36 = vadd.f32 %v3359_v43, %v3329_v33  ;;  %v3428_v27 = vadd.f32 %v3427_v40, %v3397_v48  ;;  %v4680_v28 = vadd.f32 %v3052_v21, %v6026_v4 }
 0x204   : > { %v3167_v1 = vpack.c.bf16 %v4679_v45, %v4677_v5 }
 0x205   : > { %v3361_v23 = vadd.f32 %v3360_v36, %v3330_v52  ;;  %v3429_v59 = vadd.f32 %v3428_v27, %v3398_v3  ;;  %v3166_v47 = vpack.c.bf16 %v4680_v28, %v4678_v62  ;;  %v4443_v14 = vpop.f32.mrb[16].mxu1 }
 0x206   : > { %3992 = vst [vmem:[%s6033_s17 + $0x38] sm:$0xff] %v3167_v1   ;;  %v2005_v41 = vpop.f32.mrb[17].mxu1  ;;  %v3334_v56 = vunpack.c.l.bf16 %v3167_v1  ;;  %v3335_v20 = vunpack.c.h.bf16 %v3167_v1 }
 0x207   : > { %v3430_v32 = vadd.f32 %v3429_v59, %v3399_v26  ;;  %3991 = vst [vmem:[%s6033_s17 + $0x30] sm:$0xff] %v3166_v47   ;;  %v3332_v15 = vunpack.c.l.bf16 %v3166_v47  ;;  %v3333_v42 = vunpack.c.h.bf16 %v3166_v47  ;;  %v3362_v12 = vadd.f32 %v3361_v23, %v3331_v53  ;;  %v4635_v55 = vpop.f32.mrb[16].mxu0  ;;  %v4444_v18 = vpop.f32.mrb[18].mxu1 }
 0x208   : > { %v4681_v50 = vadd.f32 %v4635_v55, %v4443_v14  ;;  %v3065_v51 = vpop.f32.mrb[17].mxu0  ;;  %v2008_v30 = vpop.f32.mrb[19].mxu1  ;;  %v3403_v61 = vmul.f32 %v3334_v56, %v3334_v56  ;;  %v3404_v11 = vmul.f32 %v3335_v20, %v3335_v20 }
 0x209   : > { %v3363_v4 = vadd.f32 %v3362_v12, %v3332_v15  ;;  %v3401_v16 = vmul.f32 %v3332_v15, %v3332_v15  ;;  %v3431_v13 = vadd.f32 %v3430_v32, %v3400_v57  ;;  %v4636_v0 = vpop.f32.mrb[18].mxu0  ;;  %v4682_v34 = vadd.f32 %v3065_v51, %v2005_v41 }
 0x20a   : > { %v4683_v7 = vadd.f32 %v4636_v0, %v4444_v18  ;;  %v3068_v54 = vpop.f32.mrb[19].mxu0  ;;  %v3402_v49 = vmul.f32 %v3333_v42, %v3333_v42 }
 0x20b   : > { %v3364_v37 = vadd.f32 %v3363_v4, %v3333_v42  ;;  %v3432_v39 = vadd.f32 %v3431_v13, %v3401_v16  ;;  %v4684_v8 = vadd.f32 %v3068_v54, %v2008_v30 }
 0x20c   : > { %v3169_v31 = vpack.c.bf16 %v4683_v7, %v4681_v50 }
 0x20d   : > { %v3365_v2 = vadd.f32 %v3364_v37, %v3334_v56  ;;  %v3433_v44 = vadd.f32 %v3432_v39, %v3402_v49  ;;  %v3168_v35 = vpack.c.bf16 %v4684_v8, %v4682_v34  ;;  %v4447_v19 = vpop.f32.mrb[20].mxu1 }
 0x20e   : > { %3994 = vst [vmem:[%s6033_s17 + $0x48] sm:$0xff] %v3169_v31   ;;  %v2021_v46 = vpop.f32.mrb[21].mxu1  ;;  %v3338_v33 = vunpack.c.l.bf16 %v3169_v31  ;;  %v3339_v43 = vunpack.c.h.bf16 %v3169_v31 }
 0x20f   : > { %v3434_v6 = vadd.f32 %v3433_v44, %v3403_v61  ;;  %3993 = vst [vmem:[%s6033_s17 + $0x40] sm:$0xff] %v3168_v35   ;;  %v3336_v58 = vunpack.c.l.bf16 %v3168_v35  ;;  %v3337_v38 = vunpack.c.h.bf16 %v3168_v35  ;;  %v3366_v60 = vadd.f32 %v3365_v2, %v3335_v20  ;;  %v4639_v25 = vpop.f32.mrb[20].mxu0  ;;  %v4448_v22 = vpop.f32.mrb[22].mxu1 }
 0x210   : > { %v4685_v24 = vadd.f32 %v4639_v25, %v4447_v19  ;;  %v3081_v9 = vpop.f32.mrb[21].mxu0  ;;  %v2024_v52 = vpop.f32.mrb[23].mxu1  ;;  %v3407_v3 = vmul.f32 %v3338_v33, %v3338_v33  ;;  %v3408_v26 = vmul.f32 %v3339_v43, %v3339_v43 }
 0x211   : > { %v3367_v29 = vadd.f32 %v3366_v60, %v3336_v58  ;;  %v3405_v10 = vmul.f32 %v3336_v58, %v3336_v58  ;;  %v3435_v5 = vadd.f32 %v3434_v6, %v3404_v11  ;;  %v4640_v17 = vpop.f32.mrb[22].mxu0  ;;  %v4686_v48 = vadd.f32 %v3081_v9, %v2021_v46 }
 0x212   : > { %v4687_v40 = vadd.f32 %v4640_v17, %v4448_v22  ;;  %v3084_v63 = vpop.f32.mrb[23].mxu0  ;;  %v3406_v62 = vmul.f32 %v3337_v38, %v3337_v38 }
 0x213   : > { %v3368_v53 = vadd.f32 %v3367_v29, %v3337_v38  ;;  %v3436_v45 = vadd.f32 %v3435_v5, %v3405_v10  ;;  %v4688_v21 = vadd.f32 %v3084_v63, %v2024_v52 }
 0x214   : > { %v3171_v36 = vpack.c.bf16 %v4687_v40, %v4685_v24 }
 0x215   : > { %v3369_v27 = vadd.f32 %v3368_v53, %v3338_v33  ;;  %v3437_v28 = vadd.f32 %v3436_v45, %v3406_v62  ;;  %v3170_v1 = vpack.c.bf16 %v4688_v21, %v4686_v48  ;;  %v4451_v23 = vpop.f32.mrb[24].mxu1 }
 0x216   : > { %3996 = vst [vmem:[%s6033_s17 + $0x58] sm:$0xff] %v3171_v36   ;;  %v2037_v15 = vpop.f32.mrb[25].mxu1  ;;  %v3342_v41 = vunpack.c.l.bf16 %v3171_v36  ;;  %v3343_v16 = vunpack.c.h.bf16 %v3171_v36 }
 0x217   : > { %v3438_v59 = vadd.f32 %v3437_v28, %v3407_v3  ;;  %3995 = vst [vmem:[%s6033_s17 + $0x50] sm:$0xff] %v3170_v1   ;;  %v3340_v47 = vunpack.c.l.bf16 %v3170_v1  ;;  %v3341_v57 = vunpack.c.h.bf16 %v3170_v1  ;;  %v3370_v14 = vadd.f32 %v3369_v27, %v3339_v43  ;;  %v4643_v32 = vpop.f32.mrb[24].mxu0  ;;  %v4452_v55 = vpop.f32.mrb[26].mxu1 }
 0x218   : > { %v4689_v42 = vadd.f32 %v4643_v32, %v4451_v23  ;;  %v3097_v12 = vpop.f32.mrb[25].mxu0  ;;  %v2040_v4 = vpop.f32.mrb[27].mxu1  ;;  %v3411_v49 = vmul.f32 %v3342_v41, %v3342_v41  ;;  %v3412_v61 = vmul.f32 %v3343_v16, %v3343_v16 }
 0x219   : > { %v3371_v50 = vadd.f32 %v3370_v14, %v3340_v47  ;;  %v3409_v51 = vmul.f32 %v3340_v47, %v3340_v47  ;;  %v3439_v18 = vadd.f32 %v3438_v59, %v3408_v26  ;;  %v4644_v56 = vpop.f32.mrb[26].mxu0  ;;  %v4690_v13 = vadd.f32 %v3097_v12, %v2037_v15 }
 0x21a   : > { %v4691_v0 = vadd.f32 %v4644_v56, %v4452_v55  ;;  %v3100_v30 = vpop.f32.mrb[27].mxu0  ;;  %v3410_v34 = vmul.f32 %v3341_v57, %v3341_v57 }
 0x21b   : > { %v3372_v20 = vadd.f32 %v3371_v50, %v3341_v57  ;;  %v3440_v7 = vadd.f32 %v3439_v18, %v3409_v51  ;;  %v4692_v54 = vadd.f32 %v3100_v30, %v2040_v4 }
 0x21c   : > { %v3173_v37 = vpack.c.bf16 %v4691_v0, %v4689_v42 }
 0x21d   : > { %v3373_v39 = vadd.f32 %v3372_v20, %v3342_v41  ;;  %v3441_v8 = vadd.f32 %v3440_v7, %v3410_v34  ;;  %v3172_v31 = vpack.c.bf16 %v4692_v54, %v4690_v13  ;;  %v4455_v2 = vpop.f32.mrb[28].mxu1 }
 0x21e   : > { %3998 = vst [vmem:[%s6033_s17 + $0x68] sm:$0xff] %v3173_v37   ;;  %v2053_v58 = vpop.f32.mrb[29].mxu1  ;;  %v3346_v46 = vunpack.c.l.bf16 %v3173_v37  ;;  %v3347_v10 = vunpack.c.h.bf16 %v3173_v37 }
 0x21f   : > { %v3442_v44 = vadd.f32 %v3441_v8, %v3411_v49  ;;  %3997 = vst [vmem:[%s6033_s17 + $0x60] sm:$0xff] %v3172_v31   ;;  %v3344_v35 = vunpack.c.l.bf16 %v3172_v31  ;;  %v3345_v11 = vunpack.c.h.bf16 %v3172_v31  ;;  %v3374_v19 = vadd.f32 %v3373_v39, %v3343_v16  ;;  %v4647_v6 = vpop.f32.mrb[28].mxu0  ;;  %v4456_v25 = vpop.f32.mrb[30].mxu1 }
 0x220   : > { %v4693_v38 = vadd.f32 %v4647_v6, %v4455_v2  ;;  %v3113_v60 = vpop.f32.mrb[29].mxu0  ;;  %v2056_v29 = vpop.f32.mrb[31].mxu1  ;;  %v3415_v62 = vmul.f32 %v3346_v46, %v3346_v46  ;;  %v3416_v3 = vmul.f32 %v3347_v10, %v3347_v10 }
 0x221   : > { %v3375_v24 = vadd.f32 %v3374_v19, %v3344_v35  ;;  %v3413_v9 = vmul.f32 %v3344_v35, %v3344_v35  ;;  %v3443_v22 = vadd.f32 %v3442_v44, %v3412_v61  ;;  %v4648_v33 = vpop.f32.mrb[30].mxu0  ;;  %v4694_v5 = vadd.f32 %v3113_v60, %v2053_v58 }
 0x222   : > { %v4695_v17 = vadd.f32 %v4648_v33, %v4456_v25  ;;  %v3116_v52 = vpop.f32.mrb[31].mxu0  ;;  %v3414_v48 = vmul.f32 %v3345_v11, %v3345_v11 }
 0x223   : > { %v3376_v43 = vadd.f32 %v3375_v24, %v3345_v11  ;;  %v3444_v40 = vadd.f32 %v3443_v22, %v3413_v9  ;;  %v4696_v63 = vadd.f32 %v3116_v52, %v2056_v29 }
 0x224   : > { %v3175_v53 = vpack.c.bf16 %v4695_v17, %v4693_v38 }
 0x225   : > { %v3377_v45 = vadd.f32 %v3376_v43, %v3346_v46  ;;  %v3445_v21 = vadd.f32 %v3444_v40, %v3414_v48  ;;  %v3174_v36 = vpack.c.bf16 %v4696_v63, %v4694_v5 }
 0x226   : > { %4000 = vst [vmem:[%s6033_s17 + $0x78] sm:$0xff] %v3175_v53   ;;  %v3350_v23 = vunpack.c.l.bf16 %v3175_v53  ;;  %v3351_v14 = vunpack.c.h.bf16 %v3175_v53 }
 0x227   : > { %v3446_v27 = vadd.f32 %v3445_v21, %v3415_v62  ;;  %3999 = vst [vmem:[%s6033_s17 + $0x70] sm:$0xff] %v3174_v36   ;;  %v3348_v28 = vunpack.c.l.bf16 %v3174_v36  ;;  %v3349_v1 = vunpack.c.h.bf16 %v3174_v36  ;;  %v3378_v26 = vadd.f32 %v3377_v45, %v3347_v10 }
 0x228   : > { %v3419_v12 = vmul.f32 %v3350_v23, %v3350_v23  ;;  %v3420_v50 = vmul.f32 %v3351_v14, %v3351_v14 }
 0x229   : > { %v3379_v59 = vadd.f32 %v3378_v26, %v3348_v28  ;;  %v3417_v47 = vmul.f32 %v3348_v28, %v3348_v28  ;;  %v3447_v57 = vadd.f32 %v3446_v27, %v3416_v3  ;;  %v3418_v15 = vmul.f32 %v3349_v1, %v3349_v1 }
 0x22b   : > { %v3380_v32 = vadd.f32 %v3379_v59, %v3349_v1  ;;  %v3448_v42 = vadd.f32 %v3447_v57, %v3417_v47 }
 0x22d   : > { %v3381_v55 = vadd.f32 %v3380_v32, %v3350_v23  ;;  %v3449_v41 = vadd.f32 %v3448_v42, %v3418_v15 }
 0x22f   : > { %v3382_v51 = vadd.f32 %v3381_v55, %v3351_v14  ;;  %v3450_v18 = vadd.f32 %v3449_v41, %v3419_v12 }
 0x231   : > { %v3383_v56 = vrot.slane %v3382_v51, 4  ;;  %v3451_v4 = vadd.f32 %v3450_v18, %v3420_v50 }
 0x233   : > { %v3384_v16 = vadd.f32 %v3383_v56, %v3382_v51  ;;  %v3452_v13 = vrot.slane %v3451_v4, 4 }
 0x235   : > { %v3385_v0 = vrot.slane %v3384_v16, 2  ;;  %v3453_v30 = vadd.f32 %v3452_v13, %v3451_v4 }
 0x237   : > { %v3386_v20 = vadd.f32 %v3385_v0, %v3384_v16  ;;  %v3454_v34 = vrot.slane %v3453_v30, 2 }
 0x239   : > { %v3387_v7 = vrot.slane %v3386_v20, 1  ;;  %v3455_v54 = vadd.f32 %v3454_v34, %v3453_v30 }
 0x23b   : > { %v3456_v37 = vrot.slane %v3455_v54, 1  ;;  %v3388_v49 = vadd.f32 %v3387_v7, %v3386_v20 }
 0x23d   : > { %v3457_v39 = vadd.f32 %v3456_v37, %v3455_v54 }
 0x23f   : > { %v3459_v8 = vsel %vm3458_vm2, %v3388_v49, %v3457_v39 }
 0x240   : > { %3460 = vst [vmem:[%s235_s22] sm:$0x3] %v3459_v8 }
 0x241 PF: > { %s16_s18 = sadd.s32 1, %s5021_s18  }
 0x242   : > { %p13_p4 = scmp.ge.s32.totalorder %s16_s18, 4  }
 0x244   :  { %15 = sbr.rel (!%p13_p4) target bundleno = 1 (0x1), region = 88 }

</bundles_post_ra>
